<compile_context>
chip_gen: v7x
topology: tpu7x:2x2x1
jax: 0.10.0
libtpu: 0.0.40
codegen_flags: <defaults>
</compile_context>

<pallas_src>
import functools

import jax
import jax.numpy as jnp
from jax.experimental import pallas as pl
from jax.experimental.pallas import tpu as pltpu

ACT_DTYPE = jnp.bfloat16           # activation-stream dtype (f32 accumulation in-kernel)
VMEM_LIMIT = 48 * 1024 * 1024      # fits v7x's 64 MiB physical VMEM with headroom


def _mosaic_params(*sem):
    return pltpu.CompilerParams(dimension_semantics=sem,
                                vmem_limit_bytes=VMEM_LIMIT)


# ----------------------------------------------------------------------------
# Pallas kernels
# ----------------------------------------------------------------------------
def _conv1x1_kernel(x_ref, w_ref, b_ref, o_ref, *, act):
    # (Cout, Cin) @ (Cin, tm) -> lane-dense (Cout, tm); f32 accumulate + epilogue.
    acc = jnp.dot(w_ref[...], x_ref[0], preferred_element_type=jnp.float32)
    acc = acc + b_ref[...]                       # (Cout, 1) broadcasts over lanes
    if act == "swish":
        acc = acc * jax.nn.sigmoid(acc)
    o_ref[0] = acc.astype(o_ref.dtype)


def _conv1x1_res_kernel(x_ref, w_ref, b_ref, r_ref, o_ref, *, act):
    acc = jnp.dot(w_ref[...], x_ref[0], preferred_element_type=jnp.float32)
    acc = acc + b_ref[...]
    if act == "swish":
        acc = acc * jax.nn.sigmoid(acc)
    acc = acc + r_ref[0].astype(jnp.float32)     # fused residual add
    o_ref[0] = acc.astype(o_ref.dtype)


def _conv3x3_kernel(x_ref, w_ref, b_ref, o_ref, *, tap_offsets, mp):
    # x_ref: (1, Cin, (H+3)*(W+2)) flat zero-padded plane, w_ref: (9, Cout, Cin),
    # o_ref: (1, Cout, H*(W+2)).  The 9 taps are shifted windows of the flat plane.
    acc = jnp.zeros(o_ref.shape[1:], jnp.float32)
    for t, off in enumerate(tap_offsets):
        xt = x_ref[0, :, pl.ds(off, mp)]         # (Cin, MP), static offset window
        acc = acc + jnp.dot(w_ref[t], xt, preferred_element_type=jnp.float32)
    acc = acc + b_ref[...]
    o_ref[0] = acc.astype(o_ref.dtype)


def _win_attn_kernel(q_ref, v_ref, o_ref):
    # Batched window attention: softmax(q q^T) v for WB windows per grid step.
    q = q_ref[...]
    s = jnp.einsum("blc,bkc->blk", q, q, preferred_element_type=jnp.float32)
    s = s - jnp.max(s, axis=-1, keepdims=True)
    p = jnp.exp(s)
    inv = pl.reciprocal(jnp.sum(p, axis=-1, keepdims=True), approx=True)
    p = p * inv
    o = jnp.einsum("blk,bkc->blc", p.astype(v_ref.dtype), v_ref[...],
                   preferred_element_type=jnp.float32)
    o_ref[...] = o.astype(o_ref.dtype)


# ----------------------------------------------------------------------------
# Kernel wrappers
# ----------------------------------------------------------------------------
def _pick_m_tile(m):
    for t in (512, 384, 256, 128):
        if m % t == 0:
            return t
    if m <= 4096:
        return m                 # small spatial plane: one full-row tile, fits VMEM
    return 512                   # ragged final tile; Pallas masks the OOB writes


def conv1x1_cf(x, w, b, *, act="none", residual=None, out_dtype=ACT_DTYPE):
    """Channels-first 1x1 conv.  x: (B,Cin,H,W); w: (Cout,Cin); b: (Cout,)."""
    B, Cin, H, W = x.shape
    Cout = w.shape[0]
    M = H * W
    tm = _pick_m_tile(M)
    grid = (B, pl.cdiv(M, tm))
    xk = x.reshape(B, Cin, M).astype(ACT_DTYPE)
    wk = w.astype(ACT_DTYPE)
    bk = b.reshape(Cout, 1).astype(jnp.float32)
    in_specs = [
        pl.BlockSpec((1, Cin, tm), lambda bi, mi: (bi, 0, mi)),
        pl.BlockSpec((Cout, Cin), lambda bi, mi: (0, 0)),
        pl.BlockSpec((Cout, 1), lambda bi, mi: (0, 0)),
    ]
    args = [xk, wk, bk]
    if residual is None:
        kernel = functools.partial(_conv1x1_kernel, act=act)
    else:
        in_specs.append(pl.BlockSpec((1, Cout, tm), lambda bi, mi: (bi, 0, mi)))
        args.append(residual.reshape(B, Cout, M).astype(ACT_DTYPE))
        kernel = functools.partial(_conv1x1_res_kernel, act=act)
    y = pl.pallas_call(
        kernel,
        out_shape=jax.ShapeDtypeStruct((B, Cout, M), out_dtype),
        grid=grid,
        in_specs=in_specs,
        out_specs=pl.BlockSpec((1, Cout, tm), lambda bi, mi: (bi, 0, mi)),
        compiler_params=_mosaic_params("parallel", "parallel"),
    )(*args)
    return y.reshape(B, Cout, H, W)


def conv3x3_cf(x, w, b, *, out_dtype=ACT_DTYPE):
    """3x3 conv, stride 1, zero pad 1, taps fused in-kernel (no HBM im2col).
    x: (B,Cin,H,W); w: (Cout,Cin,3,3); b: (Cout,)."""
    # TODO(synk): spatially tile (with halo) for very large H*W; here the whole
    #             per-batch padded plane is VMEM-resident (fine for SR-sized tiles).
    B, Cin, H, W = x.shape
    Cout = w.shape[0]
    Wp = W + 2
    MP = H * Wp                                   # padded-width output length
    xp = jnp.pad(x, ((0, 0), (0, 0), (1, 2), (1, 1)))     # 1 top, 2 bottom, 1 l/r
    xk = xp.reshape(B, Cin, (H + 3) * Wp).astype(ACT_DTYPE)
    wk = w.transpose(2, 3, 0, 1).reshape(9, Cout, Cin).astype(ACT_DTYPE)
    bk = b.reshape(Cout, 1).astype(jnp.float32)
    offs = tuple(di * Wp + dj for di in range(3) for dj in range(3))
    y = pl.pallas_call(
        functools.partial(_conv3x3_kernel, tap_offsets=offs, mp=MP),
        out_shape=jax.ShapeDtypeStruct((B, Cout, MP), out_dtype),
        grid=(B,),
        in_specs=[
            pl.BlockSpec((1, Cin, (H + 3) * Wp), lambda bi: (bi, 0, 0)),
            pl.BlockSpec((9, Cout, Cin), lambda bi: (0, 0, 0)),
            pl.BlockSpec((Cout, 1), lambda bi: (0, 0)),
        ],
        out_specs=pl.BlockSpec((1, Cout, MP), lambda bi: (bi, 0, 0)),
        compiler_params=_mosaic_params("parallel"),
    )(xk, wk, bk)
    return y.reshape(B, Cout, H, Wp)[:, :, :, :W]


def _pick_window_tile(nw):
    cap = min(256, nw)
    if nw >= 2:
        cap = min(cap, max(1, nw // 2))   # keep >= 2 grid steps for v7x megacore
    wb = 1
    for d in range(1, cap + 1):
        if nw % d == 0:
            wb = d
    return wb


def window_self_attention(q, v):
    """q, v: (NW, L, C) -> softmax(q q^T) v per window, WB windows per grid step."""
    NW, L, C = q.shape
    WB = _pick_window_tile(NW)
    return pl.pallas_call(
        _win_attn_kernel,
        out_shape=jax.ShapeDtypeStruct((NW, L, C), ACT_DTYPE),
        grid=(NW // WB,),
        in_specs=[pl.BlockSpec((WB, L, C), lambda i: (i, 0, 0)),
                  pl.BlockSpec((WB, L, C), lambda i: (i, 0, 0))],
        out_specs=pl.BlockSpec((WB, L, C), lambda i: (i, 0, 0)),
        compiler_params=_mosaic_params("parallel"),
    )(q.astype(ACT_DTYPE), v.astype(ACT_DTYPE))


# ----------------------------------------------------------------------------
# LGTT building blocks (plain-JAX glue around the Pallas kernels)
# ----------------------------------------------------------------------------
DF2K_MEAN = jnp.array([0.469, 0.449, 0.4036], jnp.float32)


def mean_shift(x, sign, rgb_range=255):
    # MeanShift: identity 1x1 conv (std = 1) + per-channel bias.
    return x + (sign * rgb_range * DF2K_MEAN).reshape(1, 3, 1, 1)


def pixel_mixer(x):
    """PixelMixer: per-channel circular single-pixel shifts; touches ~1x the data."""
    B, C, H, W = x.shape
    g = [jnp.roll(x[:, 0::5], -1, axis=3),
         jnp.roll(x[:, 1::5], 1, axis=3),
         jnp.roll(x[:, 2::5], -1, axis=2),
         jnp.roll(x[:, 3::5], 1, axis=2),
         x[:, 4::5]]
    return jnp.stack(g, axis=2).reshape(B, C, H, W)


def lt_modeler(x, blk):
    """x + BatchNorm_eval(PixelMixer(x) - x); BN math in f32, stream in bf16."""
    p = blk["lt_bn"]
    s = p["gamma"] * jax.lax.rsqrt(p["var"] + 1e-5)
    t = p["beta"] - p["mean"] * s
    d = pixel_mixer(x).astype(jnp.float32) - x.astype(jnp.float32)
    y = d * s.reshape(1, -1, 1, 1) + t.reshape(1, -1, 1, 1)
    return (x.astype(jnp.float32) + y).astype(x.dtype)


def shift_plus(x, cgp):
    """ShiftConv2d1x1 '+' spatial shift (zero padded), contiguous channel groups."""
    B, C, H, W = x.shape
    z = jnp.pad(x, ((0, 0), (0, 0), (1, 1), (1, 1)))
    right = z[:, :, 1:1 + H, 2:2 + W]   # in[y, x+1]
    left = z[:, :, 1:1 + H, 0:W]        # in[y, x-1]
    down = z[:, :, 2:2 + H, 1:1 + W]    # in[y+1, x]
    up = z[:, :, 0:H, 1:1 + W]          # in[y-1, x]
    return jnp.concatenate(
        [right[:, 0:cgp], left[:, cgp:2 * cgp], down[:, 2 * cgp:3 * cgp],
         up[:, 3 * cgp:4 * cgp], x[:, 4 * cgp:]], axis=1)


def mlp_block(x, blk):
    """x + fc2(shift(Swish(fc1(shift(x))))); Swish and the residual fused in-kernel."""
    h = conv1x1_cf(shift_plus(x, x.shape[1] // 5), blk["fc1_w"], blk["fc1_b"],
                   act="swish")
    return conv1x1_cf(shift_plus(h, h.shape[1] // 5), blk["fc2_w"], blk["fc2_b"],
                      residual=x)


def gt_modeler(x, blk, num_heads, window_list, shift_list):
    """x + Conv1x1(+folded BN) -> windowed softmax(q q^T) v -> Conv1x1 (residual fused)."""
    qkv = conv1x1_cf(x, blk["attn_w"], blk["attn_b"])
    B, C, h, w = qkv.shape
    slices = jnp.split(qkv, len(window_list), axis=1)
    outs = []
    # TODO(synk): the window (un)roll transposes below still shuffle small-last-dim
    #             tiles in HBM; an in-kernel window gather (PrefetchScalarGridSpec)
    #             would remove that traffic.
    for sl, (ws1, ws2), (sh1, sh2) in zip(slices, window_list, shift_list):
        pad_h = (-h) % ws1
        pad_w = (-w) % ws2
        if pad_h or pad_w:
            sl = jnp.pad(sl, ((0, 0), (0, 0), (0, pad_h), (0, pad_w)), mode="reflect")
        if (sh1, sh2) != (0, 0):
            sl = jnp.roll(sl, (sh1, sh2), axis=(2, 3))
        Cs, H, W = sl.shape[1], sl.shape[2], sl.shape[3]
        c = Cs // (2 * num_heads)
        nh, nw = H // ws1, W // ws2
        # 'b (qv head c) (nh ws1) (nw ws2) -> qv (b head nh nw) (ws1 ws2) c'
        t = sl.reshape(B, 2, num_heads, c, nh, ws1, nw, ws2)
        t = t.transpose(1, 0, 2, 4, 6, 5, 7, 3).reshape(
            2, B * num_heads * nh * nw, ws1 * ws2, c)
        o = window_self_attention(t[0], t[1])
        # '(b head nh nw) (ws1 ws2) c -> b (head c) (nh ws1) (nw ws2)'
        o = o.reshape(B, num_heads, nh, nw, ws1, ws2, c)
        o = o.transpose(0, 1, 6, 2, 4, 3, 5).reshape(
            B, num_heads * c, nh * ws1, nw * ws2)
        if (sh1, sh2) != (0, 0):
            o = jnp.roll(o, (-sh1, -sh2), axis=(2, 3))
        outs.append(o[:, :, :h, :w])
    out = jnp.concatenate(outs, axis=1)
    return conv1x1_cf(out, blk["proj_w"], blk["proj_b"], residual=x)


def pixel_shuffle(x, r):
    B, Cr2, H, W = x.shape
    C = Cr2 // (r * r)
    x = x.reshape(B, C, r, r, H, W)
    x = x.transpose(0, 1, 4, 2, 5, 3)
    return x.reshape(B, C, H * r, W * r)


def lgtt_forward(x, params, cfg):
    no_shift = tuple((0, 0) for _ in cfg["window_list"])
    sub_x = mean_shift(x, -1)
    head_x = conv3x3_cf(sub_x, params["head_w"], params["head_b"])
    body_x = head_x
    for blocks in params["groups"]:
        for bi, blk in enumerate(blocks):
            if bi <= cfg["num_gtmodeler"] - 1:
                shift = cfg["shift_list"] if (bi + 1) % 2 == 0 else no_shift
                body_x = gt_modeler(body_x, blk, cfg["num_heads"],
                                    cfg["window_list"], shift)
            else:
                body_x = lt_modeler(body_x, blk)
            body_x = mlp_block(body_x, blk)
        # TransformerGroup.conv is Identity (conv_list=None in LGTGroup)
    body_x = body_x + head_x
    tail_x = conv3x3_cf(body_x, params["tail_w"], params["tail_b"],
                        out_dtype=jnp.float32)
    tail_x = pixel_shuffle(tail_x, cfg["upscale"])
    return mean_shift(tail_x, +1)


# ----------------------------------------------------------------------------
# Deterministic parameter initialization (shapes follow the PyTorch __init__)
# ----------------------------------------------------------------------------
def init_conv(key, cout, cin, k=1, scale=0.05):
    kw, kb = jax.random.split(key)
    w = scale * jax.random.normal(kw, (cout, cin, k, k), jnp.float32)
    b = 0.02 * jax.random.normal(kb, (cout,), jnp.float32)
    return w, b


def init_bn(key, c):
    k1, k2, k3, k4 = jax.random.split(key, 4)
    return dict(
        gamma=1.0 + 0.05 * jax.random.normal(k1, (c,), jnp.float32),
        beta=0.02 * jax.random.normal(k2, (c,), jnp.float32),
        mean=0.02 * jax.random.normal(k3, (c,), jnp.float32),
        var=1.0 + 0.05 * jnp.abs(jax.random.normal(k4, (c,), jnp.float32)),
    )


def build_params(key, cfg):
    params = {}
    keys = jax.random.split(key, 4)
    params["head_w"], params["head_b"] = init_conv(keys[0], cfg["dim"],
                                                   cfg["num_in_ch"], 3)
    groups = []
    gkeys = jax.random.split(keys[1], cfg["n_groups"])
    for g in range(cfg["n_groups"]):
        bkeys = jax.random.split(gkeys[g], cfg["n_blocks"])
        blocks = []
        for bi in range(cfg["n_blocks"]):
            sk = jax.random.split(bkeys[bi], 6)
            blk = {}
            if bi <= cfg["num_gtmodeler"] - 1:                  # GTModeler block
                aw, ab = init_conv(sk[0], 2 * cfg["dim"], cfg["dim"], 1)
                bn = init_bn(sk[1], 2 * cfg["dim"])
                s = bn["gamma"] / jnp.sqrt(bn["var"] + 1e-5)    # fold BN into conv
                blk["attn_w"] = aw[:, :, 0, 0] * s[:, None]
                blk["attn_b"] = (ab - bn["mean"]) * s + bn["beta"]
                pw, pb = init_conv(sk[2], cfg["dim"], cfg["dim"], 1)
                blk["proj_w"], blk["proj_b"] = pw[:, :, 0, 0], pb
            else:                                               # LTModeler block
                blk["lt_bn"] = init_bn(sk[0], cfg["dim"])
            hidden = cfg["dim"] * cfg["mlp_ratio"]
            w1, b1 = init_conv(sk[3], hidden, cfg["dim"], 1)
            w2, b2 = init_conv(sk[4], cfg["dim"], hidden, 1)
            blk["fc1_w"], blk["fc1_b"] = w1[:, :, 0, 0], b1
            blk["fc2_w"], blk["fc2_b"] = w2[:, :, 0, 0], b2
            blocks.append(blk)
        groups.append(blocks)
    params["groups"] = groups
    # tail, task='lsr': Conv3x3(dim, out*upscale^2) + PixelShuffle(upscale)
    params["tail_w"], params["tail_b"] = init_conv(
        keys[2], cfg["num_out_ch"] * cfg["upscale"] ** 2, cfg["dim"], 3)
    return params


# ----------------------------------------------------------------------------
if __name__ == "__main__":
    # Small but structurally faithful config: dim % 5 == 0, dim % num_heads == 0,
    # dim divisible by len(window_list)*num_heads; H, W divisible by the windows.
    cfg = dict(
        upscale=2, num_in_ch=3, num_out_ch=3, dim=30,
        n_groups=1, n_blocks=3, num_heads=3, mlp_ratio=2, num_gtmodeler=2,
        window_list=((4, 4), (4, 4)), shift_list=((2, 2), (2, 2)),
    )
    key = jax.random.PRNGKey(0)
    kp, kx = jax.random.split(key)
    params = build_params(kp, cfg)
    x = jax.random.normal(kx, (2, cfg["num_in_ch"], 8, 8), jnp.float32)

    fwd = jax.jit(functools.partial(lgtt_forward, cfg=cfg))
    out = jax.block_until_ready(fwd(x, params))
    assert out.shape == (2, cfg["num_out_ch"],
                         8 * cfg["upscale"], 8 * cfg["upscale"]), out.shape
    assert bool(jnp.all(jnp.isfinite(out)))
    print("KERNEL_OK")
</pallas_src>

<mosaic_0001>
module attributes {stable_mosaic.version = 11 : i64} {
  func.func @_conv3x3_kernel(%arg0: i32, %arg1: memref<1x3x110xbf16, #tpu.memory_space<vmem>>, %arg2: memref<9x30x3xbf16, #tpu.memory_space<vmem>>, %arg3: memref<30x1xf32, #tpu.memory_space<vmem>>, %arg4: memref<1x30x80xbf16, #tpu.memory_space<vmem>>) attributes {dimension_semantics = [#tpu.dimension_semantics<parallel>], iteration_bounds = array<i64: 2>, scalar_prefetch = 0 : i64, scratch_operands = 0 : i64, tpu.core_type = #tpu.core_type<tc>, window_params = [{transform_indices = @transform_0, window_bounds = array<i64: 1, 3, 110>}, {pipeline_mode = #tpu.pipeline_mode<synchronous>, transform_indices = @transform_1, window_bounds = array<i64: 9, 30, 3>}, {pipeline_mode = #tpu.pipeline_mode<synchronous>, transform_indices = @transform_2, window_bounds = array<i64: 30, 1>}, {transform_indices = @transform_3, window_bounds = array<i64: 1, 30, 80>}]} {
    %cst = arith.constant 0.000000e+00 : f32
    %0 = vector.broadcast %cst : f32 to vector<30x80xf32>
    %c0 = arith.constant 0 : index
    %c0_0 = arith.constant 0 : index
    %c0_1 = arith.constant 0 : index
    %1 = vector.load %arg1[%c0, %c0_0, %c0_1] : memref<1x3x110xbf16, #tpu.memory_space<vmem>>, vector<1x3x80xbf16>
    %2 = vector.shape_cast %1 : vector<1x3x80xbf16> to vector<3x80xbf16>
    %c0_2 = arith.constant 0 : index
    %c0_3 = arith.constant 0 : index
    %c0_4 = arith.constant 0 : index
    %3 = vector.load %arg2[%c0_2, %c0_3, %c0_4] : memref<9x30x3xbf16, #tpu.memory_space<vmem>>, vector<1x30x3xbf16>
    %4 = vector.shape_cast %3 : vector<1x30x3xbf16> to vector<30x3xbf16>
    %cst_5 = arith.constant dense<0.000000e+00> : vector<30x80xf32>
    %5 = tpu.matmul %4, %2, %cst_5 {dimension_numbers = #tpu.dot_dimension_numbers<[1], [0], [0], [1], [0, 0, 1, 1], [], []>} : vector<30x3xbf16>, vector<3x80xbf16>, vector<30x80xf32> -> vector<30x80xf32>
    %6 = arith.addf %0, %5 : vector<30x80xf32>
    %c0_6 = arith.constant 0 : index
    %c0_7 = arith.constant 0 : index
    %c1 = arith.constant 1 : index
    %7 = vector.load %arg1[%c0_6, %c0_7, %c1] : memref<1x3x110xbf16, #tpu.memory_space<vmem>>, vector<1x3x80xbf16>
    %8 = vector.shape_cast %7 : vector<1x3x80xbf16> to vector<3x80xbf16>
    %c1_8 = arith.constant 1 : index
    %c0_9 = arith.constant 0 : index
    %c0_10 = arith.constant 0 : index
    %9 = vector.load %arg2[%c1_8, %c0_9, %c0_10] : memref<9x30x3xbf16, #tpu.memory_space<vmem>>, vector<1x30x3xbf16>
    %10 = vector.shape_cast %9 : vector<1x30x3xbf16> to vector<30x3xbf16>
    %cst_11 = arith.constant dense<0.000000e+00> : vector<30x80xf32>
    %11 = tpu.matmul %10, %8, %cst_11 {dimension_numbers = #tpu.dot_dimension_numbers<[1], [0], [0], [1], [0, 0, 1, 1], [], []>} : vector<30x3xbf16>, vector<3x80xbf16>, vector<30x80xf32> -> vector<30x80xf32>
    %12 = arith.addf %6, %11 : vector<30x80xf32>
    %c0_12 = arith.constant 0 : index
    %c0_13 = arith.constant 0 : index
    %c2 = arith.constant 2 : index
    %13 = vector.load %arg1[%c0_12, %c0_13, %c2] : memref<1x3x110xbf16, #tpu.memory_space<vmem>>, vector<1x3x80xbf16>
    %14 = vector.shape_cast %13 : vector<1x3x80xbf16> to vector<3x80xbf16>
    %c2_14 = arith.constant 2 : index
    %c0_15 = arith.constant 0 : index
    %c0_16 = arith.constant 0 : index
    %15 = vector.load %arg2[%c2_14, %c0_15, %c0_16] : memref<9x30x3xbf16, #tpu.memory_space<vmem>>, vector<1x30x3xbf16>
    %16 = vector.shape_cast %15 : vector<1x30x3xbf16> to vector<30x3xbf16>
    %cst_17 = arith.constant dense<0.000000e+00> : vector<30x80xf32>
    %17 = tpu.matmul %16, %14, %cst_17 {dimension_numbers = #tpu.dot_dimension_numbers<[1], [0], [0], [1], [0, 0, 1, 1], [], []>} : vector<30x3xbf16>, vector<3x80xbf16>, vector<30x80xf32> -> vector<30x80xf32>
    %18 = arith.addf %12, %17 : vector<30x80xf32>
    %c0_18 = arith.constant 0 : index
    %c0_19 = arith.constant 0 : index
    %c10 = arith.constant 10 : index
    %19 = vector.load %arg1[%c0_18, %c0_19, %c10] : memref<1x3x110xbf16, #tpu.memory_space<vmem>>, vector<1x3x80xbf16>
    %20 = vector.shape_cast %19 : vector<1x3x80xbf16> to vector<3x80xbf16>
    %c3 = arith.constant 3 : index
    %c0_20 = arith.constant 0 : index
    %c0_21 = arith.constant 0 : index
    %21 = vector.load %arg2[%c3, %c0_20, %c0_21] : memref<9x30x3xbf16, #tpu.memory_space<vmem>>, vector<1x30x3xbf16>
    %22 = vector.shape_cast %21 : vector<1x30x3xbf16> to vector<30x3xbf16>
    %cst_22 = arith.constant dense<0.000000e+00> : vector<30x80xf32>
    %23 = tpu.matmul %22, %20, %cst_22 {dimension_numbers = #tpu.dot_dimension_numbers<[1], [0], [0], [1], [0, 0, 1, 1], [], []>} : vector<30x3xbf16>, vector<3x80xbf16>, vector<30x80xf32> -> vector<30x80xf32>
    %24 = arith.addf %18, %23 : vector<30x80xf32>
    %c0_23 = arith.constant 0 : index
    %c0_24 = arith.constant 0 : index
    %c11 = arith.constant 11 : index
    %25 = vector.load %arg1[%c0_23, %c0_24, %c11] : memref<1x3x110xbf16, #tpu.memory_space<vmem>>, vector<1x3x80xbf16>
    %26 = vector.shape_cast %25 : vector<1x3x80xbf16> to vector<3x80xbf16>
    %c4 = arith.constant 4 : index
    %c0_25 = arith.constant 0 : index
    %c0_26 = arith.constant 0 : index
    %27 = vector.load %arg2[%c4, %c0_25, %c0_26] : memref<9x30x3xbf16, #tpu.memory_space<vmem>>, vector<1x30x3xbf16>
    %28 = vector.shape_cast %27 : vector<1x30x3xbf16> to vector<30x3xbf16>
    %cst_27 = arith.constant dense<0.000000e+00> : vector<30x80xf32>
    %29 = tpu.matmul %28, %26, %cst_27 {dimension_numbers = #tpu.dot_dimension_numbers<[1], [0], [0], [1], [0, 0, 1, 1], [], []>} : vector<30x3xbf16>, vector<3x80xbf16>, vector<30x80xf32> -> vector<30x80xf32>
    %30 = arith.addf %24, %29 : vector<30x80xf32>
    %c0_28 = arith.constant 0 : index
    %c0_29 = arith.constant 0 : index
    %c12 = arith.constant 12 : index
    %31 = vector.load %arg1[%c0_28, %c0_29, %c12] : memref<1x3x110xbf16, #tpu.memory_space<vmem>>, vector<1x3x80xbf16>
    %32 = vector.shape_cast %31 : vector<1x3x80xbf16> to vector<3x80xbf16>
    %c5 = arith.constant 5 : index
    %c0_30 = arith.constant 0 : index
    %c0_31 = arith.constant 0 : index
    %33 = vector.load %arg2[%c5, %c0_30, %c0_31] : memref<9x30x3xbf16, #tpu.memory_space<vmem>>, vector<1x30x3xbf16>
    %34 = vector.shape_cast %33 : vector<1x30x3xbf16> to vector<30x3xbf16>
    %cst_32 = arith.constant dense<0.000000e+00> : vector<30x80xf32>
    %35 = tpu.matmul %34, %32, %cst_32 {dimension_numbers = #tpu.dot_dimension_numbers<[1], [0], [0], [1], [0, 0, 1, 1], [], []>} : vector<30x3xbf16>, vector<3x80xbf16>, vector<30x80xf32> -> vector<30x80xf32>
    %36 = arith.addf %30, %35 : vector<30x80xf32>
    %c0_33 = arith.constant 0 : index
    %c0_34 = arith.constant 0 : index
    %c20 = arith.constant 20 : index
    %37 = vector.load %arg1[%c0_33, %c0_34, %c20] : memref<1x3x110xbf16, #tpu.memory_space<vmem>>, vector<1x3x80xbf16>
    %38 = vector.shape_cast %37 : vector<1x3x80xbf16> to vector<3x80xbf16>
    %c6 = arith.constant 6 : index
    %c0_35 = arith.constant 0 : index
    %c0_36 = arith.constant 0 : index
    %39 = vector.load %arg2[%c6, %c0_35, %c0_36] : memref<9x30x3xbf16, #tpu.memory_space<vmem>>, vector<1x30x3xbf16>
    %40 = vector.shape_cast %39 : vector<1x30x3xbf16> to vector<30x3xbf16>
    %cst_37 = arith.constant dense<0.000000e+00> : vector<30x80xf32>
    %41 = tpu.matmul %40, %38, %cst_37 {dimension_numbers = #tpu.dot_dimension_numbers<[1], [0], [0], [1], [0, 0, 1, 1], [], []>} : vector<30x3xbf16>, vector<3x80xbf16>, vector<30x80xf32> -> vector<30x80xf32>
    %42 = arith.addf %36, %41 : vector<30x80xf32>
    %c0_38 = arith.constant 0 : index
    %c0_39 = arith.constant 0 : index
    %c21 = arith.constant 21 : index
    %43 = vector.load %arg1[%c0_38, %c0_39, %c21] : memref<1x3x110xbf16, #tpu.memory_space<vmem>>, vector<1x3x80xbf16>
    %44 = vector.shape_cast %43 : vector<1x3x80xbf16> to vector<3x80xbf16>
    %c7 = arith.constant 7 : index
    %c0_40 = arith.constant 0 : index
    %c0_41 = arith.constant 0 : index
    %45 = vector.load %arg2[%c7, %c0_40, %c0_41] : memref<9x30x3xbf16, #tpu.memory_space<vmem>>, vector<1x30x3xbf16>
    %46 = vector.shape_cast %45 : vector<1x30x3xbf16> to vector<30x3xbf16>
    %cst_42 = arith.constant dense<0.000000e+00> : vector<30x80xf32>
    %47 = tpu.matmul %46, %44, %cst_42 {dimension_numbers = #tpu.dot_dimension_numbers<[1], [0], [0], [1], [0, 0, 1, 1], [], []>} : vector<30x3xbf16>, vector<3x80xbf16>, vector<30x80xf32> -> vector<30x80xf32>
    %48 = arith.addf %42, %47 : vector<30x80xf32>
    %c0_43 = arith.constant 0 : index
    %c0_44 = arith.constant 0 : index
    %c22 = arith.constant 22 : index
    %49 = vector.load %arg1[%c0_43, %c0_44, %c22] : memref<1x3x110xbf16, #tpu.memory_space<vmem>>, vector<1x3x80xbf16>
    %50 = vector.shape_cast %49 : vector<1x3x80xbf16> to vector<3x80xbf16>
    %c8 = arith.constant 8 : index
    %c0_45 = arith.constant 0 : index
    %c0_46 = arith.constant 0 : index
    %51 = vector.load %arg2[%c8, %c0_45, %c0_46] : memref<9x30x3xbf16, #tpu.memory_space<vmem>>, vector<1x30x3xbf16>
    %52 = vector.shape_cast %51 : vector<1x30x3xbf16> to vector<30x3xbf16>
    %cst_47 = arith.constant dense<0.000000e+00> : vector<30x80xf32>
    %53 = tpu.matmul %52, %50, %cst_47 {dimension_numbers = #tpu.dot_dimension_numbers<[1], [0], [0], [1], [0, 0, 1, 1], [], []>} : vector<30x3xbf16>, vector<3x80xbf16>, vector<30x80xf32> -> vector<30x80xf32>
    %54 = arith.addf %48, %53 : vector<30x80xf32>
    %c0_48 = arith.constant 0 : index
    %c0_49 = arith.constant 0 : index
    %55 = vector.load %arg3[%c0_48, %c0_49] : memref<30x1xf32, #tpu.memory_space<vmem>>, vector<30x1xf32>
    %56 = vector.broadcast %55 : vector<30x1xf32> to vector<30x80xf32>
    %57 = arith.addf %54, %56 : vector<30x80xf32>
    %58 = arith.truncf %57 : vector<30x80xf32> to vector<30x80xbf16>
    %c0_50 = arith.constant 0 : index
    %c0_51 = arith.constant 0 : index
    %c0_52 = arith.constant 0 : index
    %59 = vector.load %arg4[%c0_50, %c0_51, %c0_52] : memref<1x30x80xbf16, #tpu.memory_space<vmem>>, vector<1x30x80xbf16>
    %60 = vector.shape_cast %59 : vector<1x30x80xbf16> to vector<30x80xbf16>
    %61 = vector.shape_cast %58 : vector<30x80xbf16> to vector<1x30x80xbf16>
    tpu.vector_store %arg4[%c0_50, %c0_51, %c0_52], %61 {strides = array<i32>} : memref<1x30x80xbf16, #tpu.memory_space<vmem>>, vector<1x30x80xbf16>,
    return
  }
  func.func @transform_0(%arg0: i32) -> (i32, i32, i32) {
    %c0_i32 = arith.constant 0 : i32
    %c0_i32_0 = arith.constant 0 : i32
    %c0_i32_1 = arith.constant 0 : i32
    return %arg0, %c0_i32, %c0_i32_0 : i32, i32, i32
  }
  func.func @transform_1(%arg0: i32) -> (i32, i32, i32) {
    %c0_i32 = arith.constant 0 : i32
    %c0_i32_0 = arith.constant 0 : i32
    %c0_i32_1 = arith.constant 0 : i32
    %c0_i32_2 = arith.constant 0 : i32
    return %c0_i32, %c0_i32_0, %c0_i32_1 : i32, i32, i32
  }
  func.func @transform_2(%arg0: i32) -> (i32, i32) {
    %c0_i32 = arith.constant 0 : i32
    %c0_i32_0 = arith.constant 0 : i32
    %c0_i32_1 = arith.constant 0 : i32
    return %c0_i32, %c0_i32_0 : i32, i32
  }
  func.func @transform_3(%arg0: i32) -> (i32, i32, i32) {
    %c0_i32 = arith.constant 0 : i32
    %c0_i32_0 = arith.constant 0 : i32
    %c0_i32_1 = arith.constant 0 : i32
    return %arg0, %c0_i32, %c0_i32_0 : i32, i32, i32
  }
}

module attributes {stable_mosaic.version = 11 : i64} {
  func.func @_conv1x1_kernel(%arg0: i32, %arg1: i32, %arg2: memref<1x30x64xbf16, #tpu.memory_space<vmem>>, %arg3: memref<60x30xbf16, #tpu.memory_space<vmem>>, %arg4: memref<60x1xf32, #tpu.memory_space<vmem>>, %arg5: memref<1x60x64xbf16, #tpu.memory_space<vmem>>) attributes {dimension_semantics = [#tpu.dimension_semantics<parallel>, #tpu.dimension_semantics<parallel>], iteration_bounds = array<i64: 2, 1>, scalar_prefetch = 0 : i64, scratch_operands = 0 : i64, tpu.core_type = #tpu.core_type<tc>, window_params = [{transform_indices = @transform_0, window_bounds = array<i64: 1, 30, 64>}, {pipeline_mode = #tpu.pipeline_mode<synchronous>, transform_indices = @transform_1, window_bounds = array<i64: 60, 30>}, {pipeline_mode = #tpu.pipeline_mode<synchronous>, transform_indices = @transform_2, window_bounds = array<i64: 60, 1>}, {transform_indices = @transform_3, window_bounds = array<i64: 1, 60, 64>}]} {
    %c0 = arith.constant 0 : index
    %c0_0 = arith.constant 0 : index
    %0 = vector.load %arg3[%c0, %c0_0] : memref<60x30xbf16, #tpu.memory_space<vmem>>, vector<60x30xbf16>
    %c0_1 = arith.constant 0 : index
    %c0_2 = arith.constant 0 : index
    %c0_3 = arith.constant 0 : index
    %1 = vector.load %arg2[%c0_1, %c0_2, %c0_3] : memref<1x30x64xbf16, #tpu.memory_space<vmem>>, vector<1x30x64xbf16>
    %2 = vector.shape_cast %1 : vector<1x30x64xbf16> to vector<30x64xbf16>
    %cst = arith.constant dense<0.000000e+00> : vector<60x64xf32>
    %3 = tpu.matmul %0, %2, %cst {dimension_numbers = #tpu.dot_dimension_numbers<[1], [0], [0], [1], [0, 0, 1, 1], [], []>} : vector<60x30xbf16>, vector<30x64xbf16>, vector<60x64xf32> -> vector<60x64xf32>
    %c0_4 = arith.constant 0 : index
    %c0_5 = arith.constant 0 : index
    %4 = vector.load %arg4[%c0_4, %c0_5] : memref<60x1xf32, #tpu.memory_space<vmem>>, vector<60x1xf32>
    %5 = vector.broadcast %4 : vector<60x1xf32> to vector<60x64xf32>
    %6 = arith.addf %3, %5 : vector<60x64xf32>
    %7 = arith.truncf %6 : vector<60x64xf32> to vector<60x64xbf16>
    %c0_6 = arith.constant 0 : index
    %c0_7 = arith.constant 0 : index
    %c0_8 = arith.constant 0 : index
    %8 = vector.load %arg5[%c0_6, %c0_7, %c0_8] : memref<1x60x64xbf16, #tpu.memory_space<vmem>>, vector<1x60x64xbf16>
    %9 = vector.shape_cast %8 : vector<1x60x64xbf16> to vector<60x64xbf16>
    %10 = vector.shape_cast %7 : vector<60x64xbf16> to vector<1x60x64xbf16>
    tpu.vector_store %arg5[%c0_6, %c0_7, %c0_8], %10 {strides = array<i32>} : memref<1x60x64xbf16, #tpu.memory_space<vmem>>, vector<1x60x64xbf16>,
    return
  }
  func.func @transform_0(%arg0: i32, %arg1: i32) -> (i32, i32, i32) {
    %c0_i32 = arith.constant 0 : i32
    %c0_i32_0 = arith.constant 0 : i32
    return %arg0, %c0_i32, %arg1 : i32, i32, i32
  }
  func.func @transform_1(%arg0: i32, %arg1: i32) -> (i32, i32) {
    %c0_i32 = arith.constant 0 : i32
    %c0_i32_0 = arith.constant 0 : i32
    %c0_i32_1 = arith.constant 0 : i32
    return %c0_i32, %c0_i32_0 : i32, i32
  }
  func.func @transform_2(%arg0: i32, %arg1: i32) -> (i32, i32) {
    %c0_i32 = arith.constant 0 : i32
    %c0_i32_0 = arith.constant 0 : i32
    %c0_i32_1 = arith.constant 0 : i32
    return %c0_i32, %c0_i32_0 : i32, i32
  }
  func.func @transform_3(%arg0: i32, %arg1: i32) -> (i32, i32, i32) {
    %c0_i32 = arith.constant 0 : i32
    %c0_i32_0 = arith.constant 0 : i32
    return %arg0, %c0_i32, %arg1 : i32, i32, i32
  }
}

module attributes {stable_mosaic.version = 11 : i64} {
  func.func @_win_attn_kernel(%arg0: i32, %arg1: memref<12x16x5xbf16, #tpu.memory_space<vmem>>, %arg2: memref<12x16x5xbf16, #tpu.memory_space<vmem>>, %arg3: memref<12x16x5xbf16, #tpu.memory_space<vmem>>) attributes {dimension_semantics = [#tpu.dimension_semantics<parallel>], iteration_bounds = array<i64: 2>, scalar_prefetch = 0 : i64, scratch_operands = 0 : i64, tpu.core_type = #tpu.core_type<tc>, window_params = [{transform_indices = @transform_0, window_bounds = array<i64: 12, 16, 5>}, {transform_indices = @transform_1, window_bounds = array<i64: 12, 16, 5>}, {transform_indices = @transform_2, window_bounds = array<i64: 12, 16, 5>}]} {
    %c0 = arith.constant 0 : index
    %c0_0 = arith.constant 0 : index
    %c0_1 = arith.constant 0 : index
    %0 = vector.load %arg1[%c0, %c0_0, %c0_1] : memref<12x16x5xbf16, #tpu.memory_space<vmem>>, vector<12x16x5xbf16>
    "tpu.trace_start"() <{level = 10 : i32, message = "blc,bkc->blk"}> : () -> ()
    %cst = arith.constant dense<0.000000e+00> : vector<12x16x16xf32>
    %1 = tpu.matmul %0, %0, %cst {dimension_numbers = #tpu.dot_dimension_numbers<[2], [2], [1], [1], [0, 0, 0, 1, 1, 1], [0], [0]>} : vector<12x16x5xbf16>, vector<12x16x5xbf16>, vector<12x16x16xf32> -> vector<12x16x16xf32>
    "tpu.trace_stop"() : () -> ()
    %cst_2 = arith.constant dense<0xFF800000> : vector<12x16xf32>
    %2 = vector.multi_reduction <maximumf>, %1, %cst_2 [2] : vector<12x16x16xf32> to vector<12x16xf32>
    %3 = vector.shape_cast %2 : vector<12x16xf32> to vector<12x16x1xf32>
    %4 = vector.broadcast %3 : vector<12x16x1xf32> to vector<12x16x16xf32>
    %5 = arith.subf %1, %4 : vector<12x16x16xf32>
    %6 = math.exp %5 : vector<12x16x16xf32>
    %cst_3 = arith.constant dense<0.000000e+00> : vector<12x16xf32>
    %7 = vector.multi_reduction <add>, %6, %cst_3 [2] : vector<12x16x16xf32> to vector<12x16xf32>
    %8 = vector.shape_cast %7 : vector<12x16xf32> to vector<12x16x1xf32>
    %9 = tpu.reciprocal %8 {approx = true} : vector<12x16x1xf32> -> vector<12x16x1xf32>
    %10 = vector.broadcast %9 : vector<12x16x1xf32> to vector<12x16x16xf32>
    %11 = arith.mulf %6, %10 : vector<12x16x16xf32>
    %12 = arith.truncf %11 : vector<12x16x16xf32> to vector<12x16x16xbf16>
    %c0_4 = arith.constant 0 : index
    %c0_5 = arith.constant 0 : index
    %c0_6 = arith.constant 0 : index
    %13 = vector.load %arg2[%c0_4, %c0_5, %c0_6] : memref<12x16x5xbf16, #tpu.memory_space<vmem>>, vector<12x16x5xbf16>
    "tpu.trace_start"() <{level = 10 : i32, message = "blk,bkc->blc"}> : () -> ()
    %cst_7 = arith.constant dense<0.000000e+00> : vector<12x16x5xf32>
    %14 = tpu.matmul %12, %13, %cst_7 {dimension_numbers = #tpu.dot_dimension_numbers<[2], [1], [1], [2], [0, 0, 0, 1, 1, 2], [0], [0]>} : vector<12x16x16xbf16>, vector<12x16x5xbf16>, vector<12x16x5xf32> -> vector<12x16x5xf32>
    "tpu.trace_stop"() : () -> ()
    %15 = arith.truncf %14 : vector<12x16x5xf32> to vector<12x16x5xbf16>
    %c0_8 = arith.constant 0 : index
    %c0_9 = arith.constant 0 : index
    %c0_10 = arith.constant 0 : index
    %16 = vector.load %arg3[%c0_8, %c0_9, %c0_10] : memref<12x16x5xbf16, #tpu.memory_space<vmem>>, vector<12x16x5xbf16>
    tpu.vector_store %arg3[%c0_8, %c0_9, %c0_10], %15 {strides = array<i32>} : memref<12x16x5xbf16, #tpu.memory_space<vmem>>, vector<12x16x5xbf16>,
    return
  }
  func.func @transform_0(%arg0: i32) -> (i32, i32, i32) {
    %c0_i32 = arith.constant 0 : i32
    %c0_i32_0 = arith.constant 0 : i32
    %c0_i32_1 = arith.constant 0 : i32
    return %arg0, %c0_i32, %c0_i32_0 : i32, i32, i32
  }
  func.func @transform_1(%arg0: i32) -> (i32, i32, i32) {
    %c0_i32 = arith.constant 0 : i32
    %c0_i32_0 = arith.constant 0 : i32
    %c0_i32_1 = arith.constant 0 : i32
    return %arg0, %c0_i32, %c0_i32_0 : i32, i32, i32
  }
  func.func @transform_2(%arg0: i32) -> (i32, i32, i32) {
    %c0_i32 = arith.constant 0 : i32
    %c0_i32_0 = arith.constant 0 : i32
    %c0_i32_1 = arith.constant 0 : i32
    return %arg0, %c0_i32, %c0_i32_0 : i32, i32, i32
  }
}

module attributes {stable_mosaic.version = 11 : i64} {
  func.func @_conv1x1_res_kernel(%arg0: i32, %arg1: i32, %arg2: memref<1x30x64xbf16, #tpu.memory_space<vmem>>, %arg3: memref<30x30xbf16, #tpu.memory_space<vmem>>, %arg4: memref<30x1xf32, #tpu.memory_space<vmem>>, %arg5: memref<1x30x64xbf16, #tpu.memory_space<vmem>>, %arg6: memref<1x30x64xbf16, #tpu.memory_space<vmem>>) attributes {dimension_semantics = [#tpu.dimension_semantics<parallel>, #tpu.dimension_semantics<parallel>], iteration_bounds = array<i64: 2, 1>, scalar_prefetch = 0 : i64, scratch_operands = 0 : i64, tpu.core_type = #tpu.core_type<tc>, window_params = [{transform_indices = @transform_0, window_bounds = array<i64: 1, 30, 64>}, {pipeline_mode = #tpu.pipeline_mode<synchronous>, transform_indices = @transform_1, window_bounds = array<i64: 30, 30>}, {pipeline_mode = #tpu.pipeline_mode<synchronous>, transform_indices = @transform_2, window_bounds = array<i64: 30, 1>}, {transform_indices = @transform_3, window_bounds = array<i64: 1, 30, 64>}, {transform_indices = @transform_4, window_bounds = array<i64: 1, 30, 64>}]} {
    %c0 = arith.constant 0 : index
    %c0_0 = arith.constant 0 : index
    %0 = vector.load %arg3[%c0, %c0_0] : memref<30x30xbf16, #tpu.memory_space<vmem>>, vector<30x30xbf16>
    %c0_1 = arith.constant 0 : index
    %c0_2 = arith.constant 0 : index
    %c0_3 = arith.constant 0 : index
    %1 = vector.load %arg2[%c0_1, %c0_2, %c0_3] : memref<1x30x64xbf16, #tpu.memory_space<vmem>>, vector<1x30x64xbf16>
    %2 = vector.shape_cast %1 : vector<1x30x64xbf16> to vector<30x64xbf16>
    %cst = arith.constant dense<0.000000e+00> : vector<30x64xf32>
    %3 = tpu.matmul %0, %2, %cst {dimension_numbers = #tpu.dot_dimension_numbers<[1], [0], [0], [1], [0, 0, 1, 1], [], []>} : vector<30x30xbf16>, vector<30x64xbf16>, vector<30x64xf32> -> vector<30x64xf32>
    %c0_4 = arith.constant 0 : index
    %c0_5 = arith.constant 0 : index
    %4 = vector.load %arg4[%c0_4, %c0_5] : memref<30x1xf32, #tpu.memory_space<vmem>>, vector<30x1xf32>
    %5 = vector.broadcast %4 : vector<30x1xf32> to vector<30x64xf32>
    %6 = arith.addf %3, %5 : vector<30x64xf32>
    %c0_6 = arith.constant 0 : index
    %c0_7 = arith.constant 0 : index
    %c0_8 = arith.constant 0 : index
    %7 = vector.load %arg5[%c0_6, %c0_7, %c0_8] : memref<1x30x64xbf16, #tpu.memory_space<vmem>>, vector<1x30x64xbf16>
    %8 = vector.shape_cast %7 : vector<1x30x64xbf16> to vector<30x64xbf16>
    %9 = arith.extf %8 : vector<30x64xbf16> to vector<30x64xf32>
    %10 = arith.addf %6, %9 : vector<30x64xf32>
    %11 = arith.truncf %10 : vector<30x64xf32> to vector<30x64xbf16>
    %c0_9 = arith.constant 0 : index
    %c0_10 = arith.constant 0 : index
    %c0_11 = arith.constant 0 : index
    %12 = vector.load %arg6[%c0_9, %c0_10, %c0_11] : memref<1x30x64xbf16, #tpu.memory_space<vmem>>, vector<1x30x64xbf16>
    %13 = vector.shape_cast %12 : vector<1x30x64xbf16> to vector<30x64xbf16>
    %14 = vector.shape_cast %11 : vector<30x64xbf16> to vector<1x30x64xbf16>
    tpu.vector_store %arg6[%c0_9, %c0_10, %c0_11], %14 {strides = array<i32>} : memref<1x30x64xbf16, #tpu.memory_space<vmem>>, vector<1x30x64xbf16>,
    return
  }
  func.func @transform_0(%arg0: i32, %arg1: i32) -> (i32, i32, i32) {
    %c0_i32 = arith.constant 0 : i32
    %c0_i32_0 = arith.constant 0 : i32
    return %arg0, %c0_i32, %arg1 : i32, i32, i32
  }
  func.func @transform_1(%arg0: i32, %arg1: i32) -> (i32, i32) {
    %c0_i32 = arith.constant 0 : i32
    %c0_i32_0 = arith.constant 0 : i32
    %c0_i32_1 = arith.constant 0 : i32
    return %c0_i32, %c0_i32_0 : i32, i32
  }
  func.func @transform_2(%arg0: i32, %arg1: i32) -> (i32, i32) {
    %c0_i32 = arith.constant 0 : i32
    %c0_i32_0 = arith.constant 0 : i32
    %c0_i32_1 = arith.constant 0 : i32
    return %c0_i32, %c0_i32_0 : i32, i32
  }
  func.func @transform_3(%arg0: i32, %arg1: i32) -> (i32, i32, i32) {
    %c0_i32 = arith.constant 0 : i32
    %c0_i32_0 = arith.constant 0 : i32
    return %arg0, %c0_i32, %arg1 : i32, i32, i32
  }
  func.func @transform_4(%arg0: i32, %arg1: i32) -> (i32, i32, i32) {
    %c0_i32 = arith.constant 0 : i32
    %c0_i32_0 = arith.constant 0 : i32
    return %arg0, %c0_i32, %arg1 : i32, i32, i32
  }
}

module attributes {stable_mosaic.version = 11 : i64} {
  func.func @_conv1x1_kernel(%arg0: i32, %arg1: i32, %arg2: memref<1x30x64xbf16, #tpu.memory_space<vmem>>, %arg3: memref<60x30xbf16, #tpu.memory_space<vmem>>, %arg4: memref<60x1xf32, #tpu.memory_space<vmem>>, %arg5: memref<1x60x64xbf16, #tpu.memory_space<vmem>>) attributes {dimension_semantics = [#tpu.dimension_semantics<parallel>, #tpu.dimension_semantics<parallel>], iteration_bounds = array<i64: 2, 1>, scalar_prefetch = 0 : i64, scratch_operands = 0 : i64, tpu.core_type = #tpu.core_type<tc>, window_params = [{transform_indices = @transform_0, window_bounds = array<i64: 1, 30, 64>}, {pipeline_mode = #tpu.pipeline_mode<synchronous>, transform_indices = @transform_1, window_bounds = array<i64: 60, 30>}, {pipeline_mode = #tpu.pipeline_mode<synchronous>, transform_indices = @transform_2, window_bounds = array<i64: 60, 1>}, {transform_indices = @transform_3, window_bounds = array<i64: 1, 60, 64>}]} {
    %c0 = arith.constant 0 : index
    %c0_0 = arith.constant 0 : index
    %0 = vector.load %arg3[%c0, %c0_0] : memref<60x30xbf16, #tpu.memory_space<vmem>>, vector<60x30xbf16>
    %c0_1 = arith.constant 0 : index
    %c0_2 = arith.constant 0 : index
    %c0_3 = arith.constant 0 : index
    %1 = vector.load %arg2[%c0_1, %c0_2, %c0_3] : memref<1x30x64xbf16, #tpu.memory_space<vmem>>, vector<1x30x64xbf16>
    %2 = vector.shape_cast %1 : vector<1x30x64xbf16> to vector<30x64xbf16>
    %cst = arith.constant dense<0.000000e+00> : vector<60x64xf32>
    %3 = tpu.matmul %0, %2, %cst {dimension_numbers = #tpu.dot_dimension_numbers<[1], [0], [0], [1], [0, 0, 1, 1], [], []>} : vector<60x30xbf16>, vector<30x64xbf16>, vector<60x64xf32> -> vector<60x64xf32>
    %c0_4 = arith.constant 0 : index
    %c0_5 = arith.constant 0 : index
    %4 = vector.load %arg4[%c0_4, %c0_5] : memref<60x1xf32, #tpu.memory_space<vmem>>, vector<60x1xf32>
    %5 = vector.broadcast %4 : vector<60x1xf32> to vector<60x64xf32>
    %6 = arith.addf %3, %5 : vector<60x64xf32>
    %7 = arith.negf %6 : vector<60x64xf32>
    %8 = math.exp %7 : vector<60x64xf32>
    %cst_6 = arith.constant 1.000000e+00 : f32
    %9 = vector.broadcast %cst_6 : f32 to vector<60x64xf32>
    %10 = arith.addf %9, %8 : vector<60x64xf32>
    %11 = arith.divf %9, %10 : vector<60x64xf32>
    %12 = arith.mulf %6, %11 : vector<60x64xf32>
    %13 = arith.truncf %12 : vector<60x64xf32> to vector<60x64xbf16>
    %c0_7 = arith.constant 0 : index
    %c0_8 = arith.constant 0 : index
    %c0_9 = arith.constant 0 : index
    %14 = vector.load %arg5[%c0_7, %c0_8, %c0_9] : memref<1x60x64xbf16, #tpu.memory_space<vmem>>, vector<1x60x64xbf16>
    %15 = vector.shape_cast %14 : vector<1x60x64xbf16> to vector<60x64xbf16>
    %16 = vector.shape_cast %13 : vector<60x64xbf16> to vector<1x60x64xbf16>
    tpu.vector_store %arg5[%c0_7, %c0_8, %c0_9], %16 {strides = array<i32>} : memref<1x60x64xbf16, #tpu.memory_space<vmem>>, vector<1x60x64xbf16>,
    return
  }
  func.func @transform_0(%arg0: i32, %arg1: i32) -> (i32, i32, i32) {
    %c0_i32 = arith.constant 0 : i32
    %c0_i32_0 = arith.constant 0 : i32
    return %arg0, %c0_i32, %arg1 : i32, i32, i32
  }
  func.func @transform_1(%arg0: i32, %arg1: i32) -> (i32, i32) {
    %c0_i32 = arith.constant 0 : i32
    %c0_i32_0 = arith.constant 0 : i32
    %c0_i32_1 = arith.constant 0 : i32
    return %c0_i32, %c0_i32_0 : i32, i32
  }
  func.func @transform_2(%arg0: i32, %arg1: i32) -> (i32, i32) {
    %c0_i32 = arith.constant 0 : i32
    %c0_i32_0 = arith.constant 0 : i32
    %c0_i32_1 = arith.constant 0 : i32
    return %c0_i32, %c0_i32_0 : i32, i32
  }
  func.func @transform_3(%arg0: i32, %arg1: i32) -> (i32, i32, i32) {
    %c0_i32 = arith.constant 0 : i32
    %c0_i32_0 = arith.constant 0 : i32
    return %arg0, %c0_i32, %arg1 : i32, i32, i32
  }
}

module attributes {stable_mosaic.version = 11 : i64} {
  func.func @_conv1x1_res_kernel(%arg0: i32, %arg1: i32, %arg2: memref<1x60x64xbf16, #tpu.memory_space<vmem>>, %arg3: memref<30x60xbf16, #tpu.memory_space<vmem>>, %arg4: memref<30x1xf32, #tpu.memory_space<vmem>>, %arg5: memref<1x30x64xbf16, #tpu.memory_space<vmem>>, %arg6: memref<1x30x64xbf16, #tpu.memory_space<vmem>>) attributes {dimension_semantics = [#tpu.dimension_semantics<parallel>, #tpu.dimension_semantics<parallel>], iteration_bounds = array<i64: 2, 1>, scalar_prefetch = 0 : i64, scratch_operands = 0 : i64, tpu.core_type = #tpu.core_type<tc>, window_params = [{transform_indices = @transform_0, window_bounds = array<i64: 1, 60, 64>}, {pipeline_mode = #tpu.pipeline_mode<synchronous>, transform_indices = @transform_1, window_bounds = array<i64: 30, 60>}, {pipeline_mode = #tpu.pipeline_mode<synchronous>, transform_indices = @transform_2, window_bounds = array<i64: 30, 1>}, {transform_indices = @transform_3, window_bounds = array<i64: 1, 30, 64>}, {transform_indices = @transform_4, window_bounds = array<i64: 1, 30, 64>}]} {
    %c0 = arith.constant 0 : index
    %c0_0 = arith.constant 0 : index
    %0 = vector.load %arg3[%c0, %c0_0] : memref<30x60xbf16, #tpu.memory_space<vmem>>, vector<30x60xbf16>
    %c0_1 = arith.constant 0 : index
    %c0_2 = arith.constant 0 : index
    %c0_3 = arith.constant 0 : index
    %1 = vector.load %arg2[%c0_1, %c0_2, %c0_3] : memref<1x60x64xbf16, #tpu.memory_space<vmem>>, vector<1x60x64xbf16>
    %2 = vector.shape_cast %1 : vector<1x60x64xbf16> to vector<60x64xbf16>
    %cst = arith.constant dense<0.000000e+00> : vector<30x64xf32>
    %3 = tpu.matmul %0, %2, %cst {dimension_numbers = #tpu.dot_dimension_numbers<[1], [0], [0], [1], [0, 0, 1, 1], [], []>} : vector<30x60xbf16>, vector<60x64xbf16>, vector<30x64xf32> -> vector<30x64xf32>
    %c0_4 = arith.constant 0 : index
    %c0_5 = arith.constant 0 : index
    %4 = vector.load %arg4[%c0_4, %c0_5] : memref<30x1xf32, #tpu.memory_space<vmem>>, vector<30x1xf32>
    %5 = vector.broadcast %4 : vector<30x1xf32> to vector<30x64xf32>
    %6 = arith.addf %3, %5 : vector<30x64xf32>
    %c0_6 = arith.constant 0 : index
    %c0_7 = arith.constant 0 : index
    %c0_8 = arith.constant 0 : index
    %7 = vector.load %arg5[%c0_6, %c0_7, %c0_8] : memref<1x30x64xbf16, #tpu.memory_space<vmem>>, vector<1x30x64xbf16>
    %8 = vector.shape_cast %7 : vector<1x30x64xbf16> to vector<30x64xbf16>
    %9 = arith.extf %8 : vector<30x64xbf16> to vector<30x64xf32>
    %10 = arith.addf %6, %9 : vector<30x64xf32>
    %11 = arith.truncf %10 : vector<30x64xf32> to vector<30x64xbf16>
    %c0_9 = arith.constant 0 : index
    %c0_10 = arith.constant 0 : index
    %c0_11 = arith.constant 0 : index
    %12 = vector.load %arg6[%c0_9, %c0_10, %c0_11] : memref<1x30x64xbf16, #tpu.memory_space<vmem>>, vector<1x30x64xbf16>
    %13 = vector.shape_cast %12 : vector<1x30x64xbf16> to vector<30x64xbf16>
    %14 = vector.shape_cast %11 : vector<30x64xbf16> to vector<1x30x64xbf16>
    tpu.vector_store %arg6[%c0_9, %c0_10, %c0_11], %14 {strides = array<i32>} : memref<1x30x64xbf16, #tpu.memory_space<vmem>>, vector<1x30x64xbf16>,
    return
  }
  func.func @transform_0(%arg0: i32, %arg1: i32) -> (i32, i32, i32) {
    %c0_i32 = arith.constant 0 : i32
    %c0_i32_0 = arith.constant 0 : i32
    return %arg0, %c0_i32, %arg1 : i32, i32, i32
  }
  func.func @transform_1(%arg0: i32, %arg1: i32) -> (i32, i32) {
    %c0_i32 = arith.constant 0 : i32
    %c0_i32_0 = arith.constant 0 : i32
    %c0_i32_1 = arith.constant 0 : i32
    return %c0_i32, %c0_i32_0 : i32, i32
  }
  func.func @transform_2(%arg0: i32, %arg1: i32) -> (i32, i32) {
    %c0_i32 = arith.constant 0 : i32
    %c0_i32_0 = arith.constant 0 : i32
    %c0_i32_1 = arith.constant 0 : i32
    return %c0_i32, %c0_i32_0 : i32, i32
  }
  func.func @transform_3(%arg0: i32, %arg1: i32) -> (i32, i32, i32) {
    %c0_i32 = arith.constant 0 : i32
    %c0_i32_0 = arith.constant 0 : i32
    return %arg0, %c0_i32, %arg1 : i32, i32, i32
  }
  func.func @transform_4(%arg0: i32, %arg1: i32) -> (i32, i32, i32) {
    %c0_i32 = arith.constant 0 : i32
    %c0_i32_0 = arith.constant 0 : i32
    return %arg0, %c0_i32, %arg1 : i32, i32, i32
  }
}

module attributes {stable_mosaic.version = 11 : i64} {
  func.func @_conv3x3_kernel(%arg0: i32, %arg1: memref<1x30x110xbf16, #tpu.memory_space<vmem>>, %arg2: memref<9x12x30xbf16, #tpu.memory_space<vmem>>, %arg3: memref<12x1xf32, #tpu.memory_space<vmem>>, %arg4: memref<1x12x80xf32, #tpu.memory_space<vmem>>) attributes {dimension_semantics = [#tpu.dimension_semantics<parallel>], iteration_bounds = array<i64: 2>, scalar_prefetch = 0 : i64, scratch_operands = 0 : i64, tpu.core_type = #tpu.core_type<tc>, window_params = [{transform_indices = @transform_0, window_bounds = array<i64: 1, 30, 110>}, {pipeline_mode = #tpu.pipeline_mode<synchronous>, transform_indices = @transform_1, window_bounds = array<i64: 9, 12, 30>}, {pipeline_mode = #tpu.pipeline_mode<synchronous>, transform_indices = @transform_2, window_bounds = array<i64: 12, 1>}, {transform_indices = @transform_3, window_bounds = array<i64: 1, 12, 80>}]} {
    %cst = arith.constant 0.000000e+00 : f32
    %0 = vector.broadcast %cst : f32 to vector<12x80xf32>
    %c0 = arith.constant 0 : index
    %c0_0 = arith.constant 0 : index
    %c0_1 = arith.constant 0 : index
    %1 = vector.load %arg1[%c0, %c0_0, %c0_1] : memref<1x30x110xbf16, #tpu.memory_space<vmem>>, vector<1x30x80xbf16>
    %2 = vector.shape_cast %1 : vector<1x30x80xbf16> to vector<30x80xbf16>
    %c0_2 = arith.constant 0 : index
    %c0_3 = arith.constant 0 : index
    %c0_4 = arith.constant 0 : index
    %3 = vector.load %arg2[%c0_2, %c0_3, %c0_4] : memref<9x12x30xbf16, #tpu.memory_space<vmem>>, vector<1x12x30xbf16>
    %4 = vector.shape_cast %3 : vector<1x12x30xbf16> to vector<12x30xbf16>
    %cst_5 = arith.constant dense<0.000000e+00> : vector<12x80xf32>
    %5 = tpu.matmul %4, %2, %cst_5 {dimension_numbers = #tpu.dot_dimension_numbers<[1], [0], [0], [1], [0, 0, 1, 1], [], []>} : vector<12x30xbf16>, vector<30x80xbf16>, vector<12x80xf32> -> vector<12x80xf32>
    %6 = arith.addf %0, %5 : vector<12x80xf32>
    %c0_6 = arith.constant 0 : index
    %c0_7 = arith.constant 0 : index
    %c1 = arith.constant 1 : index
    %7 = vector.load %arg1[%c0_6, %c0_7, %c1] : memref<1x30x110xbf16, #tpu.memory_space<vmem>>, vector<1x30x80xbf16>
    %8 = vector.shape_cast %7 : vector<1x30x80xbf16> to vector<30x80xbf16>
    %c1_8 = arith.constant 1 : index
    %c0_9 = arith.constant 0 : index
    %c0_10 = arith.constant 0 : index
    %9 = vector.load %arg2[%c1_8, %c0_9, %c0_10] : memref<9x12x30xbf16, #tpu.memory_space<vmem>>, vector<1x12x30xbf16>
    %10 = vector.shape_cast %9 : vector<1x12x30xbf16> to vector<12x30xbf16>
    %cst_11 = arith.constant dense<0.000000e+00> : vector<12x80xf32>
    %11 = tpu.matmul %10, %8, %cst_11 {dimension_numbers = #tpu.dot_dimension_numbers<[1], [0], [0], [1], [0, 0, 1, 1], [], []>} : vector<12x30xbf16>, vector<30x80xbf16>, vector<12x80xf32> -> vector<12x80xf32>
    %12 = arith.addf %6, %11 : vector<12x80xf32>
    %c0_12 = arith.constant 0 : index
    %c0_13 = arith.constant 0 : index
    %c2 = arith.constant 2 : index
    %13 = vector.load %arg1[%c0_12, %c0_13, %c2] : memref<1x30x110xbf16, #tpu.memory_space<vmem>>, vector<1x30x80xbf16>
    %14 = vector.shape_cast %13 : vector<1x30x80xbf16> to vector<30x80xbf16>
    %c2_14 = arith.constant 2 : index
    %c0_15 = arith.constant 0 : index
    %c0_16 = arith.constant 0 : index
    %15 = vector.load %arg2[%c2_14, %c0_15, %c0_16] : memref<9x12x30xbf16, #tpu.memory_space<vmem>>, vector<1x12x30xbf16>
    %16 = vector.shape_cast %15 : vector<1x12x30xbf16> to vector<12x30xbf16>
    %cst_17 = arith.constant dense<0.000000e+00> : vector<12x80xf32>
    %17 = tpu.matmul %16, %14, %cst_17 {dimension_numbers = #tpu.dot_dimension_numbers<[1], [0], [0], [1], [0, 0, 1, 1], [], []>} : vector<12x30xbf16>, vector<30x80xbf16>, vector<12x80xf32> -> vector<12x80xf32>
    %18 = arith.addf %12, %17 : vector<12x80xf32>
    %c0_18 = arith.constant 0 : index
    %c0_19 = arith.constant 0 : index
    %c10 = arith.constant 10 : index
    %19 = vector.load %arg1[%c0_18, %c0_19, %c10] : memref<1x30x110xbf16, #tpu.memory_space<vmem>>, vector<1x30x80xbf16>
    %20 = vector.shape_cast %19 : vector<1x30x80xbf16> to vector<30x80xbf16>
    %c3 = arith.constant 3 : index
    %c0_20 = arith.constant 0 : index
    %c0_21 = arith.constant 0 : index
    %21 = vector.load %arg2[%c3, %c0_20, %c0_21] : memref<9x12x30xbf16, #tpu.memory_space<vmem>>, vector<1x12x30xbf16>
    %22 = vector.shape_cast %21 : vector<1x12x30xbf16> to vector<12x30xbf16>
    %cst_22 = arith.constant dense<0.000000e+00> : vector<12x80xf32>
    %23 = tpu.matmul %22, %20, %cst_22 {dimension_numbers = #tpu.dot_dimension_numbers<[1], [0], [0], [1], [0, 0, 1, 1], [], []>} : vector<12x30xbf16>, vector<30x80xbf16>, vector<12x80xf32> -> vector<12x80xf32>
    %24 = arith.addf %18, %23 : vector<12x80xf32>
    %c0_23 = arith.constant 0 : index
    %c0_24 = arith.constant 0 : index
    %c11 = arith.constant 11 : index
    %25 = vector.load %arg1[%c0_23, %c0_24, %c11] : memref<1x30x110xbf16, #tpu.memory_space<vmem>>, vector<1x30x80xbf16>
    %26 = vector.shape_cast %25 : vector<1x30x80xbf16> to vector<30x80xbf16>
    %c4 = arith.constant 4 : index
    %c0_25 = arith.constant 0 : index
    %c0_26 = arith.constant 0 : index
    %27 = vector.load %arg2[%c4, %c0_25, %c0_26] : memref<9x12x30xbf16, #tpu.memory_space<vmem>>, vector<1x12x30xbf16>
    %28 = vector.shape_cast %27 : vector<1x12x30xbf16> to vector<12x30xbf16>
    %cst_27 = arith.constant dense<0.000000e+00> : vector<12x80xf32>
    %29 = tpu.matmul %28, %26, %cst_27 {dimension_numbers = #tpu.dot_dimension_numbers<[1], [0], [0], [1], [0, 0, 1, 1], [], []>} : vector<12x30xbf16>, vector<30x80xbf16>, vector<12x80xf32> -> vector<12x80xf32>
    %30 = arith.addf %24, %29 : vector<12x80xf32>
    %c0_28 = arith.constant 0 : index
    %c0_29 = arith.constant 0 : index
    %c12 = arith.constant 12 : index
    %31 = vector.load %arg1[%c0_28, %c0_29, %c12] : memref<1x30x110xbf16, #tpu.memory_space<vmem>>, vector<1x30x80xbf16>
    %32 = vector.shape_cast %31 : vector<1x30x80xbf16> to vector<30x80xbf16>
    %c5 = arith.constant 5 : index
    %c0_30 = arith.constant 0 : index
    %c0_31 = arith.constant 0 : index
    %33 = vector.load %arg2[%c5, %c0_30, %c0_31] : memref<9x12x30xbf16, #tpu.memory_space<vmem>>, vector<1x12x30xbf16>
    %34 = vector.shape_cast %33 : vector<1x12x30xbf16> to vector<12x30xbf16>
    %cst_32 = arith.constant dense<0.000000e+00> : vector<12x80xf32>
    %35 = tpu.matmul %34, %32, %cst_32 {dimension_numbers = #tpu.dot_dimension_numbers<[1], [0], [0], [1], [0, 0, 1, 1], [], []>} : vector<12x30xbf16>, vector<30x80xbf16>, vector<12x80xf32> -> vector<12x80xf32>
    %36 = arith.addf %30, %35 : vector<12x80xf32>
    %c0_33 = arith.constant 0 : index
    %c0_34 = arith.constant 0 : index
    %c20 = arith.constant 20 : index
    %37 = vector.load %arg1[%c0_33, %c0_34, %c20] : memref<1x30x110xbf16, #tpu.memory_space<vmem>>, vector<1x30x80xbf16>
    %38 = vector.shape_cast %37 : vector<1x30x80xbf16> to vector<30x80xbf16>
    %c6 = arith.constant 6 : index
    %c0_35 = arith.constant 0 : index
    %c0_36 = arith.constant 0 : index
    %39 = vector.load %arg2[%c6, %c0_35, %c0_36] : memref<9x12x30xbf16, #tpu.memory_space<vmem>>, vector<1x12x30xbf16>
    %40 = vector.shape_cast %39 : vector<1x12x30xbf16> to vector<12x30xbf16>
    %cst_37 = arith.constant dense<0.000000e+00> : vector<12x80xf32>
    %41 = tpu.matmul %40, %38, %cst_37 {dimension_numbers = #tpu.dot_dimension_numbers<[1], [0], [0], [1], [0, 0, 1, 1], [], []>} : vector<12x30xbf16>, vector<30x80xbf16>, vector<12x80xf32> -> vector<12x80xf32>
    %42 = arith.addf %36, %41 : vector<12x80xf32>
    %c0_38 = arith.constant 0 : index
    %c0_39 = arith.constant 0 : index
    %c21 = arith.constant 21 : index
    %43 = vector.load %arg1[%c0_38, %c0_39, %c21] : memref<1x30x110xbf16, #tpu.memory_space<vmem>>, vector<1x30x80xbf16>
    %44 = vector.shape_cast %43 : vector<1x30x80xbf16> to vector<30x80xbf16>
    %c7 = arith.constant 7 : index
    %c0_40 = arith.constant 0 : index
    %c0_41 = arith.constant 0 : index
    %45 = vector.load %arg2[%c7, %c0_40, %c0_41] : memref<9x12x30xbf16, #tpu.memory_space<vmem>>, vector<1x12x30xbf16>
    %46 = vector.shape_cast %45 : vector<1x12x30xbf16> to vector<12x30xbf16>
    %cst_42 = arith.constant dense<0.000000e+00> : vector<12x80xf32>
    %47 = tpu.matmul %46, %44, %cst_42 {dimension_numbers = #tpu.dot_dimension_numbers<[1], [0], [0], [1], [0, 0, 1, 1], [], []>} : vector<12x30xbf16>, vector<30x80xbf16>, vector<12x80xf32> -> vector<12x80xf32>
    %48 = arith.addf %42, %47 : vector<12x80xf32>
    %c0_43 = arith.constant 0 : index
    %c0_44 = arith.constant 0 : index
    %c22 = arith.constant 22 : index
    %49 = vector.load %arg1[%c0_43, %c0_44, %c22] : memref<1x30x110xbf16, #tpu.memory_space<vmem>>, vector<1x30x80xbf16>
    %50 = vector.shape_cast %49 : vector<1x30x80xbf16> to vector<30x80xbf16>
    %c8 = arith.constant 8 : index
    %c0_45 = arith.constant 0 : index
    %c0_46 = arith.constant 0 : index
    %51 = vector.load %arg2[%c8, %c0_45, %c0_46] : memref<9x12x30xbf16, #tpu.memory_space<vmem>>, vector<1x12x30xbf16>
    %52 = vector.shape_cast %51 : vector<1x12x30xbf16> to vector<12x30xbf16>
    %cst_47 = arith.constant dense<0.000000e+00> : vector<12x80xf32>
    %53 = tpu.matmul %52, %50, %cst_47 {dimension_numbers = #tpu.dot_dimension_numbers<[1], [0], [0], [1], [0, 0, 1, 1], [], []>} : vector<12x30xbf16>, vector<30x80xbf16>, vector<12x80xf32> -> vector<12x80xf32>
    %54 = arith.addf %48, %53 : vector<12x80xf32>
    %c0_48 = arith.constant 0 : index
    %c0_49 = arith.constant 0 : index
    %55 = vector.load %arg3[%c0_48, %c0_49] : memref<12x1xf32, #tpu.memory_space<vmem>>, vector<12x1xf32>
    %56 = vector.broadcast %55 : vector<12x1xf32> to vector<12x80xf32>
    %57 = arith.addf %54, %56 : vector<12x80xf32>
    %c0_50 = arith.constant 0 : index
    %c0_51 = arith.constant 0 : index
    %c0_52 = arith.constant 0 : index
    %58 = vector.load %arg4[%c0_50, %c0_51, %c0_52] : memref<1x12x80xf32, #tpu.memory_space<vmem>>, vector<1x12x80xf32>
    %59 = vector.shape_cast %58 : vector<1x12x80xf32> to vector<12x80xf32>
    %60 = vector.shape_cast %57 : vector<12x80xf32> to vector<1x12x80xf32>
    tpu.vector_store %arg4[%c0_50, %c0_51, %c0_52], %60 {strides = array<i32>} : memref<1x12x80xf32, #tpu.memory_space<vmem>>, vector<1x12x80xf32>,
    return
  }
  func.func @transform_0(%arg0: i32) -> (i32, i32, i32) {
    %c0_i32 = arith.constant 0 : i32
    %c0_i32_0 = arith.constant 0 : i32
    %c0_i32_1 = arith.constant 0 : i32
    return %arg0, %c0_i32, %c0_i32_0 : i32, i32, i32
  }
  func.func @transform_1(%arg0: i32) -> (i32, i32, i32) {
    %c0_i32 = arith.constant 0 : i32
    %c0_i32_0 = arith.constant 0 : i32
    %c0_i32_1 = arith.constant 0 : i32
    %c0_i32_2 = arith.constant 0 : i32
    return %c0_i32, %c0_i32_0, %c0_i32_1 : i32, i32, i32
  }
  func.func @transform_2(%arg0: i32) -> (i32, i32) {
    %c0_i32 = arith.constant 0 : i32
    %c0_i32_0 = arith.constant 0 : i32
    %c0_i32_1 = arith.constant 0 : i32
    return %c0_i32, %c0_i32_0 : i32, i32
  }
  func.func @transform_3(%arg0: i32) -> (i32, i32, i32) {
    %c0_i32 = arith.constant 0 : i32
    %c0_i32_0 = arith.constant 0 : i32
    %c0_i32_1 = arith.constant 0 : i32
    return %arg0, %c0_i32, %c0_i32_0 : i32, i32, i32
  }
}

</mosaic_0001>

<bundles_post_ra>
// kernel: lgtt_forward.17
= control target key start
LH: loop header
LB: loop body
LE: loop exit
PB: predicated region body
PF: predicated region fallthrough
CT: control target
= control target key end

     0   :  { %s642_s12 = smov 0   ;;  %s644_s13 = smov 0   ;;  %s727_s0 = inlined_call_operand.vmem [shape: bf16[2,30,64], index: 0, kind: input, shape index: {}]   ;;  %s728_s1 = inlined_call_operand.vmem [shape: bf16[60,30], index: 1, kind: input, shape index: {}]   ;;  %s729_s2 = inlined_call_operand.vmem [shape: f32[60,1], index: 2, kind: input, shape index: {}]   ;;  %s730_s3 = inlined_call_operand.vmem [shape: bf16[2,60,64], index: 3, kind: output, shape index: {}]  }
   0x1   :  { %s646_s14 = smov 0  }
   0x2 LB: > { %s25_s15 = sadd.s32 1, %s615_s13  ;;  %p505_p0 = scmp.ge.s32.totalorder %s619_s14, 1  ;;  %s619_s14 = sphi %s646_s14, %s13_s14   ;;  %s615_s13 = sphi %s644_s13, %s732_s13   ;;  %s611_s12 = sphi %s642_s12, %s731_s12  }
   0x3   : > { %p27_p1 = scmp.ge.s32.totalorder %s25_s15, 2  ;;  %p156_p2 = scmp.lt.s32.totalorder %s619_s14, 3 }
   0x5   : > { %s734_s15 = smov (%p27_p1, %s25_s15), 0  ;;  %p157_p3 = pnand %p505_p0, %p156_p2 }
   0x6   : > { %p186_p4 = scmp.lt.s32.totalorder (!%p157_p3), %s611_s12, 1  ;;  %v593_v0 = vld [vmem:[%s728_s1] sm:$0xff] (!%p157_p3)   ;;  %vm294_vm0 = vcmask (!%p157_p3), 244736   ;;  %v594_v1 = vld [vmem:[%s728_s1 + $0x10] sm:$0xff] (!%p157_p3)   ;;  %v621_v2 = vmov (!%p157_p3), 0   ;;  %vm307_vm1 = vcmask (!%p157_p3), 1046528  }
   0x7   : > { %160 = sbr.rel (%p157_p3) target bundleno = 247 (0xf7), region = 32  ;;  %550 = vmatprep.mubr.msk.bf16.mxu0 (!%p157_p3), %vm294_vm0, %v593_v0  ;;  %554 = vmatprep.mubr.msk.bf16.mxu1 (!%p157_p3), %vm294_vm0, %v594_v1  ;;  %v217_v3 = vld [vmem:[%s729_s2 + $0x10] sm:$0xff] (!%p157_p3)  ;;  %v215_v4 = vld [vmem:[%s729_s2] sm:$0xff] (!%p157_p3)  ;;  %v218_v7 = vld [vmem:[%s729_s2 + $0x18] sm:$0xff] (!%p157_p3)  ;;  %vm408_vm2 = vcmask (!%p157_p3), 519168   ;;  %vm416_vm3 = vcmask (!%p157_p3), 517120  }
   0x8   : > { %590 = vset.pattern.permute.xlu1 (!%p157_p3), %v621_v2  ;;  %589 = vset.pattern.permute.xlu0 (!%p157_p3), %v621_v2  ;;  %v216_v8 = vld [vmem:[%s729_s2 + $0x8] sm:$0xff] (!%p157_p3)  ;;  %v596_v11 = vld [vmem:[%s728_s1 + $0x18] sm:$0x3f] (!%p157_p3)   ;;  %v219_v13 = vld [vmem:[%s729_s2 + $0x20] sm:$0xff] (!%p157_p3) }
   0x9   : > { %235 = vperm.xlu1 (!%p157_p3), %590, %v217_v3   ;;  %225 = vperm.xlu0 (!%p157_p3), %589, %v215_v4   ;;  %v595_v10 = vld [vmem:[%s728_s1 + $0x8] sm:$0xff] (!%p157_p3)   ;;  %v222_v14 = vld [vmem:[%s729_s2 + $0x38] sm:$0xf] (!%p157_p3)  ;;  %v221_v15 = vld [vmem:[%s729_s2 + $0x30] sm:$0xff] (!%p157_p3) }
   0xa   : > { %v220_v12 = vld [vmem:[%s729_s2 + $0x28] sm:$0xff] (!%p157_p3) }
   0xd   : > { %240 = vperm.xlu1 (!%p157_p3), %590, %v218_v7   ;;  %230 = vperm.xlu0 (!%p157_p3), %589, %v216_v8  }
   0xe   : > { %s736_s12 = smov (!%p186_p4, %s611_s12), 1 }
   0xf   : > { %s530_s20 = sshll.u32 %s736_s12, 4  ;;  %s531_s21 = sshll.u32 %s736_s12, 5 }
  0x10   : > { %s193_s27 = scalar_lea.vmem %s727_s0, %s530_s20  ;;  %s201_s24 = scalar_lea.vmem %s730_s3, %s531_s21 }
  0x11   : > { %v591_v5 = vld [vmem:[%s193_s27] sm:$0xff]   ;;  %v592_v6 = vld [vmem:[%s193_s27 + $0x8] sm:$0x7f]   ;;  %250 = vperm.xlu1 %590, %v220_v12   ;;  %245 = vperm.xlu0 %589, %v219_v13  }
  0x12   : > { %546 = vmatprep.subr.bf16.mxu0 %v591_v5  ;;  %558 = vmatprep.subr.bf16.mxu1 %v591_v5  ;;  %v309_v9 = vsel %vm307_vm1, %v592_v6, 0 }
  0x13   : > { %547 = vmatpush3.bf16.msra.mxu0 %v591_v5  ;;  %560 = vmatpush3.bf16.msra.mxu1 %v591_v5 }
  0x14   : > { %562 = vmatprep.subr.msk.bf16.mxu0 %vm307_vm1, %v592_v6  ;;  %563 = vmatprep.subr.msk.bf16.mxu1 %vm307_vm1, %v592_v6 }
  0x15   : > { %260 = vperm.xlu1 %590, %v222_v14   ;;  %255 = vperm.xlu0 %589, %v221_v15  }
  0x17   : > { %549 = vmatpush3.bf16.msra.mxu0 %v309_v9  ;;  %561 = vmatpush3.bf16.msra.mxu1 %v309_v9 }
  0x1a   : > { %551 = vmatmul.mubr.msk.bf16.vlgmr.msra.gmra.mrb[0].mxu0 %vm294_vm0, %v595_v10  ;;  %555 = vmatmul.mubr.msk.bf16.vlgmr.msra.gmra.mrb[0].mxu1 %vm294_vm0, %v596_v11 }
  0x88   : > { %v236_v16 = vpop.permute.xlu1 %235  ;;  %v226_v17 = vpop.permute.xlu0 %225 }
  0x8c   : > { %v241_v18 = vpop.permute.xlu1 %240  ;;  %v231_v19 = vpop.permute.xlu0 %230 }
  0x90   : > { %v251_v20 = vpop.permute.xlu1 %250  ;;  %v246_v21 = vpop.permute.xlu0 %245 }
  0x94   : > { %v261_v22 = vpop.permute.xlu1 %260  ;;  %v256_v23 = vpop.permute.xlu0 %255 }
  0xed   : > { %v552_v24 = vpop.f32.mrb[0].mxu0  ;;  %v556_v25 = vpop.f32.mrb[0].mxu1 }
  0xee   : > { %v354_v26 = vadd.f32 %v552_v24, %v236_v16  ;;  %v370_v27 = vadd.f32 %v556_v25, %v256_v23  ;;  %v345_v28 = vpop.f32.mrb[1].mxu0  ;;  %v361_v29 = vpop.f32.mrb[1].mxu1 }
  0xef   : > { %v346_v30 = vadd.f32 %v345_v28, %v226_v17  ;;  %v362_v31 = vadd.f32 %v361_v29, %v246_v21  ;;  %v553_v32 = vpop.f32.mrb[2].mxu0  ;;  %v557_v33 = vpop.f32.mrb[2].mxu1 }
  0xf0   : > { %v534_v34 = vpack.c.bf16 %v354_v26, %v354_v26  ;;  %v538_v35 = vpack.c.bf16 %v370_v27, %v370_v27  ;;  %v357_v36 = vadd.f32 %v553_v32, %v241_v18  ;;  %v373_v37 = vadd.f32 %v557_v33, %v261_v22  ;;  %v348_v38 = vpop.f32.mrb[3].mxu0  ;;  %v364_v39 = vpop.f32.mrb[3].mxu1 }
  0xf1   : > { %v532_v40 = vpack.c.bf16 %v346_v30, %v346_v30  ;;  %v536_v41 = vpack.c.bf16 %v362_v31, %v362_v31  ;;  %v349_v42 = vadd.f32 %v348_v38, %v231_v19  ;;  %v365_v43 = vadd.f32 %v364_v39, %v251_v20 }
  0xf2   : > { %411 = vst.msk [vmem:[%s201_s24 + $0x8] sm:$0xf] %vm408_vm2, %v534_v34  ;;  %415 = vst.msk [vmem:[%s201_s24 + $0x18] sm:$0xf] %vm408_vm2, %v538_v35  ;;  %v535_v44 = vpack.c.bf16 %v357_v36, %v357_v36  ;;  %v539_v45 = vpack.c.bf16 %v373_v37, %v373_v37 }
  0xf3   : > { %409 = vst.msk [vmem:[%s201_s24] sm:$0xf] %vm408_vm2, %v532_v40  ;;  %413 = vst.msk [vmem:[%s201_s24 + $0x10] sm:$0xf] %vm408_vm2, %v536_v41  ;;  %v533_v46 = vpack.c.bf16 %v349_v42, %v349_v42  ;;  %v537_v47 = vpack.c.bf16 %v365_v43, %v365_v43 }
  0xf4   : > { %412 = vst.msk [vmem:[%s201_s24 + $0xc] sm:$0xf] %vm408_vm2, %v535_v44 }
  0xf5   : > { %417 = vst.msk [vmem:[%s201_s24 + $0x1c] sm:$0x3] %vm416_vm3, %v539_v45 }
  0xf6   : > { %410 = vst.msk [vmem:[%s201_s24 + $0x4] sm:$0xf] %vm408_vm2, %v533_v46  ;;  %414 = vst.msk [vmem:[%s201_s24 + $0x14] sm:$0xf] %vm408_vm2, %v537_v47 }
  0xf7 PF: > { %s13_s14 = sadd.s32 1, %s619_s14   ;;  %s731_s12 = smov %s615_s13 }
  0xf8   : > { %p10_p5 = scmp.ge.s32.totalorder %s13_s14, 4   ;;  %s732_s13 = smov %s734_s15 }
  0xfa   :  { %12 = sbr.rel (!%p10_p5) target bundleno = 2 (0x2), region = 62 }

// kernel: lgtt_forward.16
= control target key start
LH: loop header
LB: loop body
LE: loop exit
PB: predicated region body
PF: predicated region fallthrough
CT: control target
= control target key end

     0   :  { %s1336_s12 = smov 0   ;;  %s1441_s0 = inlined_call_operand.vmem [shape: bf16[2,3,110], index: 0, kind: input, shape index: {}]   ;;  %s1442_s1 = inlined_call_operand.vmem [shape: bf16[9,30,3], index: 1, kind: input, shape index: {}]   ;;  %s1443_s2 = inlined_call_operand.vmem [shape: f32[30,1], index: 2, kind: input, shape index: {}]   ;;  %s1444_s3 = inlined_call_operand.vmem [shape: bf16[2,30,80], index: 3, kind: output, shape index: {}]  }
   0x1 LB: > { %s1051_s13 = sadd.s32 4294967295, %s1303_s12   ;;  %p1055_p0 = scmp.ge.s32.totalorder %s1303_s12, 1  ;;  %s1303_s12 = sphi %s1336_s12, %s13_s12  }
   0x2   : > { %p136_p1 = scmp.lt.s32.totalorder %s1303_s12, 3 }
   0x4   : > { %p137_p2 = pnand %p1055_p0, %p136_p1 }
   0x5   : > { %p159_p3 = scmp.lt.s32.totalorder (!%p137_p2), %s1051_s13, 1  ;;  %v193_v0 = vlaneseq (!%p137_p2)  ;;  %v1305_v1 = vmov (!%p137_p2), 1983009808   ;;  %vm199_vm0 = vcmask (!%p137_p2), 23552   ;;  %v1279_v4 = vld [vmem:[%s1442_s1 + $0x40] sm:$0xff] (!%p137_p2)   ;;  %v1281_v6 = vld [vmem:[%s1442_s1 + $0x10] sm:$0xff] (!%p137_p2)  }
   0x6   : > { %140 = sbr.rel (%p137_p2) target bundleno = 408 (0x198), region = 32  ;;  %v191_v2 = vunpack.c.l.s4 (!%p137_p2), %v1305_v1  ;;  %1198 = vmatprep.mubr.msk.bf16.mxu0 (!%p137_p2), %vm199_vm0, %v1279_v4  ;;  %1174 = vmatprep.mubr.msk.bf16.mxu1 (!%p137_p2), %vm199_vm0, %v1281_v6  ;;  %s1306_s22 = smov (!%p137_p2), 117   ;;  %v947_v11 = vld [vmem:[%s1443_s2 + $0x8] sm:$0xff] (!%p137_p2)  ;;  %v946_v12 = vld [vmem:[%s1443_s2] sm:$0xff] (!%p137_p2)  ;;  %v1314_v13 = vmov (!%p137_p2), 0   ;;  %v948_v14 = vld [vmem:[%s1443_s2 + $0x10] sm:$0xff] (!%p137_p2) }
   0x7   : > { %v194_v3 = vshrl.u32 (!%p137_p2), %v193_v0, 7  ;;  %s1307_s23 = smov (!%p137_p2), 116   ;;  %s1308_s24 = smov (!%p137_p2), 127   ;;  %1278 = vset.pattern.permute.xlu1 (!%p137_p2), %v1314_v13  ;;  %1277 = vset.pattern.permute.xlu0 (!%p137_p2), %v1314_v13  ;;  %v949_v15 = vld [vmem:[%s1443_s2 + $0x18] sm:$0x3f] (!%p137_p2)  ;;  %vm206_vm1 = vcmask (!%p137_p2), 1040384  }
   0x8   : > { %v192_v5 = vunpack.c.0.s8 (!%p137_p2), %v191_v2  ;;  %s1309_s25 = smov (!%p137_p2), 108   ;;  %s1310_s26 = smov (!%p137_p2), 107   ;;  %vm207_vm2 = vcmask (!%p137_p2), 1041408   ;;  %v1315_v16 = vmov (!%p137_p2), 65535   ;;  %v1280_v23 = vld [vmem:[%s1442_s1 + $0x48] sm:$0x7f] (!%p137_p2)  }
   0x9   : > { %s1311_s27 = smov (!%p137_p2), 126   ;;  %s1312_s28 = smov (!%p137_p2), 106   ;;  %v208_v17 = vsel (!%p137_p2), %vm206_vm1, 4294967295, %v1315_v16  ;;  %v1283_v28 = vld [vmem:[%s1442_s1 + $0x50] sm:$0xff] (!%p137_p2)   ;;  %v1282_v30 = vld [vmem:[%s1442_s1 + $0x18] sm:$0x7f] (!%p137_p2)  }
   0xa   : > { %v195_v7 = vsub.s32 (!%p137_p2), %v192_v5, %v194_v3  ;;  %s1313_s29 = smov (!%p137_p2), 118   ;;  %v209_v18 = vsel (!%p137_p2), %vm207_vm2, %v208_v17, 0  ;;  %v1285_v31 = vld [vmem:[%s1442_s1] sm:$0xff] (!%p137_p2)   ;;  %v1284_v35 = vld [vmem:[%s1442_s1 + $0x58] sm:$0x7f] (!%p137_p2)   ;;  %v1291_v44 = vld [vmem:[%s1442_s1 + $0x70] sm:$0xff] (!%p137_p2)  }
   0xb   : > { %v1287_v36 = vld [vmem:[%s1442_s1 + $0x60] sm:$0xff] (!%p137_p2)   ;;  %v1286_v39 = vld [vmem:[%s1442_s1 + $0x8] sm:$0x7f] (!%p137_p2)   ;;  %v1293_v47 = vld [vmem:[%s1442_s1 + $0x30] sm:$0xff] (!%p137_p2)   ;;  %vm990_vm3 = vcmask (!%p137_p2), 650240   ;;  %vm994_vm4 = vcmask (!%p137_p2), 649216  }
   0xc   : > { %v1289_v40 = vld [vmem:[%s1442_s1 + $0x20] sm:$0xff] (!%p137_p2)   ;;  %v1288_v43 = vld [vmem:[%s1442_s1 + $0x68] sm:$0x7f] (!%p137_p2)   ;;  %v1292_v48 = vld [vmem:[%s1442_s1 + $0x78] sm:$0x7f] (!%p137_p2)  }
   0xd   : > { %s1446_s13 = smov (!%p159_p3, %s1051_s13), 1  ;;  %v1290_v46 = vld [vmem:[%s1442_s1 + $0x28] sm:$0x7f]   ;;  %v1295_v49 = vld [vmem:[%s1442_s1 + $0x80] sm:$0xff]   ;;  %v1294_v50 = vld [vmem:[%s1442_s1 + $0x38] sm:$0x7f]  }
   0xe   : > { %s1056_s18 = sshll.u32 %s1446_s13, 1  ;;  %v1296_v51 = vld [vmem:[%s1442_s1 + $0x88] sm:$0x7f]   ;;  %s1140_s20 = sshll.u32 %s1446_s13, 4 }
   0xf   : > { %s162_s21 = scalar_lea.vmem %s1441_s0, %s1056_s18 }
  0x10   : > { %v1095_v8 = vld.sshfl [vmem:[%s162_s21] sm:$0x3 pattern:$0x76325410] }
  0x11   : > { %v169_v9 = vld [vmem:[%s162_s21] sm:$0x3]  ;;  %530 = vrot.lane.b32.xlu0 %v1095_v8, %s1306_s22  ;;  %618 = vrot.lane.b32.xlu1 %v1095_v8, %s1307_s23  ;;  %s167_s23 = scalar_lea.vmem %s1444_s3, %s1140_s20 }
  0x12   : > { %v196_v10 = vrot.slane %v169_v9, %v195_v7  ;;  %v279_v29 = vand.u32 %v209_v18, %v169_v9 }
  0x15   : > { %197 = vrot.lane.b32.xlu0 %v196_v10, %s1308_s24  ;;  %706 = vrot.lane.b32.xlu1 %v1095_v8, %s1309_s25 }
  0x19   : > { %794 = vrot.lane.b32.xlu1 %v1095_v8, %s1310_s26  ;;  %354 = vrot.lane.b32.xlu0 %v1095_v8, %s1311_s27 }
  0x1d   : > { %882 = vrot.lane.b32.xlu1 %v1095_v8, %s1312_s28  ;;  %442 = vrot.lane.b32.xlu0 %v1095_v8, %s1313_s29 }
  0x21   : > { %957 = vperm.xlu1 %1278, %v947_v11   ;;  %952 = vperm.xlu0 %1277, %v946_v12  }
  0x25   : > { %962 = vperm.xlu1 %1278, %v948_v14   ;;  %967 = vperm.xlu0 %1277, %v949_v15  }
  0x83   : > { %v531_v19 = vpop.permute.xlu0 %530  ;;  %v619_v20 = vpop.permute.xlu1 %618 }
  0x84   : > { %v539_v21 = vand.u32 %v531_v19, %v209_v18  ;;  %v627_v22 = vand.u32 %v619_v20, %v209_v18 }
  0x86   : > { %1196 = vmatprep.subr.bf16.mxu0 %v539_v21 }
  0x87   : > { %1197 = vmatpush3.bf16.msra.mxu0 %v539_v21  ;;  %v198_v24 = vpop.permute.xlu0 %197  ;;  %v707_v25 = vpop.permute.xlu1 %706 }
  0x88   : > { %v211_v26 = vand.u32 %v209_v18, %v198_v24  ;;  %1202 = vmatprep.subr.bf16.mxu0 %v627_v22  ;;  %v715_v27 = vand.u32 %v707_v25, %v209_v18 }
  0x8a   : > { %1172 = vmatprep.subr.bf16.mxu1 %v211_v26  ;;  %1199 = vmatmul.mubr.msk.bf16.vlgmr.msra.gmra.mrb[0].mxu0 %vm199_vm0, %v1280_v23 }
  0x8b   : > { %1173 = vmatpush3.bf16.msra.mxu1 %v211_v26  ;;  %1203 = vmatpush3.bf16.msra.mxu0 %v627_v22  ;;  %v355_v32 = vpop.permute.xlu0 %354  ;;  %v795_v34 = vpop.permute.xlu1 %794 }
  0x8c   : > { %1204 = vmatprep.mubr.msk.bf16.mxu0 %vm199_vm0, %v1283_v28  ;;  %1208 = vmatprep.subr.bf16.mxu0 %v715_v27  ;;  %v363_v33 = vand.u32 %v355_v32, %v209_v18  ;;  %v803_v37 = vand.u32 %v795_v34, %v209_v18 }
  0x8d   : > { %1178 = vmatprep.subr.bf16.mxu1 %v279_v29 }
  0x8e   : > { %1175 = vmatmul.mubr.msk.bf16.vlgmr.msra.gmra.mrb[0].mxu1 %vm199_vm0, %v1282_v30 }
  0x8f   : > { %1179 = vmatpush3.bf16.msra.mxu1 %v279_v29  ;;  %1180 = vmatprep.mubr.msk.bf16.mxu1 %vm199_vm0, %v1285_v31  ;;  %v443_v38 = vpop.permute.xlu0 %442  ;;  %v883_v42 = vpop.permute.xlu1 %882 }
  0x90   : > { %1184 = vmatprep.subr.bf16.mxu1 %v363_v33  ;;  %v451_v41 = vand.u32 %v443_v38, %v209_v18  ;;  %v891_v45 = vand.u32 %v883_v42, %v209_v18 }
  0x96   : > { %1205 = vmatmul.mubr.msk.bf16.vlgmr.msra.gmra.mrb[0].mxu0 %vm199_vm0, %v1284_v35 }
  0x97   : > { %1209 = vmatpush3.bf16.msra.mxu0 %v715_v27  ;;  %1210 = vmatprep.mubr.msk.bf16.mxu0 %vm199_vm0, %v1287_v36 }
  0x98   : > { %1214 = vmatprep.subr.bf16.mxu0 %v803_v37 }
  0x9a   : > { %1181 = vmatmul.mubr.msk.bf16.vlgmr.msra.gmra.mrb[0].mxu1 %vm199_vm0, %v1286_v39 }
  0x9b   : > { %1185 = vmatpush3.bf16.msra.mxu1 %v363_v33  ;;  %1186 = vmatprep.mubr.msk.bf16.mxu1 %vm199_vm0, %v1289_v40 }
  0x9c   : > { %1190 = vmatprep.subr.bf16.mxu1 %v451_v41 }
  0xa0   : > { %v958_v55 = vpop.permute.xlu1 %957  ;;  %v953_v57 = vpop.permute.xlu0 %952 }
  0xa2   : > { %1211 = vmatmul.mubr.msk.bf16.vlgmr.msra.gmra.mrb[0].mxu0 %vm199_vm0, %v1288_v43 }
  0xa3   : > { %1215 = vmatpush3.bf16.msra.mxu0 %v803_v37  ;;  %1216 = vmatprep.mubr.msk.bf16.mxu0 %vm199_vm0, %v1291_v44 }
  0xa4   : > { %1220 = vmatprep.subr.bf16.mxu0 %v891_v45  ;;  %v963_v59 = vpop.permute.xlu1 %962  ;;  %v968_v4 = vpop.permute.xlu0 %967 }
  0xa6   : > { %1187 = vmatmul.mubr.msk.bf16.vlgmr.msra.gmra.mrb[0].mxu1 %vm199_vm0, %v1290_v46 }
  0xa7   : > { %1191 = vmatpush3.bf16.msra.mxu1 %v451_v41  ;;  %1192 = vmatprep.mubr.msk.bf16.mxu1 %vm199_vm0, %v1293_v47 }
  0xae   : > { %1217 = vmatmul.mubr.msk.bf16.vlgmr.msra.gmra.mrb[0].mxu0 %vm199_vm0, %v1292_v48 }
  0xaf   : > { %1221 = vmatpush3.bf16.msra.mxu0 %v891_v45  ;;  %1222 = vmatprep.mubr.msk.bf16.mxu0 %vm199_vm0, %v1295_v49 }
  0xb2   : > { %1193 = vmatmul.mubr.msk.bf16.vlgmr.msra.gmra.mrb[0].mxu1 %vm199_vm0, %v1294_v50 }
  0xba   : > { %1223 = vmatmul.mubr.msk.bf16.vlgmr.msra.gmra.mrb[0].mxu0 %vm199_vm0, %v1296_v51 }
 0x185   : > { %v1194_v52 = vpop.f32.mrb[0].mxu1 }
 0x186   : > { %v487_v53 = vpop.f32.mrb[1].mxu1 }
 0x187   : > { %v1195_v54 = vpop.f32.mrb[2].mxu1 }
 0x188   : > { %v490_v56 = vpop.f32.mrb[3].mxu1 }
 0x18d   : > { %v1224_v58 = vpop.f32.mrb[0].mxu0 }
 0x18e   : > { %v1226_v60 = vadd.f32 %v1224_v58, %v1194_v52  ;;  %v927_v61 = vpop.f32.mrb[1].mxu0 }
 0x18f   : > { %v1227_v62 = vadd.f32 %v927_v61, %v487_v53  ;;  %v1225_v63 = vpop.f32.mrb[2].mxu0 }
 0x190   : > { %v972_v0 = vadd.f32 %v1226_v60, %v963_v59  ;;  %v1228_v1 = vadd.f32 %v1225_v63, %v1195_v54  ;;  %v930_v2 = vpop.f32.mrb[3].mxu0 }
 0x191   : > { %v970_v3 = vadd.f32 %v1227_v62, %v953_v57  ;;  %v1229_v5 = vadd.f32 %v930_v2, %v490_v56 }
 0x192   : > { %v1143_v6 = vpack.c.bf16 %v972_v0, %v972_v0  ;;  %v973_v7 = vadd.f32 %v1228_v1, %v968_v4 }
 0x193   : > { %v1141_v8 = vpack.c.bf16 %v970_v3, %v970_v3  ;;  %v971_v9 = vadd.f32 %v1229_v5, %v958_v55 }
 0x194   : > { %993 = vst.msk [vmem:[%s167_s23 + $0x8] sm:$0xf] %vm990_vm3, %v1143_v6  ;;  %v1144_v10 = vpack.c.bf16 %v973_v7, %v973_v7 }
 0x195   : > { %991 = vst.msk [vmem:[%s167_s23] sm:$0xf] %vm990_vm3, %v1141_v8  ;;  %v1142_v11 = vpack.c.bf16 %v971_v9, %v971_v9 }
 0x196   : > { %995 = vst.msk [vmem:[%s167_s23 + $0xc] sm:$0x7] %vm994_vm4, %v1144_v10 }
 0x197   : > { %992 = vst.msk [vmem:[%s167_s23 + $0x4] sm:$0xf] %vm990_vm3, %v1142_v11 }
 0x198 PF: > { %s13_s12 = sadd.s32 1, %s1303_s12  }
 0x199   : > { %p10_p4 = scmp.ge.s32.totalorder %s13_s12, 4  }
 0x19b   :  { %12 = sbr.rel (!%p10_p4) target bundleno = 1 (0x1), region = 70 }

// kernel: lgtt_forward.19
= control target key start
LH: loop header
LB: loop body
LE: loop exit
PB: predicated region body
PF: predicated region fallthrough
CT: control target
= control target key end

     0   :  { %s2342_s9 = smov 0   ;;  %s2793_s0 = inlined_call_operand.vmem [shape: bf16[24,16,5], index: 0, kind: input, shape index: {}]   ;;  %s2794_s1 = inlined_call_operand.vmem [shape: bf16[24,16,5], index: 1, kind: input, shape index: {}]   ;;  %s2795_s2 = inlined_call_operand.vmem [shape: bf16[24,16,5], index: 2, kind: output, shape index: {}]  }
   0x1 LB: > { %s1883_s10 = sadd.s32 4294967295, %s2323_s9   ;;  %p1887_p0 = scmp.ge.s32.totalorder %s2323_s9, 1  ;;  %s2323_s9 = sphi %s2342_s9, %s12_s9  }
   0x2   : > { %p126_p1 = scmp.lt.s32.totalorder %s2323_s9, 3 }
   0x4   : > { %p127_p2 = pnand %p1887_p0, %p126_p1 }
   0x5   : > { %s156_s11 = smul.u32 (!%p127_p2), 12, %s1883_s10  ;;  %v2325_v0 = vmov (!%p127_p2), 0.0   ;;  %vm2326_vm0 = vmmov (!%p127_p2), 0   ;;  %vm207_vm1 = vcmask (!%p127_p2), 39936   ;;  %vm791_vm2 = vcmask (!%p127_p2), 130048  }
   0x6   : > { %130 = sbr.rel (%p127_p2) target bundleno = 818 (0x332), region = 28  ;;  %2043 = vmatprep.subr.bf16.mxu0 (!%p127_p2), %v2325_v0  ;;  %2049 = vmatprep.subr.bf16.mxu1 (!%p127_p2), %v2325_v0  ;;  %vm1788_vm3 = vcmask (!%p127_p2), 35840  }
   0x7   : > { %p157_p3 = scmp.lt.s32.totalorder (!%p127_p2), %s156_s11, 23  ;;  %2045 = vmatprep.mubr.msk.bf16.mxu0 (!%p127_p2), %vm2326_vm0, %v2325_v0  ;;  %2051 = vmatprep.mubr.msk.bf16.mxu1 (!%p127_p2), %vm2326_vm0, %v2325_v0 }
   0xd   : > { %s2797_s11 = smov (!%p157_p3, %s156_s11), 23 }
   0xe   : > { %s2356_s12 = sshll.u32 %s2797_s11, 3 }
   0xf   : > { %s2362_s15 = scalar_lea.vmem %s2793_s0, %s2356_s12  ;;  %s2381_s18 = scalar_lea.vmem %s2794_s1, %s2356_s12 }
  0x10   : > { %v2197_v1 = vld [vmem:[%s2362_s15] sm:$0xff]   ;;  %v2198_v2 = vld [vmem:[%s2362_s15 + $0x8] sm:$0xff]   ;;  %v2199_v5 = vld [vmem:[%s2362_s15 + $0x10] sm:$0xff]   ;;  %s2740_s21 = scalar_lea.vmem %s2795_s2, %s2356_s12 }
  0x11   : > { %v209_v3 = vsel %vm207_vm1, %v2197_v1, 0  ;;  %v258_v4 = vsel %vm207_vm1, %v2198_v2, 0  ;;  %v2200_v6 = vld [vmem:[%s2362_s15 + $0x18] sm:$0xff]   ;;  %v307_v7 = vsel %vm207_vm1, %v2199_v5, 0  ;;  %v2201_v8 = vld [vmem:[%s2362_s15 + $0x20] sm:$0xff]   ;;  %v2202_v10 = vld [vmem:[%s2362_s15 + $0x28] sm:$0xff]  }
  0x12   : > { %2044 = vmatpush3.bf16.xpose.msra.mxu0 %v209_v3  ;;  %2050 = vmatpush3.bf16.xpose.msra.mxu1 %v258_v4  ;;  %v356_v9 = vsel %vm207_vm1, %v2200_v6, 0  ;;  %v405_v11 = vsel %vm207_vm1, %v2201_v8, 0  ;;  %v454_v12 = vsel %vm207_vm1, %v2202_v10, 0  ;;  %v2203_v13 = vld [vmem:[%s2362_s15 + $0x30] sm:$0xff]   ;;  %v2204_v14 = vld [vmem:[%s2362_s15 + $0x38] sm:$0xff]   ;;  %v2205_v17 = vld [vmem:[%s2362_s15 + $0x40] sm:$0xff]  }
  0x13   : > { %2055 = vmatprep.subr.bf16.mxu0 %v2325_v0  ;;  %2061 = vmatprep.subr.bf16.mxu1 %v2325_v0  ;;  %v503_v15 = vsel %vm207_vm1, %v2203_v13, 0  ;;  %v552_v16 = vsel %vm207_vm1, %v2204_v14, 0  ;;  %v2206_v18 = vld [vmem:[%s2362_s15 + $0x48] sm:$0xff]   ;;  %v601_v19 = vsel %vm207_vm1, %v2205_v17, 0  ;;  %v2207_v21 = vld [vmem:[%s2362_s15 + $0x50] sm:$0xff]   ;;  %v2208_v22 = vld [vmem:[%s2362_s15 + $0x58] sm:$0xff]  }
  0x14   : > { %v650_v20 = vsel %vm207_vm1, %v2206_v18, 0  ;;  %v699_v23 = vsel %vm207_vm1, %v2207_v21, 0  ;;  %v748_v24 = vsel %vm207_vm1, %v2208_v22, 0 }
  0x19   : > { %2046 = vmatmul.mubr.msk.bf16.vlgmr.msra.gmra.mrb[0].mxu0 %vm207_vm1, %v2197_v1  ;;  %2052 = vmatmul.mubr.msk.bf16.vlgmr.msra.gmra.mrb[0].mxu1 %vm207_vm1, %v2198_v2 }
  0x1a   : > { %2056 = vmatpush3.bf16.xpose.msra.mxu0 %v307_v7  ;;  %2062 = vmatpush3.bf16.xpose.msra.mxu1 %v356_v9 }
  0x1b   : > { %2057 = vmatprep.mubr.msk.bf16.mxu0 %vm2326_vm0, %v2325_v0  ;;  %2067 = vmatprep.subr.bf16.mxu0 %v2325_v0 }
  0x1c   : > { %2063 = vmatprep.mubr.msk.bf16.mxu1 %vm2326_vm0, %v2325_v0  ;;  %2073 = vmatprep.subr.bf16.mxu1 %v2325_v0 }
  0x21   : > { %2058 = vmatmul.mubr.msk.bf16.vlgmr.msra.gmra.mrb[4].mxu0 %vm207_vm1, %v2199_v5  ;;  %2064 = vmatmul.mubr.msk.bf16.vlgmr.msra.gmra.mrb[4].mxu1 %vm207_vm1, %v2200_v6 }
  0x22   : > { %2068 = vmatpush3.bf16.xpose.msra.mxu0 %v405_v11  ;;  %2074 = vmatpush3.bf16.xpose.msra.mxu1 %v454_v12 }
  0x23   : > { %2069 = vmatprep.mubr.msk.bf16.mxu0 %vm2326_vm0, %v2325_v0  ;;  %2079 = vmatprep.subr.bf16.mxu0 %v2325_v0 }
  0x24   : > { %2075 = vmatprep.mubr.msk.bf16.mxu1 %vm2326_vm0, %v2325_v0  ;;  %2085 = vmatprep.subr.bf16.mxu1 %v2325_v0 }
  0x29   : > { %2070 = vmatmul.mubr.msk.bf16.vlgmr.msra.gmra.mrb[8].mxu0 %vm207_vm1, %v2201_v8  ;;  %2076 = vmatmul.mubr.msk.bf16.vlgmr.msra.gmra.mrb[8].mxu1 %vm207_vm1, %v2202_v10 }
  0x2a   : > { %2080 = vmatpush3.bf16.xpose.msra.mxu0 %v503_v15  ;;  %2086 = vmatpush3.bf16.xpose.msra.mxu1 %v552_v16 }
  0x2b   : > { %2081 = vmatprep.mubr.msk.bf16.mxu0 %vm2326_vm0, %v2325_v0  ;;  %2091 = vmatprep.subr.bf16.mxu0 %v2325_v0 }
  0x2c   : > { %2087 = vmatprep.mubr.msk.bf16.mxu1 %vm2326_vm0, %v2325_v0  ;;  %2097 = vmatprep.subr.bf16.mxu1 %v2325_v0 }
  0x31   : > { %2082 = vmatmul.mubr.msk.bf16.vlgmr.msra.gmra.mrb[12].mxu0 %vm207_vm1, %v2203_v13  ;;  %2088 = vmatmul.mubr.msk.bf16.vlgmr.msra.gmra.mrb[12].mxu1 %vm207_vm1, %v2204_v14 }
  0x32   : > { %2092 = vmatpush3.bf16.xpose.msra.mxu0 %v601_v19  ;;  %2098 = vmatpush3.bf16.xpose.msra.mxu1 %v650_v20 }
  0x33   : > { %2093 = vmatprep.mubr.msk.bf16.mxu0 %vm2326_vm0, %v2325_v0  ;;  %2103 = vmatprep.subr.bf16.mxu0 %v2325_v0 }
  0x34   : > { %2099 = vmatprep.mubr.msk.bf16.mxu1 %vm2326_vm0, %v2325_v0  ;;  %2109 = vmatprep.subr.bf16.mxu1 %v2325_v0 }
  0x39   : > { %2094 = vmatmul.mubr.msk.bf16.vlgmr.msra.gmra.mrb[16].mxu0 %vm207_vm1, %v2205_v17  ;;  %2100 = vmatmul.mubr.msk.bf16.vlgmr.msra.gmra.mrb[16].mxu1 %vm207_vm1, %v2206_v18 }
  0x3a   : > { %2104 = vmatpush3.bf16.xpose.msra.mxu0 %v699_v23  ;;  %2110 = vmatpush3.bf16.xpose.msra.mxu1 %v748_v24 }
  0x3b   : > { %2105 = vmatprep.mubr.msk.bf16.mxu0 %vm2326_vm0, %v2325_v0  ;;  %2111 = vmatprep.mubr.msk.bf16.mxu1 %vm2326_vm0, %v2325_v0 }
  0x3c   : > { %2115 = vmatprep.subr.bf16.mxu0 %v2325_v0  ;;  %2121 = vmatprep.subr.bf16.mxu1 %v2325_v0 }
  0x41   : > { %2106 = vmatmul.mubr.msk.bf16.vlgmr.msra.gmra.mrb[20].mxu0 %vm207_vm1, %v2207_v21  ;;  %2112 = vmatmul.mubr.msk.bf16.vlgmr.msra.gmra.mrb[20].mxu1 %vm207_vm1, %v2208_v22 }
  0x42   : > { %2117 = vmatprep.mubr.msk.bf16.mxu0 %vm2326_vm0, %v2325_v0  ;;  %2123 = vmatprep.mubr.msk.bf16.mxu1 %vm2326_vm0, %v2325_v0 }
  0xec   : > { %v2442_v25 = vpop.f32.mrb[0].mxu0  ;;  %v2444_v26 = vpop.f32.mrb[0].mxu1 }
  0xed   : > { %v2047_v27 = vpop.f32.mrb[1].mxu0  ;;  %v792_v28 = vsel %vm791_vm2, %v2442_v25, -inf  ;;  %v798_v29 = vsel %vm791_vm2, %v2444_v26, -inf  ;;  %v2053_v30 = vpop.f32.mrb[1].mxu1 }
  0xee   : > { %793 = vmax.xlane.f32.xlu0 %v792_v28  ;;  %v2450_v31 = vpop.f32.mrb[2].mxu0  ;;  %799 = vmax.xlane.f32.xlu1 %v798_v29  ;;  %v2452_v33 = vpop.f32.mrb[2].mxu1 }
  0xef   : > { %v2048_v32 = vpop.f32.mrb[3].mxu0  ;;  %v2054_v34 = vpop.f32.mrb[3].mxu1  ;;  %v801_v35 = vsel %vm791_vm2, %v2452_v33, -inf  ;;  %v795_v36 = vsel %vm791_vm2, %v2450_v31, -inf }
  0xf2   : > { %796 = vmax.xlane.f32.xlu0 %v795_v36  ;;  %802 = vmax.xlane.f32.xlu1 %v801_v35 }
  0xf4   : > { %v2458_v37 = vpop.f32.mrb[4].mxu0  ;;  %v2462_v40 = vpop.f32.mrb[4].mxu1 }
  0xf5   : > { %v2059_v38 = vpop.f32.mrb[5].mxu0  ;;  %v804_v39 = vsel %vm791_vm2, %v2458_v37, -inf  ;;  %v2065_v42 = vpop.f32.mrb[5].mxu1  ;;  %v810_v46 = vsel %vm791_vm2, %v2462_v40, -inf }
  0xf6   : > { %805 = vmax.xlane.f32.xlu0 %v804_v39  ;;  %v2464_v41 = vpop.f32.mrb[6].mxu0  ;;  %v2468_v45 = vpop.f32.mrb[6].mxu1 }
  0xf7   : > { %v2060_v43 = vpop.f32.mrb[7].mxu0  ;;  %v807_v44 = vsel %vm791_vm2, %v2464_v41, -inf  ;;  %v2066_v47 = vpop.f32.mrb[7].mxu1  ;;  %v813_v48 = vsel %vm791_vm2, %v2468_v45, -inf }
  0xf8   : > { %808 = vmax.xlane.f32.xlu1 %v807_v44 }
  0xfa   : > { %811 = vmax.xlane.f32.xlu0 %v810_v46 }
  0xfc   : > { %814 = vmax.xlane.f32.xlu1 %v813_v48  ;;  %v2474_v49 = vpop.f32.mrb[8].mxu0  ;;  %v2478_v52 = vpop.f32.mrb[8].mxu1 }
  0xfd   : > { %v2071_v50 = vpop.f32.mrb[9].mxu0  ;;  %v816_v51 = vsel %vm791_vm2, %v2474_v49, -inf  ;;  %v2077_v54 = vpop.f32.mrb[9].mxu1  ;;  %v822_v58 = vsel %vm791_vm2, %v2478_v52, -inf }
  0xfe   : > { %817 = vmax.xlane.f32.xlu0 %v816_v51  ;;  %v2480_v53 = vpop.f32.mrb[10].mxu0  ;;  %v2484_v57 = vpop.f32.mrb[10].mxu1 }
  0xff   : > { %v2072_v55 = vpop.f32.mrb[11].mxu0  ;;  %v819_v56 = vsel %vm791_vm2, %v2480_v53, -inf  ;;  %v2078_v59 = vpop.f32.mrb[11].mxu1  ;;  %v825_v60 = vsel %vm791_vm2, %v2484_v57, -inf }
 0x100   : > { %820 = vmax.xlane.f32.xlu1 %v819_v56 }
 0x102   : > { %823 = vmax.xlane.f32.xlu0 %v822_v58 }
 0x104   : > { %826 = vmax.xlane.f32.xlu1 %v825_v60  ;;  %v2490_v61 = vpop.f32.mrb[12].mxu0  ;;  %v2494_v1 = vpop.f32.mrb[12].mxu1 }
 0x105   : > { %v2083_v62 = vpop.f32.mrb[13].mxu0  ;;  %v828_v63 = vsel %vm791_vm2, %v2490_v61, -inf  ;;  %v2089_v3 = vpop.f32.mrb[13].mxu1  ;;  %v834_v7 = vsel %vm791_vm2, %v2494_v1, -inf }
 0x106   : > { %829 = vmax.xlane.f32.xlu0 %v828_v63  ;;  %v2496_v2 = vpop.f32.mrb[14].mxu0  ;;  %v2500_v6 = vpop.f32.mrb[14].mxu1 }
 0x107   : > { %v2084_v4 = vpop.f32.mrb[15].mxu0  ;;  %v831_v5 = vsel %vm791_vm2, %v2496_v2, -inf  ;;  %v2090_v8 = vpop.f32.mrb[15].mxu1  ;;  %v837_v9 = vsel %vm791_vm2, %v2500_v6, -inf }
 0x108   : > { %832 = vmax.xlane.f32.xlu1 %v831_v5 }
 0x10a   : > { %835 = vmax.xlane.f32.xlu0 %v834_v7 }
 0x10c   : > { %838 = vmax.xlane.f32.xlu1 %v837_v9  ;;  %v2506_v10 = vpop.f32.mrb[16].mxu0  ;;  %v2510_v13 = vpop.f32.mrb[16].mxu1 }
 0x10d   : > { %v2095_v11 = vpop.f32.mrb[17].mxu0  ;;  %v840_v12 = vsel %vm791_vm2, %v2506_v10, -inf  ;;  %v2101_v15 = vpop.f32.mrb[17].mxu1  ;;  %v846_v19 = vsel %vm791_vm2, %v2510_v13, -inf }
 0x10e   : > { %841 = vmax.xlane.f32.xlu0 %v840_v12  ;;  %v2512_v14 = vpop.f32.mrb[18].mxu0  ;;  %v2516_v18 = vpop.f32.mrb[18].mxu1 }
 0x10f   : > { %v2096_v16 = vpop.f32.mrb[19].mxu0  ;;  %v843_v17 = vsel %vm791_vm2, %v2512_v14, -inf  ;;  %v2102_v20 = vpop.f32.mrb[19].mxu1  ;;  %v849_v21 = vsel %vm791_vm2, %v2516_v18, -inf }
 0x110   : > { %844 = vmax.xlane.f32.xlu1 %v843_v17 }
 0x112   : > { %847 = vmax.xlane.f32.xlu0 %v846_v19 }
 0x114   : > { %850 = vmax.xlane.f32.xlu1 %v849_v21  ;;  %v2522_v22 = vpop.f32.mrb[20].mxu0  ;;  %v2526_v27 = vpop.f32.mrb[20].mxu1 }
 0x115   : > { %v2107_v23 = vpop.f32.mrb[21].mxu0  ;;  %v852_v24 = vsel %vm791_vm2, %v2522_v22, -inf  ;;  %v2113_v29 = vpop.f32.mrb[21].mxu1  ;;  %v858_v35 = vsel %vm791_vm2, %v2526_v27, -inf }
 0x116   : > { %853 = vmax.xlane.f32.xlu0 %v852_v24  ;;  %v2528_v28 = vpop.f32.mrb[22].mxu0  ;;  %v2532_v34 = vpop.f32.mrb[22].mxu1 }
 0x117   : > { %v2108_v30 = vpop.f32.mrb[23].mxu0  ;;  %v855_v32 = vsel %vm791_vm2, %v2528_v28, -inf  ;;  %v2114_v36 = vpop.f32.mrb[23].mxu1  ;;  %v861_v38 = vsel %vm791_vm2, %v2532_v34, -inf }
 0x118   : > { %856 = vmax.xlane.f32.xlu1 %v855_v32 }
 0x11a   : > { %859 = vmax.xlane.f32.xlu0 %v858_v35 }
 0x11c   : > { %862 = vmax.xlane.f32.xlu1 %v861_v38 }
 0x17b   : > { %v794_v39 = vpop.xlane.xlu0 %793  ;;  %v800_v42 = vpop.xlane.xlu1 %799 }
 0x17c   : > { %v864_v43 = vsub.f32 %v2442_v25, %v794_v39  ;;  %v866_v44 = vsub.f32 %v2444_v26, %v800_v42 }
 0x17e   : > { %v888_v46 = vmul.f32 1.442695, %v864_v43  ;;  %v892_v47 = vmul.f32 1.442695, %v866_v44 }
 0x17f   : > { %v797_v48 = vpop.xlane.xlu0 %796  ;;  %v803_v50 = vpop.xlane.xlu1 %802 }
 0x180   : > { %2221 = vpow2.f32 %v888_v46  ;;  %v865_v51 = vsub.f32 %v2450_v31, %v797_v48  ;;  %v867_v54 = vsub.f32 %v2452_v33, %v803_v50 }
 0x181   : > { %2223 = vpow2.f32 %v892_v47 }
 0x182   : > { %v890_v55 = vmul.f32 1.442695, %v865_v51  ;;  %v894_v56 = vmul.f32 1.442695, %v867_v54 }
 0x183   : > { %v806_v58 = vpop.xlane.xlu0 %805 }
 0x184   : > { %2225 = vpow2.f32 %v890_v55  ;;  %v868_v59 = vsub.f32 %v2458_v37, %v806_v58 }
 0x185   : > { %v809_v60 = vpop.xlane.xlu1 %808  ;;  %2227 = vpow2.f32 %v894_v56 }
 0x186   : > { %v896_v25 = vmul.f32 1.442695, %v868_v59  ;;  %v869_v26 = vsub.f32 %v2464_v41, %v809_v60 }
 0x187   : > { %v812_v62 = vpop.xlane.xlu0 %811 }
 0x188   : > { %2229 = vpow2.f32 %v896_v25  ;;  %v898_v63 = vmul.f32 1.442695, %v869_v26  ;;  %v870_v3 = vsub.f32 %v2462_v40, %v812_v62 }
 0x189   : > { %v815_v31 = vpop.xlane.xlu1 %814 }
 0x18a   : > { %v2545_v4 = vpop.eup %2221  ;;  %2231 = vpow2.f32 %v898_v63  ;;  %v900_v33 = vmul.f32 1.442695, %v870_v3  ;;  %v871_v5 = vsub.f32 %v2468_v45, %v815_v31 }
 0x18b   : > { %v818_v7 = vpop.xlane.xlu0 %817  ;;  %v936_v37 = vsel %vm791_vm2, %v2545_v4, 0.0  ;;  %v2550_v8 = vpop.eup %2223 }
 0x18c   : > { %2233 = vpow2.f32 %v900_v33  ;;  %v902_v41 = vmul.f32 1.442695, %v871_v5  ;;  %v872_v9 = vsub.f32 %v2474_v49, %v818_v7  ;;  %937 = vadd.xlane.f32.xlu0 %v936_v37  ;;  %v942_v45 = vsel %vm791_vm2, %v2550_v8, 0.0 }
 0x18d   : > { %v821_v11 = vpop.xlane.xlu1 %820 }
 0x18e   : > { %v2553_v40 = vpop.eup %2225  ;;  %2235 = vpow2.f32 %v902_v41  ;;  %v904_v12 = vmul.f32 1.442695, %v872_v9  ;;  %v873_v15 = vsub.f32 %v2480_v53, %v821_v11 }
 0x18f   : > { %v824_v16 = vpop.xlane.xlu0 %823  ;;  %v939_v17 = vsel %vm791_vm2, %v2553_v40, 0.0  ;;  %v2560_v19 = vpop.eup %2227 }
 0x190   : > { %2237 = vpow2.f32 %v904_v12  ;;  %v906_v20 = vmul.f32 1.442695, %v873_v15  ;;  %v874_v49 = vsub.f32 %v2478_v52, %v824_v16  ;;  %943 = vadd.xlane.f32.xlu0 %v942_v45  ;;  %940 = vadd.xlane.f32.xlu1 %v939_v17  ;;  %v945_v32 = vsel %vm791_vm2, %v2560_v19, 0.0 }
 0x191   : > { %v827_v21 = vpop.xlane.xlu1 %826 }
 0x192   : > { %v2563_v23 = vpop.eup %2229  ;;  %2239 = vpow2.f32 %v906_v20  ;;  %v908_v53 = vmul.f32 1.442695, %v874_v49  ;;  %v875_v24 = vsub.f32 %v2484_v57, %v827_v21 }
 0x193   : > { %v830_v29 = vpop.xlane.xlu0 %829  ;;  %v948_v30 = vsel %vm791_vm2, %v2563_v23, 0.0 }
 0x194   : > { %v2570_v35 = vpop.eup %2231  ;;  %2241 = vpow2.f32 %v908_v53  ;;  %v910_v52 = vmul.f32 1.442695, %v875_v24  ;;  %v876_v36 = vsub.f32 %v2490_v61, %v830_v29  ;;  %949 = vadd.xlane.f32.xlu0 %v948_v30  ;;  %946 = vadd.xlane.f32.xlu1 %v945_v32  ;;  %v2209_v32 = vld [vmem:[%s2381_s18] sm:$0xff]  }
 0x195   : > { %v833_v38 = vpop.xlane.xlu1 %832  ;;  %v951_v46 = vsel %vm791_vm2, %v2570_v35, 0.0  ;;  %2116 = vmatpush3.bf16.msra.mxu0 %v2209_v32 }
 0x196   : > { %v2573_v39 = vpop.eup %2233  ;;  %2243 = vpow2.f32 %v910_v52  ;;  %v912_v57 = vmul.f32 1.442695, %v876_v36  ;;  %v877_v42 = vsub.f32 %v2496_v2, %v833_v38  ;;  %2127 = vmatprep.subr.bf16.mxu0 %v2325_v0 }
 0x197   : > { %v836_v43 = vpop.xlane.xlu0 %835  ;;  %v954_v44 = vsel %vm791_vm2, %v2573_v39, 0.0 }
 0x198   : > { %v2580_v47 = vpop.eup %2235  ;;  %2245 = vpow2.f32 %v912_v57  ;;  %v914_v61 = vmul.f32 1.442695, %v877_v42  ;;  %v878_v48 = vsub.f32 %v2494_v1, %v836_v43  ;;  %955 = vadd.xlane.f32.xlu0 %v954_v44  ;;  %952 = vadd.xlane.f32.xlu1 %v951_v46  ;;  %v2210_v43 = vld [vmem:[%s2381_s18 + $0x8] sm:$0xff]  }
 0x199   : > { %v839_v50 = vpop.xlane.xlu1 %838  ;;  %v957_v58 = vsel %vm791_vm2, %v2580_v47, 0.0  ;;  %2122 = vmatpush3.bf16.msra.mxu1 %v2210_v43 }
 0x19a   : > { %v2583_v51 = vpop.eup %2237  ;;  %2247 = vpow2.f32 %v914_v61  ;;  %v916_v2 = vmul.f32 1.442695, %v878_v48  ;;  %v879_v54 = vsub.f32 %v2500_v6, %v839_v50  ;;  %2133 = vmatprep.subr.bf16.mxu1 %v2325_v0 }
 0x19b   : > { %v842_v55 = vpop.xlane.xlu0 %841  ;;  %v960_v56 = vsel %vm791_vm2, %v2583_v51, 0.0 }
 0x19c   : > { %v2590_v59 = vpop.eup %2239  ;;  %2249 = vpow2.f32 %v916_v2  ;;  %v918_v1 = vmul.f32 1.442695, %v879_v54  ;;  %v880_v60 = vsub.f32 %v2506_v10, %v842_v55  ;;  %961 = vadd.xlane.f32.xlu0 %v960_v56  ;;  %958 = vadd.xlane.f32.xlu1 %v957_v58 }
 0x19d   : > { %v845_v25 = vpop.xlane.xlu1 %844  ;;  %v963_v31 = vsel %vm791_vm2, %v2590_v59, 0.0 }
 0x19e   : > { %v2593_v26 = vpop.eup %2241  ;;  %2251 = vpow2.f32 %v918_v1  ;;  %v920_v6 = vmul.f32 1.442695, %v880_v60  ;;  %v881_v62 = vsub.f32 %v2512_v14, %v845_v25 }
 0x19f   : > { %v848_v63 = vpop.xlane.xlu0 %847  ;;  %v966_v3 = vsel %vm791_vm2, %v2593_v26, 0.0 }
 0x1a0   : > { %v2600_v33 = vpop.eup %2243  ;;  %2253 = vpow2.f32 %v920_v6  ;;  %v922_v10 = vmul.f32 1.442695, %v881_v62  ;;  %v882_v5 = vsub.f32 %v2510_v13, %v848_v63  ;;  %967 = vadd.xlane.f32.xlu0 %v966_v3  ;;  %964 = vadd.xlane.f32.xlu1 %v963_v31 }
 0x1a1   : > { %v851_v7 = vpop.xlane.xlu1 %850  ;;  %v969_v12 = vsel %vm791_vm2, %v2600_v33, 0.0 }
 0x1a2   : > { %v2603_v37 = vpop.eup %2245  ;;  %2255 = vpow2.f32 %v922_v10  ;;  %v924_v14 = vmul.f32 1.442695, %v882_v5  ;;  %v883_v41 = vsub.f32 %v2516_v18, %v851_v7 }
 0x1a3   : > { %v854_v9 = vpop.xlane.xlu0 %853  ;;  %v972_v11 = vsel %vm791_vm2, %v2603_v37, 0.0 }
 0x1a4   : > { %v2610_v15 = vpop.eup %2247  ;;  %2257 = vpow2.f32 %v924_v14  ;;  %v926_v13 = vmul.f32 1.442695, %v883_v41  ;;  %v884_v16 = vsub.f32 %v2522_v22, %v854_v9  ;;  %973 = vadd.xlane.f32.xlu0 %v972_v11  ;;  %970 = vadd.xlane.f32.xlu1 %v969_v12 }
 0x1a5   : > { %v857_v45 = vpop.xlane.xlu1 %856  ;;  %v975_v53 = vsel %vm791_vm2, %v2610_v15, 0.0 }
 0x1a6   : > { %v2613_v17 = vpop.eup %2249  ;;  %2259 = vpow2.f32 %v926_v13  ;;  %v928_v18 = vmul.f32 1.442695, %v884_v16  ;;  %v885_v20 = vsub.f32 %v2528_v28, %v857_v45  ;;  %v2211_v13 = vld [vmem:[%s2381_s18 + $0x10] sm:$0xff]  }
 0x1a7   : > { %v860_v49 = vpop.xlane.xlu0 %859  ;;  %v978_v21 = vsel %vm791_vm2, %v2613_v17, 0.0 }
 0x1a8   : > { %v2620_v24 = vpop.eup %2251  ;;  %2261 = vpow2.f32 %v928_v18  ;;  %v930_v22 = vmul.f32 1.442695, %v885_v20  ;;  %v886_v29 = vsub.f32 %v2526_v27, %v860_v49  ;;  %979 = vadd.xlane.f32.xlu0 %v978_v21  ;;  %976 = vadd.xlane.f32.xlu1 %v975_v53 }
 0x1a9   : > { %v863_v30 = vpop.xlane.xlu1 %862  ;;  %v981_v57 = vsel %vm791_vm2, %v2620_v24, 0.0 }
 0x1aa   : > { %v2624_v52 = vpop.eup %2253  ;;  %2263 = vpow2.f32 %v930_v22  ;;  %v932_v28 = vmul.f32 1.442695, %v886_v29  ;;  %v887_v36 = vsub.f32 %v2532_v34, %v863_v30 }
 0x1ab   : > { %v984_v38 = vsel %vm791_vm2, %v2624_v52, 0.0 }
 0x1ac   : > { %v2631_v42 = vpop.eup %2255  ;;  %2265 = vpow2.f32 %v932_v28  ;;  %v934_v27 = vmul.f32 1.442695, %v887_v36  ;;  %985 = vadd.xlane.f32.xlu0 %v984_v38  ;;  %982 = vadd.xlane.f32.xlu1 %v981_v57  ;;  %v2213_v28 = vld [vmem:[%s2381_s18 + $0x20] sm:$0xff]  }
 0x1ad   : > { %v987_v46 = vsel %vm791_vm2, %v2631_v42, 0.0 }
 0x1ae   : > { %v2635_v44 = vpop.eup %2257  ;;  %2267 = vpow2.f32 %v934_v27 }
 0x1af   : > { %v990_v34 = vsel %vm791_vm2, %v2635_v44, 0.0 }
 0x1b0   : > { %v2641_v61 = vpop.eup %2259  ;;  %991 = vadd.xlane.f32.xlu0 %v990_v34  ;;  %988 = vadd.xlane.f32.xlu1 %v987_v46  ;;  %v2214_v34 = vld [vmem:[%s2381_s18 + $0x28] sm:$0xff]  }
 0x1b1   : > { %v993_v2 = vsel %vm791_vm2, %v2641_v61, 0.0 }
 0x1b2   : > { %v2644_v48 = vpop.eup %2261 }
 0x1b3   : > { %v996_v50 = vsel %vm791_vm2, %v2644_v48, 0.0 }
 0x1b4   : > { %v2650_v54 = vpop.eup %2263  ;;  %997 = vadd.xlane.f32.xlu0 %v996_v50  ;;  %994 = vadd.xlane.f32.xlu1 %v993_v2 }
 0x1b5   : > { %v999_v58 = vsel %vm791_vm2, %v2650_v54, 0.0 }
 0x1b6   : > { %v2652_v55 = vpop.eup %2265 }
 0x1b7   : > { %v1002_v56 = vsel %vm791_vm2, %v2652_v55, 0.0 }
 0x1b8   : > { %v2658_v1 = vpop.eup %2267  ;;  %1003 = vadd.xlane.f32.xlu0 %v1002_v56  ;;  %1000 = vadd.xlane.f32.xlu1 %v999_v58 }
 0x1b9   : > { %v1005_v60 = vsel %vm791_vm2, %v2658_v1, 0.0 }
 0x1bc   : > { %1006 = vadd.xlane.f32.xlu1 %v1005_v60  ;;  %v2215_v60 = vld [vmem:[%s2381_s18 + $0x30] sm:$0xff]  }
 0x219   : > { %v938_v25 = vpop.xlane.xlu0 %937 }
 0x21a   : > { %2269 = vrcp.f32 %v938_v25 }
 0x21d   : > { %v944_v6 = vpop.xlane.xlu0 %943  ;;  %v941_v62 = vpop.xlane.xlu1 %940 }
 0x21e   : > { %2271 = vrcp.f32 %v941_v62 }
 0x21f   : > { %2273 = vrcp.f32 %v944_v6 }
 0x221   : > { %v950_v63 = vpop.xlane.xlu0 %949  ;;  %v947_v3 = vpop.xlane.xlu1 %946 }
 0x222   : > { %2275 = vrcp.f32 %v947_v3 }
 0x223   : > { %2277 = vrcp.f32 %v950_v63 }
 0x224   : > { %v2270_v5 = vpop.eup %2269 }
 0x225   : > { %v956_v31 = vpop.xlane.xlu0 %955  ;;  %v953_v10 = vpop.xlane.xlu1 %952  ;;  %v1032_v9 = vmul.f32 %v2270_v5, %v2545_v4  ;;  %v2212_v4 = vld [vmem:[%s2381_s18 + $0x18] sm:$0xff]  }
 0x226   : > { %2279 = vrcp.f32 %v953_v10 }
 0x227   : > { %2281 = vrcp.f32 %v956_v31  ;;  %v2216_v31 = vld [vmem:[%s2381_s18 + $0x38] sm:$0xff]  }
 0x228   : > { %v2272_v7 = vpop.eup %2271 }
 0x229   : > { %v962_v14 = vpop.xlane.xlu0 %961  ;;  %v959_v41 = vpop.xlane.xlu1 %958  ;;  %v1033_v11 = vmul.f32 %v2272_v7, %v2553_v40 }
 0x22a   : > { %v2274_v12 = vpop.eup %2273  ;;  %2283 = vrcp.f32 %v959_v41 }
 0x22b   : > { %v1056_v16 = vpack.c.bf16 %v1033_v11, %v1032_v9  ;;  %2285 = vrcp.f32 %v962_v14  ;;  %v1034_v49 = vmul.f32 %v2274_v12, %v2550_v8  ;;  %v2217_v9 = vld [vmem:[%s2381_s18 + $0x40] sm:$0xff]  }
 0x22c   : > { %v2276_v45 = vpop.eup %2275 }
 0x22d   : > { %v968_v18 = vpop.xlane.xlu0 %967  ;;  %v965_v20 = vpop.xlane.xlu1 %964  ;;  %v1035_v21 = vmul.f32 %v2276_v45, %v2560_v19  ;;  %2118 = vmatmul.mubr.msk.bf16.vlgmr.msra.gmra.mrb[24].mxu0 %vm791_vm2, %v1056_v16 }
 0x22e   : > { %v2278_v53 = vpop.eup %2277  ;;  %2287 = vrcp.f32 %v965_v20  ;;  %2128 = vmatpush3.bf16.msra.mxu0 %v2211_v13  ;;  %2129 = vmatprep.mubr.msk.bf16.mxu0 %vm2326_vm0, %v2325_v0 }
 0x22f   : > { %v1057_v40 = vpack.c.bf16 %v1035_v21, %v1034_v49  ;;  %2139 = vmatprep.subr.bf16.mxu0 %v2325_v0  ;;  %2289 = vrcp.f32 %v968_v18  ;;  %v1036_v8 = vmul.f32 %v2278_v53, %v2563_v23  ;;  %v2218_v18 = vld [vmem:[%s2381_s18 + $0x48] sm:$0xff]  }
 0x230   : > { %v2280_v22 = vpop.eup %2279 }
 0x231   : > { %v974_v29 = vpop.xlane.xlu0 %973  ;;  %v971_v30 = vpop.xlane.xlu1 %970  ;;  %v1037_v19 = vmul.f32 %v2280_v22, %v2570_v35  ;;  %2124 = vmatmul.mubr.msk.bf16.vlgmr.msra.gmra.mrb[24].mxu1 %vm791_vm2, %v1057_v40 }
 0x232   : > { %v2282_v32 = vpop.eup %2281  ;;  %2134 = vmatpush3.bf16.msra.mxu1 %v2212_v4  ;;  %2291 = vrcp.f32 %v971_v30  ;;  %2135 = vmatprep.mubr.msk.bf16.mxu1 %vm2326_vm0, %v2325_v0  ;;  %v2219_v4 = vld [vmem:[%s2381_s18 + $0x50] sm:$0xff]   ;;  %v2220_v30 = vld [vmem:[%s2381_s18 + $0x58] sm:$0xff]  }
 0x233   : > { %v1058_v36 = vpack.c.bf16 %v1037_v19, %v1036_v8  ;;  %2145 = vmatprep.subr.bf16.mxu1 %v2325_v0  ;;  %2293 = vrcp.f32 %v974_v29  ;;  %v1038_v23 = vmul.f32 %v2282_v32, %v2573_v39 }
 0x234   : > { %v2284_v38 = vpop.eup %2283 }
 0x235   : > { %v980_v57 = vpop.xlane.xlu0 %979  ;;  %v977_v27 = vpop.xlane.xlu1 %976  ;;  %v1039_v35 = vmul.f32 %v2284_v38, %v2580_v47  ;;  %2130 = vmatmul.mubr.msk.bf16.vlgmr.msra.gmra.mrb[28].mxu0 %vm791_vm2, %v1058_v36 }
 0x236   : > { %v2286_v43 = vpop.eup %2285  ;;  %2295 = vrcp.f32 %v977_v27  ;;  %2140 = vmatpush3.bf16.msra.mxu0 %v2213_v28  ;;  %2141 = vmatprep.mubr.msk.bf16.mxu0 %vm2326_vm0, %v2325_v0 }
 0x237   : > { %v1059_v46 = vpack.c.bf16 %v1039_v35, %v1038_v23  ;;  %2151 = vmatprep.subr.bf16.mxu0 %v2325_v0  ;;  %2297 = vrcp.f32 %v980_v57  ;;  %v1040_v39 = vmul.f32 %v2286_v43, %v2583_v51 }
 0x238   : > { %v2288_v50 = vpop.eup %2287 }
 0x239   : > { %v986_v2 = vpop.xlane.xlu0 %985  ;;  %v983_v56 = vpop.xlane.xlu1 %982  ;;  %v1041_v47 = vmul.f32 %v2288_v50, %v2590_v59  ;;  %2136 = vmatmul.mubr.msk.bf16.vlgmr.msra.gmra.mrb[28].mxu1 %vm791_vm2, %v1059_v46 }
 0x23a   : > { %v2290_v58 = vpop.eup %2289  ;;  %2146 = vmatpush3.bf16.msra.mxu1 %v2214_v34  ;;  %2299 = vrcp.f32 %v983_v56  ;;  %2147 = vmatprep.mubr.msk.bf16.mxu1 %vm2326_vm0, %v2325_v0 }
 0x23b   : > { %v1060_v25 = vpack.c.bf16 %v1041_v47, %v1040_v39  ;;  %2157 = vmatprep.subr.bf16.mxu1 %v2325_v0  ;;  %2301 = vrcp.f32 %v986_v2  ;;  %v1042_v51 = vmul.f32 %v2290_v58, %v2593_v26 }
 0x23c   : > { %v2292_v6 = vpop.eup %2291 }
 0x23d   : > { %v992_v62 = vpop.xlane.xlu0 %991  ;;  %v989_v63 = vpop.xlane.xlu1 %988  ;;  %v1043_v59 = vmul.f32 %v2292_v6, %v2600_v33  ;;  %2142 = vmatmul.mubr.msk.bf16.vlgmr.msra.gmra.mrb[32].mxu0 %vm791_vm2, %v1060_v25 }
 0x23e   : > { %v2294_v3 = vpop.eup %2293  ;;  %2303 = vrcp.f32 %v989_v63  ;;  %2152 = vmatpush3.bf16.msra.mxu0 %v2215_v60  ;;  %2153 = vmatprep.mubr.msk.bf16.mxu0 %vm2326_vm0, %v2325_v0 }
 0x23f   : > { %v1061_v10 = vpack.c.bf16 %v1043_v59, %v1042_v51  ;;  %2163 = vmatprep.subr.bf16.mxu0 %v2325_v0  ;;  %2305 = vrcp.f32 %v992_v62  ;;  %v1044_v26 = vmul.f32 %v2294_v3, %v2603_v37 }
 0x240   : > { %v2296_v5 = vpop.eup %2295 }
 0x241   : > { %v998_v7 = vpop.xlane.xlu0 %997  ;;  %v995_v14 = vpop.xlane.xlu1 %994  ;;  %v1045_v33 = vmul.f32 %v2296_v5, %v2610_v15  ;;  %2148 = vmatmul.mubr.msk.bf16.vlgmr.msra.gmra.mrb[32].mxu1 %vm791_vm2, %v1061_v10 }
 0x242   : > { %v2298_v41 = vpop.eup %2297  ;;  %2158 = vmatpush3.bf16.msra.mxu1 %v2216_v31  ;;  %2307 = vrcp.f32 %v995_v14  ;;  %2159 = vmatprep.mubr.msk.bf16.mxu1 %vm2326_vm0, %v2325_v0 }
 0x243   : > { %v1062_v11 = vpack.c.bf16 %v1045_v33, %v1044_v26  ;;  %2169 = vmatprep.subr.bf16.mxu1 %v2325_v0  ;;  %2309 = vrcp.f32 %v998_v7  ;;  %v1046_v37 = vmul.f32 %v2298_v41, %v2613_v17 }
 0x244   : > { %v2300_v12 = vpop.eup %2299 }
 0x245   : > { %v1004_v13 = vpop.xlane.xlu0 %1003  ;;  %v1001_v16 = vpop.xlane.xlu1 %1000  ;;  %v1047_v15 = vmul.f32 %v2300_v12, %v2620_v24  ;;  %2154 = vmatmul.mubr.msk.bf16.vlgmr.msra.gmra.mrb[36].mxu0 %vm791_vm2, %v1062_v11 }
 0x246   : > { %v2302_v45 = vpop.eup %2301  ;;  %2311 = vrcp.f32 %v1001_v16  ;;  %2164 = vmatpush3.bf16.msra.mxu0 %v2217_v9  ;;  %2165 = vmatprep.mubr.msk.bf16.mxu0 %vm2326_vm0, %v2325_v0 }
 0x247   : > { %2313 = vrcp.f32 %v1004_v13  ;;  %v1063_v20 = vpack.c.bf16 %v1047_v15, %v1046_v37  ;;  %2175 = vmatprep.subr.bf16.mxu0 %v2325_v0  ;;  %v1048_v17 = vmul.f32 %v2302_v45, %v2624_v52 }
 0x248   : > { %v2304_v49 = vpop.eup %2303 }
 0x249   : > { %v1007_v21 = vpop.xlane.xlu1 %1006  ;;  %v1049_v24 = vmul.f32 %v2304_v49, %v2631_v42  ;;  %2160 = vmatmul.mubr.msk.bf16.vlgmr.msra.gmra.mrb[36].mxu1 %vm791_vm2, %v1063_v20  ;;  %v2306_v53 = vpop.eup %2305 }
 0x24a   : > { %2315 = vrcp.f32 %v1007_v21  ;;  %2170 = vmatpush3.bf16.msra.mxu1 %v2218_v18  ;;  %2171 = vmatprep.mubr.msk.bf16.mxu1 %vm2326_vm0, %v2325_v0  ;;  %v1050_v29 = vmul.f32 %v2306_v53, %v2635_v44 }
 0x24b   : > { %v1064_v40 = vpack.c.bf16 %v1049_v24, %v1048_v17  ;;  %2181 = vmatprep.subr.bf16.mxu1 %v2325_v0 }
 0x24c   : > { %v2308_v22 = vpop.eup %2307 }
 0x24d   : > { %v1051_v52 = vmul.f32 %v2308_v22, %v2641_v61  ;;  %2166 = vmatmul.mubr.msk.bf16.vlgmr.msra.gmra.mrb[40].mxu0 %vm791_vm2, %v1064_v40  ;;  %v2310_v42 = vpop.eup %2309 }
 0x24e   : > { %2176 = vmatpush3.bf16.msra.mxu0 %v2219_v4  ;;  %2177 = vmatprep.mubr.msk.bf16.mxu0 %vm2326_vm0, %v2325_v0  ;;  %v1052_v28 = vmul.f32 %v2310_v42, %v2644_v48 }
 0x24f   : > { %v1065_v8 = vpack.c.bf16 %v1051_v52, %v1050_v29 }
 0x250   : > { %v2312_v19 = vpop.eup %2311 }
 0x251   : > { %v2314_v32 = vpop.eup %2313  ;;  %v1053_v36 = vmul.f32 %v2312_v19, %v2650_v54  ;;  %2172 = vmatmul.mubr.msk.bf16.vlgmr.msra.gmra.mrb[40].mxu1 %vm791_vm2, %v1065_v8 }
 0x252   : > { %2182 = vmatpush3.bf16.msra.mxu1 %v2220_v30  ;;  %2183 = vmatprep.mubr.msk.bf16.mxu1 %vm2326_vm0, %v2325_v0  ;;  %v1054_v38 = vmul.f32 %v2314_v32, %v2652_v55 }
 0x253   : > { %v1066_v61 = vpack.c.bf16 %v1053_v36, %v1052_v28 }
 0x254   : > { %v2316_v44 = vpop.eup %2315 }
 0x255   : > { %v1055_v57 = vmul.f32 %v2316_v44, %v2658_v1  ;;  %2178 = vmatmul.mubr.msk.bf16.vlgmr.msra.gmra.mrb[44].mxu0 %vm791_vm2, %v1066_v61 }
 0x257   : > { %v1067_v27 = vpack.c.bf16 %v1055_v57, %v1054_v38 }
 0x259   : > { %2184 = vmatmul.mubr.msk.bf16.vlgmr.msra.gmra.mrb[44].mxu1 %vm791_vm2, %v1067_v27 }
 0x300   : > { %v1135_v0 = vpop.f32.mrb[24].mxu0 }
 0x301   : > { %v1971_v48 = vpack.c.bf16 %v1135_v0, %v1135_v0  ;;  %v2119_v54 = vpop.f32.mrb[25].mxu0 }
 0x302   : > { %v1138_v55 = vpop.f32.mrb[26].mxu0 }
 0x303   : > { %1789 = vst.msk [vmem:[%s2740_s21] sm:$0xf] %vm1788_vm3, %v1971_v48  ;;  %v1972_v1 = vpack.c.bf16 %v1138_v55, %v1138_v55  ;;  %v2120_v23 = vpop.f32.mrb[27].mxu0 }
 0x304   : > { %v1185_v35 = vpop.f32.mrb[24].mxu1 }
 0x305   : > { %1790 = vst.msk [vmem:[%s2740_s21 + $0x4] sm:$0xf] %vm1788_vm3, %v1972_v1  ;;  %v1973_v43 = vpack.c.bf16 %v1185_v35, %v1185_v35  ;;  %v2125_v34 = vpop.f32.mrb[25].mxu1 }
 0x306   : > { %v1188_v46 = vpop.f32.mrb[26].mxu1 }
 0x307   : > { %1791 = vst.msk [vmem:[%s2740_s21 + $0x8] sm:$0xf] %vm1788_vm3, %v1973_v43  ;;  %v1974_v50 = vpack.c.bf16 %v1188_v46, %v1188_v46  ;;  %v2126_v2 = vpop.f32.mrb[27].mxu1 }
 0x308   : > { %v1235_v56 = vpop.f32.mrb[28].mxu0 }
 0x309   : > { %1792 = vst.msk [vmem:[%s2740_s21 + $0xc] sm:$0xf] %vm1788_vm3, %v1974_v50  ;;  %v1975_v39 = vpack.c.bf16 %v1235_v56, %v1235_v56  ;;  %v2131_v47 = vpop.f32.mrb[29].mxu0 }
 0x30a   : > { %v1238_v58 = vpop.f32.mrb[30].mxu0 }
 0x30b   : > { %1793 = vst.msk [vmem:[%s2740_s21 + $0x10] sm:$0xf] %vm1788_vm3, %v1975_v39  ;;  %v1976_v60 = vpack.c.bf16 %v1238_v58, %v1238_v58  ;;  %v2132_v25 = vpop.f32.mrb[31].mxu0 }
 0x30c   : > { %v1285_v6 = vpop.f32.mrb[28].mxu1 }
 0x30d   : > { %1794 = vst.msk [vmem:[%s2740_s21 + $0x14] sm:$0xf] %vm1788_vm3, %v1976_v60  ;;  %v1977_v62 = vpack.c.bf16 %v1285_v6, %v1285_v6  ;;  %v2137_v63 = vpop.f32.mrb[29].mxu1 }
 0x30e   : > { %v1288_v51 = vpop.f32.mrb[30].mxu1 }
 0x30f   : > { %1795 = vst.msk [vmem:[%s2740_s21 + $0x18] sm:$0xf] %vm1788_vm3, %v1977_v62  ;;  %v1978_v59 = vpack.c.bf16 %v1288_v51, %v1288_v51  ;;  %v2138_v3 = vpop.f32.mrb[31].mxu1 }
 0x310   : > { %v1335_v31 = vpop.f32.mrb[32].mxu0 }
 0x311   : > { %1796 = vst.msk [vmem:[%s2740_s21 + $0x1c] sm:$0xf] %vm1788_vm3, %v1978_v59  ;;  %v1979_v10 = vpack.c.bf16 %v1335_v31, %v1335_v31  ;;  %v2143_v5 = vpop.f32.mrb[33].mxu0 }
 0x312   : > { %v1338_v7 = vpop.f32.mrb[34].mxu0 }
 0x313   : > { %1797 = vst.msk [vmem:[%s2740_s21 + $0x20] sm:$0xf] %vm1788_vm3, %v1979_v10  ;;  %v1980_v14 = vpack.c.bf16 %v1338_v7, %v1338_v7  ;;  %v2144_v26 = vpop.f32.mrb[35].mxu0 }
 0x314   : > { %v1385_v33 = vpop.f32.mrb[32].mxu1 }
 0x315   : > { %1798 = vst.msk [vmem:[%s2740_s21 + $0x24] sm:$0xf] %vm1788_vm3, %v1980_v14  ;;  %v1981_v41 = vpack.c.bf16 %v1385_v33, %v1385_v33  ;;  %v2149_v9 = vpop.f32.mrb[33].mxu1 }
 0x316   : > { %v1388_v11 = vpop.f32.mrb[34].mxu1 }
 0x317   : > { %1799 = vst.msk [vmem:[%s2740_s21 + $0x28] sm:$0xf] %vm1788_vm3, %v1981_v41  ;;  %v1982_v12 = vpack.c.bf16 %v1388_v11, %v1388_v11  ;;  %v2150_v13 = vpop.f32.mrb[35].mxu1 }
 0x318   : > { %v1435_v16 = vpop.f32.mrb[36].mxu0 }
 0x319   : > { %1800 = vst.msk [vmem:[%s2740_s21 + $0x2c] sm:$0xf] %vm1788_vm3, %v1982_v12  ;;  %v1983_v37 = vpack.c.bf16 %v1435_v16, %v1435_v16  ;;  %v2155_v15 = vpop.f32.mrb[37].mxu0 }
 0x31a   : > { %v1438_v45 = vpop.f32.mrb[38].mxu0 }
 0x31b   : > { %1801 = vst.msk [vmem:[%s2740_s21 + $0x30] sm:$0xf] %vm1788_vm3, %v1983_v37  ;;  %v1984_v18 = vpack.c.bf16 %v1438_v45, %v1438_v45  ;;  %v2156_v20 = vpop.f32.mrb[39].mxu0 }
 0x31c   : > { %v1485_v49 = vpop.f32.mrb[36].mxu1 }
 0x31d   : > { %1802 = vst.msk [vmem:[%s2740_s21 + $0x34] sm:$0xf] %vm1788_vm3, %v1984_v18  ;;  %v1985_v21 = vpack.c.bf16 %v1485_v49, %v1485_v49  ;;  %v2161_v17 = vpop.f32.mrb[37].mxu1 }
 0x31e   : > { %v1488_v24 = vpop.f32.mrb[38].mxu1 }
 0x31f   : > { %1803 = vst.msk [vmem:[%s2740_s21 + $0x38] sm:$0xf] %vm1788_vm3, %v1985_v21  ;;  %v1986_v53 = vpack.c.bf16 %v1488_v24, %v1488_v24  ;;  %v2162_v4 = vpop.f32.mrb[39].mxu1 }
 0x320   : > { %v1535_v40 = vpop.f32.mrb[40].mxu0 }
 0x321   : > { %1804 = vst.msk [vmem:[%s2740_s21 + $0x3c] sm:$0xf] %vm1788_vm3, %v1986_v53  ;;  %v1987_v22 = vpack.c.bf16 %v1535_v40, %v1535_v40  ;;  %v2167_v29 = vpop.f32.mrb[41].mxu0 }
 0x322   : > { %v1538_v52 = vpop.f32.mrb[42].mxu0 }
 0x323   : > { %1805 = vst.msk [vmem:[%s2740_s21 + $0x40] sm:$0xf] %vm1788_vm3, %v1987_v22  ;;  %v1988_v42 = vpack.c.bf16 %v1538_v52, %v1538_v52  ;;  %v2168_v30 = vpop.f32.mrb[43].mxu0 }
 0x324   : > { %v1585_v8 = vpop.f32.mrb[40].mxu1 }
 0x325   : > { %1806 = vst.msk [vmem:[%s2740_s21 + $0x44] sm:$0xf] %vm1788_vm3, %v1988_v42  ;;  %v1989_v19 = vpack.c.bf16 %v1585_v8, %v1585_v8  ;;  %v2173_v32 = vpop.f32.mrb[41].mxu1 }
 0x326   : > { %v1588_v28 = vpop.f32.mrb[42].mxu1 }
 0x327   : > { %1807 = vst.msk [vmem:[%s2740_s21 + $0x48] sm:$0xf] %vm1788_vm3, %v1989_v19  ;;  %v1990_v36 = vpack.c.bf16 %v1588_v28, %v1588_v28  ;;  %v2174_v44 = vpop.f32.mrb[43].mxu1 }
 0x328   : > { %v1635_v61 = vpop.f32.mrb[44].mxu0 }
 0x329   : > { %1808 = vst.msk [vmem:[%s2740_s21 + $0x4c] sm:$0xf] %vm1788_vm3, %v1990_v36  ;;  %v1991_v38 = vpack.c.bf16 %v1635_v61, %v1635_v61  ;;  %v2179_v57 = vpop.f32.mrb[45].mxu0 }
 0x32a   : > { %v1638_v27 = vpop.f32.mrb[46].mxu0 }
 0x32b   : > { %1809 = vst.msk [vmem:[%s2740_s21 + $0x50] sm:$0xf] %vm1788_vm3, %v1991_v38  ;;  %v1992_v0 = vpack.c.bf16 %v1638_v27, %v1638_v27  ;;  %v2180_v48 = vpop.f32.mrb[47].mxu0 }
 0x32c   : > { %v1685_v54 = vpop.f32.mrb[44].mxu1 }
 0x32d   : > { %1810 = vst.msk [vmem:[%s2740_s21 + $0x54] sm:$0xf] %vm1788_vm3, %v1992_v0  ;;  %v1993_v55 = vpack.c.bf16 %v1685_v54, %v1685_v54  ;;  %v2185_v1 = vpop.f32.mrb[45].mxu1 }
 0x32e   : > { %v1688_v23 = vpop.f32.mrb[46].mxu1 }
 0x32f   : > { %1811 = vst.msk [vmem:[%s2740_s21 + $0x58] sm:$0xf] %vm1788_vm3, %v1993_v55  ;;  %v1994_v35 = vpack.c.bf16 %v1688_v23, %v1688_v23  ;;  %v2186_v43 = vpop.f32.mrb[47].mxu1 }
 0x331   : > { %1812 = vst.msk [vmem:[%s2740_s21 + $0x5c] sm:$0xf] %vm1788_vm3, %v1994_v35 }
 0x332 PF: > { %s12_s9 = sadd.s32 1, %s2323_s9  }
 0x333   : > { %p9_p4 = scmp.ge.s32.totalorder %s12_s9, 4  }
 0x335   :  { %11 = sbr.rel (!%p9_p4) target bundleno = 1 (0x1), region = 61 }

// kernel: lgtt_forward.20
= control target key start
LH: loop header
LB: loop body
LE: loop exit
PB: predicated region body
PF: predicated region fallthrough
CT: control target
= control target key end

     0   :  { %s637_s15 = smov 0   ;;  %s639_s16 = smov 0   ;;  %s698_s0 = inlined_call_operand.vmem [shape: bf16[2,30,64], index: 0, kind: input, shape index: {}]   ;;  %s699_s1 = inlined_call_operand.vmem [shape: bf16[30,30], index: 1, kind: input, shape index: {}]   ;;  %s700_s2 = inlined_call_operand.vmem [shape: f32[30,1], index: 2, kind: input, shape index: {}]   ;;  %s701_s3 = inlined_call_operand.vmem [shape: bf16[2,30,64], index: 3, kind: input, shape index: {}]   ;;  %s702_s4 = inlined_call_operand.vmem [shape: bf16[2,30,64], index: 4, kind: output, shape index: {}]  }
   0x1   :  { %s641_s17 = smov 0  }
   0x2 LB: > { %s26_s18 = sadd.s32 1, %s605_s16  ;;  %p513_p0 = scmp.ge.s32.totalorder %s609_s17, 1  ;;  %s609_s17 = sphi %s641_s17, %s14_s17   ;;  %s605_s16 = sphi %s639_s16, %s704_s16   ;;  %s601_s15 = sphi %s637_s15, %s703_s15  }
   0x3   : > { %p28_p1 = scmp.ge.s32.totalorder %s26_s18, 2  ;;  %p196_p2 = scmp.lt.s32.totalorder %s609_s17, 3 }
   0x5   : > { %s706_s18 = smov (%p28_p1, %s26_s18), 0  ;;  %p197_p3 = pnand %p513_p0, %p196_p2 }
   0x6   : > { %p236_p4 = scmp.lt.s32.totalorder (!%p197_p3), %s601_s15, 1  ;;  %v585_v0 = vld [vmem:[%s699_s1] sm:$0xff] (!%p197_p3)   ;;  %vm314_vm0 = vcmask (!%p197_p3), 244736   ;;  %v271_v1 = vld [vmem:[%s700_s2 + $0x10] sm:$0xff] (!%p197_p3)  ;;  %v611_v3 = vmov (!%p197_p3), 0   ;;  %v270_v5 = vld [vmem:[%s700_s2 + $0x8] sm:$0xff] (!%p197_p3) }
   0x7   : > { %200 = sbr.rel (%p197_p3) target bundleno = 248 (0xf8), region = 36  ;;  %v269_v2 = vld [vmem:[%s700_s2] sm:$0xff] (!%p197_p3)  ;;  %551 = vmatprep.mubr.msk.bf16.mxu0 (!%p197_p3), %vm314_vm0, %v585_v0  ;;  %582 = vset.pattern.permute.xlu1 (!%p197_p3), %v611_v3  ;;  %v272_v4 = vld [vmem:[%s700_s2 + $0x18] sm:$0x3f] (!%p197_p3)  ;;  %vm321_vm1 = vcmask (!%p197_p3), 1046528   ;;  %vm402_vm2 = vcmask (!%p197_p3), 519168  }
   0x8   : > { %581 = vset.pattern.permute.xlu0 (!%p197_p3), %v611_v3  ;;  %285 = vperm.xlu1 (!%p197_p3), %582, %v271_v1   ;;  %v586_v9 = vld [vmem:[%s699_s1 + $0x8] sm:$0x7f] (!%p197_p3)   ;;  %vm406_vm3 = vcmask (!%p197_p3), 518144  }
   0x9   : > { %275 = vperm.xlu0 (!%p197_p3), %581, %v269_v2  }
   0xc   : > { %290 = vperm.xlu1 (!%p197_p3), %582, %v272_v4  }
   0xd   : > { %280 = vperm.xlu0 (!%p197_p3), %581, %v270_v5  }
   0xe   : > { %s708_s15 = smov (!%p236_p4, %s601_s15), 1 }
   0xf   : > { %s665_s25 = sshll.u32 %s708_s15, 4 }
  0x10   : > { %s243_s28 = scalar_lea.vmem %s698_s0, %s665_s25  ;;  %s251_s11 = scalar_lea.vmem %s701_s3, %s665_s25 }
  0x11   : > { %v583_v6 = vld [vmem:[%s243_s28] sm:$0xff]   ;;  %v584_v7 = vld [vmem:[%s243_s28 + $0x8] sm:$0x7f]   ;;  %s259_s14 = scalar_lea.vmem %s702_s4, %s665_s25 }
  0x12   : > { %547 = vmatprep.subr.bf16.mxu0 %v583_v6  ;;  %v323_v8 = vsel %vm321_vm1, %v584_v7, 0  ;;  %v376_v11 = vld [vmem:[%s251_s11 + $0x8] sm:$0xf]  ;;  %v540_v13 = vld [vmem:[%s251_s11] sm:$0xff]   ;;  %v377_v14 = vld [vmem:[%s251_s11 + $0xc] sm:$0x7] }
  0x13   : > { %548 = vmatpush3.bf16.msra.mxu0 %v583_v6  ;;  %v380_v15 = vunpack.c.l.bf16 %v376_v11  ;;  %v541_v17 = vunpack.c.l.bf16 %v540_v13  ;;  %v381_v20 = vunpack.c.l.bf16 %v377_v14  ;;  %v542_v24 = vunpack.c.h.bf16 %v540_v13 }
  0x14   : > { %555 = vmatprep.subr.msk.bf16.mxu0 %vm321_vm1, %v584_v7 }
  0x17   : > { %550 = vmatpush3.bf16.msra.mxu0 %v323_v8 }
  0x1a   : > { %552 = vmatmul.mubr.msk.bf16.vlgmr.msra.gmra.mrb[0].mxu0 %vm314_vm0, %v586_v9 }
  0x87   : > { %v286_v10 = vpop.permute.xlu1 %285 }
  0x88   : > { %v276_v12 = vpop.permute.xlu0 %275 }
  0x8b   : > { %v291_v21 = vpop.permute.xlu1 %290 }
  0x8c   : > { %v281_v25 = vpop.permute.xlu0 %280 }
  0xed   : > { %v553_v16 = vpop.f32.mrb[0].mxu0 }
  0xee   : > { %v368_v18 = vadd.f32 %v553_v16, %v286_v10  ;;  %v359_v19 = vpop.f32.mrb[1].mxu0 }
  0xef   : > { %v360_v22 = vadd.f32 %v359_v19, %v276_v12  ;;  %v554_v23 = vpop.f32.mrb[2].mxu0 }
  0xf0   : > { %v384_v26 = vadd.f32 %v380_v15, %v368_v18  ;;  %v371_v27 = vadd.f32 %v554_v23, %v291_v21  ;;  %v362_v28 = vpop.f32.mrb[3].mxu0 }
  0xf1   : > { %v382_v29 = vadd.f32 %v541_v17, %v360_v22  ;;  %v363_v30 = vadd.f32 %v362_v28, %v281_v25 }
  0xf2   : > { %v537_v31 = vpack.c.bf16 %v384_v26, %v384_v26  ;;  %v385_v32 = vadd.f32 %v381_v20, %v371_v27 }
  0xf3   : > { %v535_v33 = vpack.c.bf16 %v382_v29, %v382_v29  ;;  %v383_v34 = vadd.f32 %v542_v24, %v363_v30 }
  0xf4   : > { %405 = vst.msk [vmem:[%s259_s14 + $0x8] sm:$0xf] %vm402_vm2, %v537_v31  ;;  %v538_v35 = vpack.c.bf16 %v385_v32, %v385_v32 }
  0xf5   : > { %403 = vst.msk [vmem:[%s259_s14] sm:$0xf] %vm402_vm2, %v535_v33  ;;  %v536_v36 = vpack.c.bf16 %v383_v34, %v383_v34 }
  0xf6   : > { %407 = vst.msk [vmem:[%s259_s14 + $0xc] sm:$0x7] %vm406_vm3, %v538_v35 }
  0xf7   : > { %404 = vst.msk [vmem:[%s259_s14 + $0x4] sm:$0xf] %vm402_vm2, %v536_v36 }
  0xf8 PF: > { %s14_s17 = sadd.s32 1, %s609_s17   ;;  %s703_s15 = smov %s605_s16 }
  0xf9   : > { %p11_p5 = scmp.ge.s32.totalorder %s14_s17, 4   ;;  %s704_s16 = smov %s706_s18 }
  0xfb   :  { %13 = sbr.rel (!%p11_p5) target bundleno = 2 (0x2), region = 69 }

// kernel: lgtt_forward.21
= control target key start
LH: loop header
LB: loop body
LE: loop exit
PB: predicated region body
PF: predicated region fallthrough
CT: control target
= control target key end

     0   :  { %s738_s12 = smov 0   ;;  %s740_s13 = smov 0   ;;  %s834_s0 = inlined_call_operand.vmem [shape: bf16[2,30,64], index: 0, kind: input, shape index: {}]   ;;  %s835_s1 = inlined_call_operand.vmem [shape: bf16[60,30], index: 1, kind: input, shape index: {}]   ;;  %s836_s2 = inlined_call_operand.vmem [shape: f32[60,1], index: 2, kind: input, shape index: {}]   ;;  %s837_s3 = inlined_call_operand.vmem [shape: bf16[2,60,64], index: 3, kind: output, shape index: {}]  }
   0x1   :  { %s742_s14 = smov 0  }
   0x2 LB: > { %s25_s15 = sadd.s32 1, %s711_s13  ;;  %p561_p0 = scmp.ge.s32.totalorder %s715_s14, 1  ;;  %s715_s14 = sphi %s742_s14, %s13_s14   ;;  %s711_s13 = sphi %s740_s13, %s839_s13   ;;  %s707_s12 = sphi %s738_s12, %s838_s12  }
   0x3   : > { %p27_p1 = scmp.ge.s32.totalorder %s25_s15, 2  ;;  %p156_p2 = scmp.lt.s32.totalorder %s715_s14, 3 }
   0x5   : > { %s841_s15 = smov (%p27_p1, %s25_s15), 0  ;;  %p157_p3 = pnand %p561_p0, %p156_p2 }
   0x6   : > { %p186_p4 = scmp.lt.s32.totalorder (!%p157_p3), %s707_s12, 1  ;;  %v657_v0 = vld [vmem:[%s835_s1] sm:$0xff] (!%p157_p3)   ;;  %vm294_vm0 = vcmask (!%p157_p3), 244736   ;;  %v658_v1 = vld [vmem:[%s835_s1 + $0x10] sm:$0xff] (!%p157_p3)   ;;  %v717_v2 = vmov (!%p157_p3), 0   ;;  %vm307_vm1 = vcmask (!%p157_p3), 1046528  }
   0x7   : > { %160 = sbr.rel (%p157_p3) target bundleno = 278 (0x116), region = 32  ;;  %614 = vmatprep.mubr.msk.bf16.mxu0 (!%p157_p3), %vm294_vm0, %v657_v0  ;;  %618 = vmatprep.mubr.msk.bf16.mxu1 (!%p157_p3), %vm294_vm0, %v658_v1  ;;  %v217_v3 = vld [vmem:[%s836_s2 + $0x10] sm:$0xff] (!%p157_p3)  ;;  %v215_v4 = vld [vmem:[%s836_s2] sm:$0xff] (!%p157_p3)  ;;  %v218_v7 = vld [vmem:[%s836_s2 + $0x18] sm:$0xff] (!%p157_p3)  ;;  %vm464_vm2 = vcmask (!%p157_p3), 519168   ;;  %vm472_vm3 = vcmask (!%p157_p3), 517120  }
   0x8   : > { %654 = vset.pattern.permute.xlu1 (!%p157_p3), %v717_v2  ;;  %653 = vset.pattern.permute.xlu0 (!%p157_p3), %v717_v2  ;;  %v216_v8 = vld [vmem:[%s836_s2 + $0x8] sm:$0xff] (!%p157_p3)  ;;  %v660_v11 = vld [vmem:[%s835_s1 + $0x18] sm:$0x3f] (!%p157_p3)   ;;  %v219_v13 = vld [vmem:[%s836_s2 + $0x20] sm:$0xff] (!%p157_p3) }
   0x9   : > { %235 = vperm.xlu1 (!%p157_p3), %654, %v217_v3   ;;  %225 = vperm.xlu0 (!%p157_p3), %653, %v215_v4   ;;  %v659_v10 = vld [vmem:[%s835_s1 + $0x8] sm:$0xff] (!%p157_p3)   ;;  %v222_v14 = vld [vmem:[%s836_s2 + $0x38] sm:$0xf] (!%p157_p3)  ;;  %v221_v15 = vld [vmem:[%s836_s2 + $0x30] sm:$0xff] (!%p157_p3) }
   0xa   : > { %v220_v12 = vld [vmem:[%s836_s2 + $0x28] sm:$0xff] (!%p157_p3) }
   0xd   : > { %240 = vperm.xlu1 (!%p157_p3), %654, %v218_v7   ;;  %230 = vperm.xlu0 (!%p157_p3), %653, %v216_v8  }
   0xe   : > { %s843_s12 = smov (!%p186_p4, %s707_s12), 1 }
   0xf   : > { %s594_s20 = sshll.u32 %s843_s12, 4  ;;  %s595_s21 = sshll.u32 %s843_s12, 5 }
  0x10   : > { %s193_s27 = scalar_lea.vmem %s834_s0, %s594_s20  ;;  %s201_s24 = scalar_lea.vmem %s837_s3, %s595_s21 }
  0x11   : > { %v655_v5 = vld [vmem:[%s193_s27] sm:$0xff]   ;;  %v656_v6 = vld [vmem:[%s193_s27 + $0x8] sm:$0x7f]   ;;  %250 = vperm.xlu1 %654, %v220_v12   ;;  %245 = vperm.xlu0 %653, %v219_v13  }
  0x12   : > { %610 = vmatprep.subr.bf16.mxu0 %v655_v5  ;;  %622 = vmatprep.subr.bf16.mxu1 %v655_v5  ;;  %v309_v9 = vsel %vm307_vm1, %v656_v6, 0 }
  0x13   : > { %611 = vmatpush3.bf16.msra.mxu0 %v655_v5  ;;  %624 = vmatpush3.bf16.msra.mxu1 %v655_v5 }
  0x14   : > { %626 = vmatprep.subr.msk.bf16.mxu0 %vm307_vm1, %v656_v6  ;;  %627 = vmatprep.subr.msk.bf16.mxu1 %vm307_vm1, %v656_v6 }
  0x15   : > { %260 = vperm.xlu1 %654, %v222_v14   ;;  %255 = vperm.xlu0 %653, %v221_v15  }
  0x17   : > { %613 = vmatpush3.bf16.msra.mxu0 %v309_v9  ;;  %625 = vmatpush3.bf16.msra.mxu1 %v309_v9 }
  0x1a   : > { %615 = vmatmul.mubr.msk.bf16.vlgmr.msra.gmra.mrb[0].mxu0 %vm294_vm0, %v659_v10  ;;  %619 = vmatmul.mubr.msk.bf16.vlgmr.msra.gmra.mrb[0].mxu1 %vm294_vm0, %v660_v11 }
  0x88   : > { %v236_v16 = vpop.permute.xlu1 %235  ;;  %v226_v17 = vpop.permute.xlu0 %225 }
  0x8c   : > { %v241_v18 = vpop.permute.xlu1 %240  ;;  %v231_v19 = vpop.permute.xlu0 %230 }
  0x90   : > { %v251_v20 = vpop.permute.xlu1 %250  ;;  %v246_v21 = vpop.permute.xlu0 %245 }
  0x94   : > { %v261_v22 = vpop.permute.xlu1 %260  ;;  %v256_v23 = vpop.permute.xlu0 %255 }
  0xed   : > { %v616_v24 = vpop.f32.mrb[0].mxu0  ;;  %v620_v25 = vpop.f32.mrb[0].mxu1 }
  0xee   : > { %v354_v26 = vadd.f32 %v616_v24, %v236_v16  ;;  %v370_v27 = vadd.f32 %v620_v25, %v256_v23  ;;  %v345_v28 = vpop.f32.mrb[1].mxu0  ;;  %v361_v29 = vpop.f32.mrb[1].mxu1 }
  0xef   : > { %v346_v30 = vadd.f32 %v345_v28, %v226_v17  ;;  %v362_v31 = vadd.f32 %v361_v29, %v246_v21  ;;  %v617_v32 = vpop.f32.mrb[2].mxu0  ;;  %v621_v33 = vpop.f32.mrb[2].mxu1 }
  0xf0   : > { %v578_v34 = vmul.f32 -1.442695, %v354_v26  ;;  %v582_v35 = vmul.f32 -1.442695, %v370_v27  ;;  %v357_v36 = vadd.f32 %v617_v32, %v241_v18  ;;  %v802_v37 = vadd.f32 %v621_v33, %v261_v22  ;;  %v348_v38 = vpop.f32.mrb[3].mxu0  ;;  %v364_v39 = vpop.f32.mrb[3].mxu1 }
  0xf1   : > { %v576_v40 = vmul.f32 -1.442695, %v346_v30  ;;  %v580_v41 = vmul.f32 -1.442695, %v362_v31  ;;  %v804_v42 = vadd.f32 %v348_v38, %v231_v19  ;;  %v806_v43 = vadd.f32 %v364_v39, %v251_v20 }
  0xf2   : > { %661 = vpow2.f32 %v578_v34  ;;  %v579_v44 = vmul.f32 -1.442695, %v357_v36  ;;  %v583_v45 = vmul.f32 -1.442695, %v802_v37 }
  0xf3   : > { %663 = vpow2.f32 %v582_v35  ;;  %v577_v46 = vmul.f32 -1.442695, %v804_v42  ;;  %v581_v47 = vmul.f32 -1.442695, %v806_v43 }
  0xf4   : > { %665 = vpow2.f32 %v576_v40 }
  0xf5   : > { %667 = vpow2.f32 %v580_v41 }
  0xf6   : > { %669 = vpow2.f32 %v579_v44 }
  0xf7   : > { %671 = vpow2.f32 %v583_v45 }
  0xf8   : > { %673 = vpow2.f32 %v577_v46 }
  0xf9   : > { %675 = vpow2.f32 %v581_v47 }
  0xfc   : > { %v662_v48 = vpop.eup %661 }
  0xfd   : > { %v664_v49 = vpop.eup %663  ;;  %v402_v50 = vadd.f32 1.0, %v662_v48 }
  0xfe   : > { %v666_v51 = vpop.eup %665  ;;  %v406_v52 = vadd.f32 1.0, %v664_v49 }
  0xff   : > { %v668_v53 = vpop.eup %667  ;;  %677 = vrcp.f32 %v402_v50  ;;  %v400_v54 = vadd.f32 1.0, %v666_v51 }
 0x100   : > { %v670_v55 = vpop.eup %669  ;;  %679 = vrcp.f32 %v406_v52  ;;  %v404_v56 = vadd.f32 1.0, %v668_v53 }
 0x101   : > { %v672_v57 = vpop.eup %671  ;;  %681 = vrcp.f32 %v400_v54  ;;  %v403_v58 = vadd.f32 1.0, %v670_v55 }
 0x102   : > { %v674_v59 = vpop.eup %673  ;;  %683 = vrcp.f32 %v404_v56  ;;  %v407_v60 = vadd.f32 1.0, %v672_v57 }
 0x103   : > { %v676_v61 = vpop.eup %675  ;;  %685 = vrcp.f32 %v403_v58  ;;  %v401_v62 = vadd.f32 1.0, %v674_v59 }
 0x104   : > { %687 = vrcp.f32 %v407_v60  ;;  %v405_v63 = vadd.f32 1.0, %v676_v61 }
 0x105   : > { %689 = vrcp.f32 %v401_v62 }
 0x106   : > { %691 = vrcp.f32 %v405_v63 }
 0x109   : > { %v678_v0 = vpop.eup %677 }
 0x10a   : > { %v680_v1 = vpop.eup %679  ;;  %v426_v2 = vmul.f32 %v678_v0, %v354_v26 }
 0x10b   : > { %v682_v3 = vpop.eup %681  ;;  %v430_v4 = vmul.f32 %v680_v1, %v370_v27 }
 0x10c   : > { %v684_v5 = vpop.eup %683  ;;  %v598_v6 = vpack.c.bf16 %v426_v2, %v426_v2  ;;  %v424_v7 = vmul.f32 %v682_v3, %v346_v30 }
 0x10d   : > { %v686_v8 = vpop.eup %685  ;;  %v602_v9 = vpack.c.bf16 %v430_v4, %v430_v4  ;;  %v428_v10 = vmul.f32 %v684_v5, %v362_v31 }
 0x10e   : > { %v688_v11 = vpop.eup %687  ;;  %467 = vst.msk [vmem:[%s201_s24 + $0x8] sm:$0xf] %vm464_vm2, %v598_v6  ;;  %v596_v12 = vpack.c.bf16 %v424_v7, %v424_v7  ;;  %v427_v13 = vmul.f32 %v686_v8, %v357_v36 }
 0x10f   : > { %v690_v14 = vpop.eup %689  ;;  %471 = vst.msk [vmem:[%s201_s24 + $0x18] sm:$0xf] %vm464_vm2, %v602_v9  ;;  %v600_v15 = vpack.c.bf16 %v428_v10, %v428_v10  ;;  %v431_v16 = vmul.f32 %v688_v11, %v802_v37 }
 0x110   : > { %v692_v17 = vpop.eup %691  ;;  %465 = vst.msk [vmem:[%s201_s24] sm:$0xf] %vm464_vm2, %v596_v12  ;;  %v599_v18 = vpack.c.bf16 %v427_v13, %v427_v13  ;;  %v425_v19 = vmul.f32 %v690_v14, %v804_v42 }
 0x111   : > { %469 = vst.msk [vmem:[%s201_s24 + $0x10] sm:$0xf] %vm464_vm2, %v600_v15  ;;  %v603_v20 = vpack.c.bf16 %v431_v16, %v431_v16  ;;  %v429_v21 = vmul.f32 %v692_v17, %v806_v43 }
 0x112   : > { %468 = vst.msk [vmem:[%s201_s24 + $0xc] sm:$0xf] %vm464_vm2, %v599_v18  ;;  %v597_v22 = vpack.c.bf16 %v425_v19, %v425_v19 }
 0x113   : > { %473 = vst.msk [vmem:[%s201_s24 + $0x1c] sm:$0x3] %vm472_vm3, %v603_v20  ;;  %v601_v23 = vpack.c.bf16 %v429_v21, %v429_v21 }
 0x114   : > { %466 = vst.msk [vmem:[%s201_s24 + $0x4] sm:$0xf] %vm464_vm2, %v597_v22 }
 0x115   : > { %470 = vst.msk [vmem:[%s201_s24 + $0x14] sm:$0xf] %vm464_vm2, %v601_v23 }
 0x116 PF: > { %s13_s14 = sadd.s32 1, %s715_s14   ;;  %s838_s12 = smov %s711_s13 }
 0x117   : > { %p10_p5 = scmp.ge.s32.totalorder %s13_s14, 4   ;;  %s839_s13 = smov %s841_s15 }
 0x119   :  { %12 = sbr.rel (!%p10_p5) target bundleno = 2 (0x2), region = 62 }

// kernel: lgtt_forward.22
= control target key start
LH: loop header
LB: loop body
LE: loop exit
PB: predicated region body
PF: predicated region fallthrough
CT: control target
= control target key end

     0   :  { %s663_s15 = smov 0   ;;  %s665_s16 = smov 0   ;;  %s723_s0 = inlined_call_operand.vmem [shape: bf16[2,60,64], index: 0, kind: input, shape index: {}]   ;;  %s724_s1 = inlined_call_operand.vmem [shape: bf16[30,60], index: 1, kind: input, shape index: {}]   ;;  %s725_s2 = inlined_call_operand.vmem [shape: f32[30,1], index: 2, kind: input, shape index: {}]   ;;  %s726_s3 = inlined_call_operand.vmem [shape: bf16[2,30,64], index: 3, kind: input, shape index: {}]   ;;  %s727_s4 = inlined_call_operand.vmem [shape: bf16[2,30,64], index: 4, kind: output, shape index: {}]  }
   0x1   :  { %s667_s17 = smov 0  }
   0x2 LB: > { %s26_s18 = sadd.s32 1, %s631_s16  ;;  %p529_p0 = scmp.ge.s32.totalorder %s635_s17, 1  ;;  %s635_s17 = sphi %s667_s17, %s14_s17   ;;  %s631_s16 = sphi %s665_s16, %s729_s16   ;;  %s627_s15 = sphi %s663_s15, %s728_s15  }
   0x3   : > { %p28_p1 = scmp.ge.s32.totalorder %s26_s18, 2  ;;  %p196_p2 = scmp.lt.s32.totalorder %s635_s17, 3 }
   0x5   : > { %s731_s18 = smov (%p28_p1, %s26_s18), 0  ;;  %p197_p3 = pnand %p529_p0, %p196_p2 }
   0x6   : > { %p236_p4 = scmp.lt.s32.totalorder (!%p197_p3), %s627_s15, 1  ;;  %v611_v0 = vld [vmem:[%s724_s1] sm:$0xff] (!%p197_p3)   ;;  %vm330_vm0 = vcmask (!%p197_p3), 490496   ;;  %v275_v1 = vld [vmem:[%s725_s2 + $0x10] sm:$0xff] (!%p197_p3)  ;;  %v637_v3 = vmov (!%p197_p3), 0   ;;  %v274_v5 = vld [vmem:[%s725_s2 + $0x8] sm:$0xff] (!%p197_p3) }
   0x7   : > { %200 = sbr.rel (%p197_p3) target bundleno = 256 (0x100), region = 36  ;;  %v273_v2 = vld [vmem:[%s725_s2] sm:$0xff] (!%p197_p3)  ;;  %575 = vmatprep.mubr.msk.bf16.mxu0 (!%p197_p3), %vm330_vm0, %v611_v0  ;;  %606 = vset.pattern.permute.xlu1 (!%p197_p3), %v637_v3  ;;  %v276_v4 = vld [vmem:[%s725_s2 + $0x18] sm:$0x3f] (!%p197_p3)  ;;  %vm337_vm1 = vcmask (!%p197_p3), 1045504   ;;  %vm418_vm2 = vcmask (!%p197_p3), 519168  }
   0x8   : > { %605 = vset.pattern.permute.xlu0 (!%p197_p3), %v637_v3  ;;  %289 = vperm.xlu1 (!%p197_p3), %606, %v275_v1   ;;  %v612_v11 = vld [vmem:[%s724_s1 + $0x8] sm:$0x7f] (!%p197_p3)   ;;  %vm422_vm3 = vcmask (!%p197_p3), 518144  }
   0x9   : > { %279 = vperm.xlu0 (!%p197_p3), %605, %v273_v2  }
   0xc   : > { %294 = vperm.xlu1 (!%p197_p3), %606, %v276_v4  }
   0xd   : > { %284 = vperm.xlu0 (!%p197_p3), %605, %v274_v5  }
   0xe   : > { %s733_s15 = smov (!%p236_p4, %s627_s15), 1 }
   0xf   : > { %s550_s25 = sshll.u32 %s733_s15, 5  ;;  %s551_s9 = sshll.u32 %s733_s15, 4 }
  0x10   : > { %s243_s28 = scalar_lea.vmem %s723_s0, %s550_s25  ;;  %s251_s12 = scalar_lea.vmem %s726_s3, %s551_s9 }
  0x11   : > { %v607_v6 = vld [vmem:[%s243_s28] sm:$0xff]   ;;  %v608_v7 = vld [vmem:[%s243_s28 + $0x8] sm:$0xff]   ;;  %v609_v8 = vld [vmem:[%s243_s28 + $0x10] sm:$0xff]   ;;  %s259_s15 = scalar_lea.vmem %s727_s4, %s551_s9 }
  0x12   : > { %567 = vmatprep.subr.bf16.mxu0 %v607_v6  ;;  %v610_v9 = vld [vmem:[%s243_s28 + $0x18] sm:$0x3f]   ;;  %v392_v13 = vld [vmem:[%s251_s12 + $0x8] sm:$0xf]  ;;  %v558_v15 = vld [vmem:[%s251_s12] sm:$0xff]  }
  0x13   : > { %568 = vmatpush3.bf16.msra.mxu0 %v607_v6  ;;  %v339_v10 = vsel %vm337_vm1, %v610_v9, 0  ;;  %v393_v16 = vld [vmem:[%s251_s12 + $0xc] sm:$0x7]  ;;  %v396_v17 = vunpack.c.l.bf16 %v392_v13  ;;  %v559_v19 = vunpack.c.l.bf16 %v558_v15  ;;  %v560_v26 = vunpack.c.h.bf16 %v558_v15 }
  0x14   : > { %569 = vmatprep.subr.bf16.mxu0 %v608_v7  ;;  %v397_v22 = vunpack.c.l.bf16 %v393_v16 }
  0x17   : > { %570 = vmatpush3.bf16.msra.mxu0 %v608_v7 }
  0x18   : > { %571 = vmatprep.subr.bf16.mxu0 %v609_v8 }
  0x1b   : > { %572 = vmatpush3.bf16.msra.mxu0 %v609_v8 }
  0x1c   : > { %579 = vmatprep.subr.msk.bf16.mxu0 %vm337_vm1, %v610_v9 }
  0x1f   : > { %574 = vmatpush3.bf16.msra.mxu0 %v339_v10 }
  0x22   : > { %576 = vmatmul.mubr.msk.bf16.vlgmr.msra.gmra.mrb[0].mxu0 %vm330_vm0, %v612_v11 }
  0x87   : > { %v290_v12 = vpop.permute.xlu1 %289 }
  0x88   : > { %v280_v14 = vpop.permute.xlu0 %279 }
  0x8b   : > { %v295_v23 = vpop.permute.xlu1 %294 }
  0x8c   : > { %v285_v27 = vpop.permute.xlu0 %284 }
  0xf5   : > { %v577_v18 = vpop.f32.mrb[0].mxu0 }
  0xf6   : > { %v384_v20 = vadd.f32 %v577_v18, %v290_v12  ;;  %v375_v21 = vpop.f32.mrb[1].mxu0 }
  0xf7   : > { %v376_v24 = vadd.f32 %v375_v21, %v280_v14  ;;  %v578_v25 = vpop.f32.mrb[2].mxu0 }
  0xf8   : > { %v400_v28 = vadd.f32 %v396_v17, %v384_v20  ;;  %v387_v29 = vadd.f32 %v578_v25, %v295_v23  ;;  %v378_v30 = vpop.f32.mrb[3].mxu0 }
  0xf9   : > { %v398_v31 = vadd.f32 %v559_v19, %v376_v24  ;;  %v379_v32 = vadd.f32 %v378_v30, %v285_v27 }
  0xfa   : > { %v555_v33 = vpack.c.bf16 %v400_v28, %v400_v28  ;;  %v401_v34 = vadd.f32 %v397_v22, %v387_v29 }
  0xfb   : > { %v553_v35 = vpack.c.bf16 %v398_v31, %v398_v31  ;;  %v399_v36 = vadd.f32 %v560_v26, %v379_v32 }
  0xfc   : > { %421 = vst.msk [vmem:[%s259_s15 + $0x8] sm:$0xf] %vm418_vm2, %v555_v33  ;;  %v556_v37 = vpack.c.bf16 %v401_v34, %v401_v34 }
  0xfd   : > { %419 = vst.msk [vmem:[%s259_s15] sm:$0xf] %vm418_vm2, %v553_v35  ;;  %v554_v38 = vpack.c.bf16 %v399_v36, %v399_v36 }
  0xfe   : > { %423 = vst.msk [vmem:[%s259_s15 + $0xc] sm:$0x7] %vm422_vm3, %v556_v37 }
  0xff   : > { %420 = vst.msk [vmem:[%s259_s15 + $0x4] sm:$0xf] %vm418_vm2, %v554_v38 }
 0x100 PF: > { %s14_s17 = sadd.s32 1, %s635_s17   ;;  %s728_s15 = smov %s631_s16 }
 0x101   : > { %p11_p5 = scmp.ge.s32.totalorder %s14_s17, 4   ;;  %s729_s16 = smov %s731_s18 }
 0x103   :  { %13 = sbr.rel (!%p11_p5) target bundleno = 2 (0x2), region = 69 }

// kernel: lgtt_forward.31
= control target key start
LH: loop header
LB: loop body
LE: loop exit
PB: predicated region body
PF: predicated region fallthrough
CT: control target
= control target key end

     0   :  { %s1029_s12 = smov 0   ;;  %s1140_s0 = inlined_call_operand.vmem [shape: bf16[2,30,110], index: 0, kind: input, shape index: {}]   ;;  %s1141_s1 = inlined_call_operand.vmem [shape: bf16[9,12,30], index: 1, kind: input, shape index: {}]   ;;  %s1142_s2 = inlined_call_operand.vmem [shape: f32[12,1], index: 2, kind: input, shape index: {}]   ;;  %s1143_s3 = inlined_call_operand.vmem [shape: f32[2,12,80], index: 3, kind: output, shape index: {}]  }
   0x1 LB: > { %s810_s13 = sadd.s32 4294967295, %s996_s12   ;;  %p814_p0 = scmp.ge.s32.totalorder %s996_s12, 1  ;;  %s996_s12 = sphi %s1029_s12, %s13_s12  }
   0x2   : > { %p137_p1 = scmp.lt.s32.totalorder %s996_s12, 3 }
   0x4   : > { %p138_p2 = pnand %p814_p0, %p137_p1 }
   0x5   : > { %p161_p3 = scmp.lt.s32.totalorder (!%p138_p2), %s810_s13, 1  ;;  %v998_v0 = vmov (!%p138_p2), 0.0   ;;  %vm999_vm0 = vmmov (!%p138_p2), 0   ;;  %vm205_vm1 = vcmask (!%p138_p2), 1046528   ;;  %s1000_s18 = smov (!%p138_p2), 127   ;;  %vm201_vm2 = vcmask (!%p138_p2), 244736  }
   0x6   : > { %141 = sbr.rel (%p138_p2) target bundleno = 391 (0x187), region = 32  ;;  %886 = vmatprep.subr.bf16.mxu0 (!%p138_p2), %v998_v0  ;;  %894 = vmatprep.subr.bf16.mxu1 (!%p138_p2), %v998_v0  ;;  %s1001_s19 = smov (!%p138_p2), 126   ;;  %v982_v4 = vld [vmem:[%s1141_s1] sm:$0x3f] (!%p138_p2)   ;;  %v1008_v5 = vmov (!%p138_p2), 0   ;;  %vm751_vm3 = vcmask (!%p138_p2), 654336  }
   0x7   : > { %890 = vmatprep.mubr.msk.bf16.mxu0 (!%p138_p2), %vm999_vm0, %v998_v0  ;;  %898 = vmatprep.mubr.msk.bf16.mxu1 (!%p138_p2), %vm999_vm0, %v998_v0  ;;  %s1002_s22 = smov (!%p138_p2), 118   ;;  %s1003_s23 = smov (!%p138_p2), 117   ;;  %v737_v6 = vld [vmem:[%s1142_s2] sm:$0xff] (!%p138_p2)  ;;  %v738_v7 = vld [vmem:[%s1142_s2 + $0x8] sm:$0xf] (!%p138_p2)  ;;  %vm753_vm4 = vcmask (!%p138_p2), 650240  }
   0x8   : > { %s1004_s24 = smov (!%p138_p2), 116   ;;  %s1005_s25 = smov (!%p138_p2), 108   ;;  %977 = vset.pattern.permute.xlu0 (!%p138_p2), %v1008_v5  ;;  %978 = vset.pattern.permute.xlu1 (!%p138_p2), %v1008_v5  ;;  %v981_v13 = vld [vmem:[%s1141_s1 + $0x8] sm:$0x3f] (!%p138_p2)   ;;  %v983_v20 = vld [vmem:[%s1141_s1 + $0x10] sm:$0x3f] (!%p138_p2)  }
   0x9   : > { %s1006_s26 = smov (!%p138_p2), 107   ;;  %s1007_s27 = smov (!%p138_p2), 106   ;;  %v984_v21 = vld [vmem:[%s1141_s1 + $0x18] sm:$0x3f] (!%p138_p2)   ;;  %v985_v28 = vld [vmem:[%s1141_s1 + $0x20] sm:$0x3f] (!%p138_p2)  }
   0xa   : > { %v986_v29 = vld [vmem:[%s1141_s1 + $0x28] sm:$0x3f] (!%p138_p2)   ;;  %v987_v35 = vld [vmem:[%s1141_s1 + $0x30] sm:$0x3f] (!%p138_p2)   ;;  %v988_v36 = vld [vmem:[%s1141_s1 + $0x38] sm:$0x3f] (!%p138_p2)  }
   0xb   : > { %v989_v39 = vld [vmem:[%s1141_s1 + $0x40] sm:$0x3f] (!%p138_p2)  }
   0xd   : > { %s1145_s13 = smov (!%p161_p3, %s810_s13), 1 }
   0xe   : > { %s857_s14 = sshll.u32 %s1145_s13, 4 }
   0xf   : > { %s165_s17 = scalar_lea.vmem %s1140_s0, %s857_s14 }
  0x10   : > { %v979_v1 = vld [vmem:[%s165_s17] sm:$0xff]   ;;  %v980_v2 = vld [vmem:[%s165_s17 + $0x8] sm:$0x7f]  }
  0x11   : > { %196 = vrot.lane.b32.xlu0 %v979_v1, %s1000_s18  ;;  %311 = vrot.lane.b32.xlu1 %v979_v1, %s1001_s19  ;;  %v260_v3 = vsel %vm205_vm1, %v980_v2, 0 }
  0x12   : > { %895 = vmatpush3.bf16.msra.mxu1 %v979_v1 }
  0x13   : > { %896 = vmatprep.subr.bf16.mxu1 %v998_v0 }
  0x15   : > { %198 = vrot.lane.b32.xlu0 %v980_v2, %s1000_s18  ;;  %313 = vrot.lane.b32.xlu1 %v980_v2, %s1001_s19 }
  0x16   : > { %897 = vmatpush3.bf16.msra.mxu1 %v260_v3 }
  0x17   : > { %910 = vmatprep.subr.bf16.mxu1 %v998_v0 }
  0x19   : > { %373 = vrot.lane.b32.xlu0 %v979_v1, %s1002_s22  ;;  %435 = vrot.lane.b32.xlu1 %v979_v1, %s1003_s23 }
  0x1a   : > { %899 = vmatmul.mubr.msk.bf16.vlgmr.msra.gmra.mrb[0].mxu1 %vm201_vm2, %v982_v4 }
  0x1b   : > { %914 = vmatprep.mubr.msk.bf16.mxu1 %vm999_vm0, %v998_v0 }
  0x1d   : > { %375 = vrot.lane.b32.xlu0 %v980_v2, %s1002_s22  ;;  %437 = vrot.lane.b32.xlu1 %v980_v2, %s1003_s23 }
  0x21   : > { %497 = vrot.lane.b32.xlu0 %v979_v1, %s1004_s24  ;;  %559 = vrot.lane.b32.xlu1 %v979_v1, %s1005_s25 }
  0x25   : > { %499 = vrot.lane.b32.xlu0 %v980_v2, %s1004_s24  ;;  %561 = vrot.lane.b32.xlu1 %v980_v2, %s1005_s25 }
  0x29   : > { %621 = vrot.lane.b32.xlu0 %v979_v1, %s1006_s26  ;;  %683 = vrot.lane.b32.xlu1 %v979_v1, %s1007_s27 }
  0x2d   : > { %623 = vrot.lane.b32.xlu0 %v980_v2, %s1006_s26  ;;  %685 = vrot.lane.b32.xlu1 %v980_v2, %s1007_s27  ;;  %s170_s26 = scalar_lea.vmem %s1143_s3, %s857_s14 }
  0x31   : > { %741 = vperm.xlu0 %977, %v737_v6   ;;  %746 = vperm.xlu1 %978, %v738_v7  }
  0x83   : > { %v197_v8 = vpop.permute.xlu0 %196  ;;  %v312_v9 = vpop.permute.xlu1 %311 }
  0x84   : > { %887 = vmatpush3.bf16.msra.mxu0 %v197_v8 }
  0x85   : > { %888 = vmatprep.subr.bf16.mxu0 %v998_v0 }
  0x87   : > { %v199_v10 = vpop.permute.xlu0 %198  ;;  %v314_v11 = vpop.permute.xlu1 %313 }
  0x88   : > { %v207_v12 = vsel %vm205_vm1, %v199_v10, 0  ;;  %v320_v16 = vsel %vm205_vm1, %v314_v11, 0 }
  0x89   : > { %889 = vmatpush3.bf16.msra.mxu0 %v207_v12 }
  0x8a   : > { %902 = vmatprep.subr.bf16.mxu0 %v998_v0 }
  0x8b   : > { %v374_v14 = vpop.permute.xlu0 %373  ;;  %v436_v15 = vpop.permute.xlu1 %435 }
  0x8c   : > { %891 = vmatmul.mubr.msk.bf16.vlgmr.msra.gmra.mrb[0].mxu0 %vm201_vm2, %v981_v13  ;;  %911 = vmatpush3.bf16.msra.mxu1 %v374_v14 }
  0x8d   : > { %903 = vmatpush3.bf16.msra.mxu0 %v312_v9  ;;  %912 = vmatprep.subr.bf16.mxu1 %v998_v0 }
  0x8e   : > { %904 = vmatprep.subr.bf16.mxu0 %v998_v0  ;;  %906 = vmatprep.mubr.msk.bf16.mxu0 %vm999_vm0, %v998_v0 }
  0x8f   : > { %v376_v17 = vpop.permute.xlu0 %375  ;;  %v438_v18 = vpop.permute.xlu1 %437 }
  0x90   : > { %v382_v19 = vsel %vm205_vm1, %v376_v17, 0  ;;  %v444_v24 = vsel %vm205_vm1, %v438_v18, 0 }
  0x91   : > { %905 = vmatpush3.bf16.msra.mxu0 %v320_v16  ;;  %913 = vmatpush3.bf16.msra.mxu1 %v382_v19 }
  0x92   : > { %918 = vmatprep.subr.bf16.mxu0 %v998_v0  ;;  %926 = vmatprep.subr.bf16.mxu1 %v998_v0 }
  0x93   : > { %v498_v22 = vpop.permute.xlu0 %497  ;;  %v560_v23 = vpop.permute.xlu1 %559 }
  0x94   : > { %907 = vmatmul.mubr.msk.bf16.vlgmr.msra.gmra.mrb[4].mxu0 %vm201_vm2, %v983_v20  ;;  %915 = vmatmul.mubr.msk.bf16.vlgmr.msra.gmra.mrb[4].mxu1 %vm201_vm2, %v984_v21 }
  0x95   : > { %919 = vmatpush3.bf16.msra.mxu0 %v436_v15  ;;  %927 = vmatpush3.bf16.msra.mxu1 %v498_v22 }
  0x96   : > { %920 = vmatprep.subr.bf16.mxu0 %v998_v0  ;;  %928 = vmatprep.subr.bf16.mxu1 %v998_v0 }
  0x97   : > { %v500_v25 = vpop.permute.xlu0 %499  ;;  %922 = vmatprep.mubr.msk.bf16.mxu0 %vm999_vm0, %v998_v0  ;;  %930 = vmatprep.mubr.msk.bf16.mxu1 %vm999_vm0, %v998_v0  ;;  %v562_v26 = vpop.permute.xlu1 %561 }
  0x98   : > { %v506_v27 = vsel %vm205_vm1, %v500_v25, 0  ;;  %v568_v32 = vsel %vm205_vm1, %v562_v26, 0 }
  0x99   : > { %921 = vmatpush3.bf16.msra.mxu0 %v444_v24  ;;  %929 = vmatpush3.bf16.msra.mxu1 %v506_v27 }
  0x9a   : > { %934 = vmatprep.subr.bf16.mxu0 %v998_v0  ;;  %942 = vmatprep.subr.bf16.mxu1 %v998_v0 }
  0x9b   : > { %v622_v30 = vpop.permute.xlu0 %621  ;;  %v684_v31 = vpop.permute.xlu1 %683 }
  0x9c   : > { %923 = vmatmul.mubr.msk.bf16.vlgmr.msra.gmra.mrb[8].mxu0 %vm201_vm2, %v985_v28  ;;  %931 = vmatmul.mubr.msk.bf16.vlgmr.msra.gmra.mrb[8].mxu1 %vm201_vm2, %v986_v29 }
  0x9d   : > { %935 = vmatpush3.bf16.msra.mxu0 %v560_v23  ;;  %943 = vmatpush3.bf16.msra.mxu1 %v622_v30 }
  0x9e   : > { %936 = vmatprep.subr.bf16.mxu0 %v998_v0  ;;  %944 = vmatprep.subr.bf16.mxu1 %v998_v0 }
  0x9f   : > { %v624_v33 = vpop.permute.xlu0 %623  ;;  %938 = vmatprep.mubr.msk.bf16.mxu0 %vm999_vm0, %v998_v0  ;;  %946 = vmatprep.mubr.msk.bf16.mxu1 %vm999_vm0, %v998_v0  ;;  %v686_v37 = vpop.permute.xlu1 %685 }
  0xa0   : > { %v630_v34 = vsel %vm205_vm1, %v624_v33, 0  ;;  %v692_v38 = vsel %vm205_vm1, %v686_v37, 0 }
  0xa1   : > { %937 = vmatpush3.bf16.msra.mxu0 %v568_v32  ;;  %945 = vmatpush3.bf16.msra.mxu1 %v630_v34 }
  0xa2   : > { %950 = vmatprep.subr.bf16.mxu0 %v998_v0 }
  0xa4   : > { %939 = vmatmul.mubr.msk.bf16.vlgmr.msra.gmra.mrb[12].mxu0 %vm201_vm2, %v987_v35  ;;  %947 = vmatmul.mubr.msk.bf16.vlgmr.msra.gmra.mrb[12].mxu1 %vm201_vm2, %v988_v36 }
  0xa5   : > { %951 = vmatpush3.bf16.msra.mxu0 %v684_v31  ;;  %954 = vmatprep.mubr.msk.bf16.mxu0 %vm999_vm0, %v998_v0 }
  0xa6   : > { %952 = vmatprep.subr.bf16.mxu0 %v998_v0 }
  0xa9   : > { %953 = vmatpush3.bf16.msra.mxu0 %v692_v38 }
  0xac   : > { %955 = vmatmul.mubr.msk.bf16.vlgmr.msra.gmra.mrb[16].mxu0 %vm201_vm2, %v989_v39 }
  0xb0   : > { %v742_v23 = vpop.permute.xlu0 %741  ;;  %v747_v27 = vpop.permute.xlu1 %746 }
  0xed   : > { %v296_v40 = vpop.f32.mrb[0].mxu1 }
  0xee   : > { %v900_v41 = vpop.f32.mrb[1].mxu1 }
  0xef   : > { %v299_v42 = vpop.f32.mrb[2].mxu1 }
  0xf0   : > { %v901_v43 = vpop.f32.mrb[3].mxu1 }
 0x15f   : > { %v243_v44 = vpop.f32.mrb[0].mxu0 }
 0x160   : > { %v297_v45 = vadd.f32 %v296_v40, %v243_v44  ;;  %v892_v46 = vpop.f32.mrb[1].mxu0 }
 0x161   : > { %v246_v47 = vpop.f32.mrb[2].mxu0 }
 0x162   : > { %v300_v48 = vadd.f32 %v299_v42, %v246_v47  ;;  %v893_v49 = vpop.f32.mrb[3].mxu0 }
 0x167   : > { %v356_v50 = vpop.f32.mrb[4].mxu0  ;;  %v418_v51 = vpop.f32.mrb[4].mxu1 }
 0x168   : > { %v363_v52 = vadd.f32 %v356_v50, %v297_v45  ;;  %v908_v53 = vpop.f32.mrb[5].mxu0  ;;  %v916_v54 = vpop.f32.mrb[5].mxu1 }
 0x169   : > { %v359_v55 = vpop.f32.mrb[6].mxu0  ;;  %v421_v56 = vpop.f32.mrb[6].mxu1 }
 0x16a   : > { %v364_v57 = vadd.f32 %v359_v55, %v300_v48  ;;  %v425_v58 = vadd.f32 %v418_v51, %v363_v52  ;;  %v909_v59 = vpop.f32.mrb[7].mxu0  ;;  %v917_v60 = vpop.f32.mrb[7].mxu1 }
 0x16c   : > { %v426_v61 = vadd.f32 %v421_v56, %v364_v57 }
 0x16f   : > { %v480_v62 = vpop.f32.mrb[8].mxu0  ;;  %v542_v63 = vpop.f32.mrb[8].mxu1 }
 0x170   : > { %v487_v0 = vadd.f32 %v480_v62, %v425_v58  ;;  %v924_v1 = vpop.f32.mrb[9].mxu0  ;;  %v932_v2 = vpop.f32.mrb[9].mxu1 }
 0x171   : > { %v483_v3 = vpop.f32.mrb[10].mxu0  ;;  %v545_v4 = vpop.f32.mrb[10].mxu1 }
 0x172   : > { %v488_v5 = vadd.f32 %v483_v3, %v426_v61  ;;  %v549_v6 = vadd.f32 %v542_v63, %v487_v0  ;;  %v925_v7 = vpop.f32.mrb[11].mxu0  ;;  %v933_v8 = vpop.f32.mrb[11].mxu1 }
 0x174   : > { %v550_v9 = vadd.f32 %v545_v4, %v488_v5 }
 0x177   : > { %v604_v10 = vpop.f32.mrb[12].mxu0  ;;  %v666_v11 = vpop.f32.mrb[12].mxu1 }
 0x178   : > { %v611_v12 = vadd.f32 %v604_v10, %v549_v6  ;;  %v940_v13 = vpop.f32.mrb[13].mxu0  ;;  %v948_v14 = vpop.f32.mrb[13].mxu1 }
 0x179   : > { %v607_v15 = vpop.f32.mrb[14].mxu0  ;;  %v669_v16 = vpop.f32.mrb[14].mxu1 }
 0x17a   : > { %v612_v17 = vadd.f32 %v607_v15, %v550_v9  ;;  %v673_v18 = vadd.f32 %v666_v11, %v611_v12  ;;  %v941_v19 = vpop.f32.mrb[15].mxu0  ;;  %v949_v20 = vpop.f32.mrb[15].mxu1 }
 0x17c   : > { %v674_v21 = vadd.f32 %v669_v16, %v612_v17 }
 0x17f   : > { %v728_v22 = vpop.f32.mrb[16].mxu0 }
 0x180   : > { %v735_v24 = vadd.f32 %v728_v22, %v673_v18  ;;  %v956_v25 = vpop.f32.mrb[17].mxu0 }
 0x181   : > { %v731_v26 = vpop.f32.mrb[18].mxu0 }
 0x182   : > { %v736_v28 = vadd.f32 %v731_v26, %v674_v21  ;;  %v749_v29 = vadd.f32 %v742_v23, %v735_v24  ;;  %v957_v30 = vpop.f32.mrb[19].mxu0 }
 0x184   : > { %752 = vst.msk [vmem:[%s170_s26] sm:$0xff] %vm751_vm3, %v749_v29  ;;  %v750_v31 = vadd.f32 %v747_v27, %v736_v28 }
 0x186   : > { %754 = vst.msk [vmem:[%s170_s26 + $0x8] sm:$0xf] %vm753_vm4, %v750_v31 }
 0x187 PF: > { %s13_s12 = sadd.s32 1, %s996_s12  }
 0x188   : > { %p10_p4 = scmp.ge.s32.totalorder %s13_s12, 4  }
 0x18a   :  { %12 = sbr.rel (!%p10_p4) target bundleno = 1 (0x1), region = 70 }

</bundles_post_ra>
